<compile_context>
chip_gen: v7x
topology: tpu7x:2x2x1
jax: 0.10.0
libtpu: 0.0.40
codegen_flags: <defaults>
</compile_context>

<pallas_src>
import functools
import math

import jax
import jax.numpy as jnp
from jax import lax
from jax.experimental import pallas as pl
from jax.experimental.pallas import tpu as pltpu


def _layernorm_f32(v, g, b, eps):
    mu = jnp.mean(v, axis=-1, keepdims=True)
    var = jnp.mean((v - mu) ** 2, axis=-1, keepdims=True)
    return (v - mu) * lax.rsqrt(var + eps) * g + b


def resblock_kernel(x_ref,
                    w_in_ref, b_in_ref, w_out_ref, b_out_ref,
                    g1_ref, be1_ref,
                    w_fc_ref, b_fc_ref, w_proj_ref, b_proj_ref,
                    g2_ref, be2_ref,
                    o_ref,
                    attn_scratch,
                    *, nhead, head_dim, eps, block_b, seq):
    C = nhead * head_dim
    rows = block_b * seq
    bf16 = jnp.bfloat16

    # (Bb, T, C) bf16 -> (Bb*T, C) f32; LN / softmax / residual math stays f32.
    x = x_ref[...].reshape(rows, C).astype(jnp.float32)

    # ---------------- x = x + attn(ln_1(x)) ----------------
    h = _layernorm_f32(x, g1_ref[...], be1_ref[...], eps)
    qkv = jnp.dot(h.astype(bf16), w_in_ref[...],
                  preferred_element_type=jnp.float32) + b_in_ref[...]   # (rows, 3C) f32
    qkv3 = qkv.reshape(block_b, seq, 3 * C)   # major-dim reshape, free

    # Per-head attention, batched over the block-batch dim.  The 1/sqrt(hd)
    # scale is pre-folded into w_in / b_in on the host (fold_attention_scale).
    # Every column of attn_scratch is written every grid step (C == nhead*hd),
    # so no zero-init is needed; stores are lane-dense when head_dim % 128 == 0.
    for hi in range(nhead):                               # static, small trip count
        c0 = hi * head_dim
        q = qkv3[:, :, c0:c0 + head_dim].astype(bf16)
        k = qkv3[:, :, C + c0:C + c0 + head_dim].astype(bf16)
        v = qkv3[:, :, 2 * C + c0:2 * C + c0 + head_dim].astype(bf16)

        s = jnp.einsum('bqd,bkd->bqk', q, k,
                       preferred_element_type=jnp.float32)              # (Bb, T, T) f32
        s = s - jnp.max(s, axis=-1, keepdims=True)
        p = jnp.exp(s)                                                   # EUP
        p = p * pl.reciprocal(jnp.sum(p, axis=-1, keepdims=True), approx=True)
        o = jnp.einsum('bqk,bkd->bqd', p.astype(bf16), v,
                       preferred_element_type=jnp.float32)               # (Bb, T, hd) f32
        attn_scratch[:, :, c0:c0 + head_dim] = o.astype(bf16)            # aligned column slot

    attn = jnp.dot(attn_scratch[...].reshape(rows, C), w_out_ref[...],
                   preferred_element_type=jnp.float32) + b_out_ref[...]
    x1 = x + attn

    # ---------------- x = x + mlp(ln_2(x)) ----------------
    h2 = _layernorm_f32(x1, g2_ref[...], be2_ref[...], eps)
    fc = jnp.dot(h2.astype(bf16), w_fc_ref[...],
                 preferred_element_type=jnp.float32) + b_fc_ref[...]
    fc = fc * jax.nn.sigmoid(1.702 * fc)                                 # QuickGELU, f32
    mlp = jnp.dot(fc.astype(bf16), w_proj_ref[...],
                  preferred_element_type=jnp.float32) + b_proj_ref[...]

    o_ref[...] = (x1 + mlp).reshape(block_b, seq, C).astype(o_ref.dtype)


def _target_rows():
    """Target M = bb*T per generation: ~512 with 128 MiB VMEM (v5e/v6e),
    ~256 with 64 MiB (v7x) — same 256-wide MXU, half the VMEM."""
    try:
        vmem = pltpu.get_tpu_info().vmem_capacity_bytes
    except Exception:
        vmem = 64 << 20
    return 512 if vmem >= (100 << 20) else 256


def _pick_block_batch(B, T, target_rows):
    """Largest divisor of B with bb*T <= target_rows, keeping the batch grid
    >= 2 steps so both v7x TensorCores get work under "parallel" semantics."""
    cap = max(1, target_rows // max(T, 1))
    best = 1
    for d in range(1, B + 1):
        if B % d or d > cap:
            continue
        if B >= 2 and B // d < 2:
            continue
        best = d
    return best


def _vmem_limit_bytes(bb, T, C, nhead, weight_bytes, single_buffer_weights):
    rows = bb * T
    hd = C // nhead
    io = 2 * (2 * rows * C * 2)                        # x-in + out slabs, bf16, double-buffered
    w = weight_bytes * (1 if single_buffer_weights else 2)
    scratch = rows * C * 2                             # bf16 attention scratch
    interm = (3 * rows * C + 4 * rows * C + 4 * rows * C) * 4   # qkv + fc + f32 copies
    attn = 2 * bb * T * T * 4 + 3 * bb * T * hd * 2    # scores/probs f32 + q/k/v bf16 (per head)
    est = io + w + scratch + interm + attn
    return int(min(max(2 * est, 32 << 20), 64 << 20))  # clamp: portable on v5e/v6e/v7x


def _build_call(kernel, B, T, C, bb, nhead, weight_args, weight_bytes,
                single_buffer_weights):
    def weight_spec(a):
        nd = a.ndim
        idx = lambda i, _nd=nd: (0,) * _nd
        if single_buffer_weights:
            # Constant block index -> no re-DMA; single buffer halves weight VMEM.
            return pl.BlockSpec(a.shape, idx, pipeline_mode=pl.Buffered(1))
        return pl.BlockSpec(a.shape, idx)

    vmem_limit = _vmem_limit_bytes(bb, T, C, nhead, weight_bytes,
                                   single_buffer_weights)
    return pl.pallas_call(
        kernel,
        out_shape=jax.ShapeDtypeStruct((B, T, C), jnp.bfloat16),
        grid_spec=pltpu.PrefetchScalarGridSpec(
            num_scalar_prefetch=0,
            grid=(B // bb,),
            in_specs=[pl.BlockSpec((bb, T, C), lambda i: (i, 0, 0))]
                     + [weight_spec(a) for a in weight_args],
            out_specs=pl.BlockSpec((bb, T, C), lambda i: (i, 0, 0)),
            scratch_shapes=[pltpu.VMEM((bb, T, C), jnp.bfloat16)],
        ),
        compiler_params=pltpu.CompilerParams(
            dimension_semantics=("parallel",),
            vmem_limit_bytes=vmem_limit),
    )


def resblock_forward(x, params, *, nhead, eps=1e-5):
    """x: (B, T, C) f32/bf16.  `params` must already have the attention scale
    folded into w_in / b_in (see fold_attention_scale).  Returns bf16."""
    B, T, C = x.shape
    assert C % nhead == 0, "dim must be divisible by nhead"
    head_dim = C // nhead
    bb = _pick_block_batch(B, T, _target_rows())

    weight_args = (
        params["w_in"], params["b_in"], params["w_out"], params["b_out"],
        params["g1"], params["be1"],
        params["w_fc"], params["b_fc"], params["w_proj"], params["b_proj"],
        params["g2"], params["be2"],
    )
    weight_bytes = sum(int(a.size) * a.dtype.itemsize for a in weight_args)

    x_bf = x.astype(jnp.bfloat16)   # halve activation HBM traffic

    kernel = functools.partial(resblock_kernel, nhead=nhead, head_dim=head_dim,
                               eps=eps, block_b=bb, seq=T)

    last_err = None
    for single_buffer_weights in (True, False):
        try:
            call = _build_call(kernel, B, T, C, bb, nhead, weight_args,
                               weight_bytes, single_buffer_weights)
            return call(x_bf, *weight_args)
        except Exception as e:   # pl.Buffered(1) unsupported -> default buffering
            last_err = e
    raise last_err


def fold_attention_scale(params, nhead):
    """One-time host transform: fold 1/sqrt(head_dim) into the q columns of the
    in-projection so the kernel applies no per-row scaling."""
    C = params["g1"].shape[-1]
    scale = 1.0 / math.sqrt(C // nhead)
    w_in = params["w_in"].astype(jnp.float32)
    b_in = params["b_in"].astype(jnp.float32)
    w_in = w_in.at[:, :C].multiply(scale)
    b_in = b_in.at[:, :C].multiply(scale)
    out = dict(params)
    out["w_in"] = w_in.astype(params["w_in"].dtype)
    out["b_in"] = b_in.astype(params["b_in"].dtype)
    return out


def ref_forward(x, params, *, nhead, eps=1e-5):
    """Pure-JAX f32 reference mirroring the PyTorch module (unfolded params)."""
    B, T, C = x.shape
    hd = C // nhead
    f32 = lambda a: a.astype(jnp.float32)

    def ln(v, g, b):
        mu = v.mean(-1, keepdims=True)
        var = ((v - mu) ** 2).mean(-1, keepdims=True)
        return (v - mu) / jnp.sqrt(var + eps) * g + b

    h = ln(x, params["g1"], params["be1"])
    qkv = h @ f32(params["w_in"]) + params["b_in"]
    q, k, v = jnp.split(qkv, 3, axis=-1)

    def heads(t):  # (B,T,C) -> (B,H,T,hd)
        return t.reshape(B, T, nhead, hd).transpose(0, 2, 1, 3)

    q, k, v = heads(q), heads(k), heads(v)
    s = jnp.einsum("bhtd,bhsd->bhts", q, k) / (hd ** 0.5)
    p = jax.nn.softmax(s, axis=-1)
    o = jnp.einsum("bhts,bhsd->bhtd", p, v).transpose(0, 2, 1, 3).reshape(B, T, C)
    x = x + (o @ f32(params["w_out"]) + params["b_out"])

    h2 = ln(x, params["g2"], params["be2"])
    fc = h2 @ f32(params["w_fc"]) + params["b_fc"]
    fc = fc * jax.nn.sigmoid(1.702 * fc)
    return x + (fc @ f32(params["w_proj"]) + params["b_proj"])


def make_params(key, dim):
    ks = jax.random.split(key, 8)
    nb = lambda k, shape: (0.02 * jax.random.normal(k, shape)).astype(jnp.bfloat16)  # MXU weights
    nf = lambda k, shape: (0.02 * jax.random.normal(k, shape)).astype(jnp.float32)   # biases / LN
    # Linear weights stored pre-transposed as (in, out) so the kernel does x @ W.
    return {
        "w_in":   nb(ks[0], (dim, 3 * dim)),
        "b_in":   nf(ks[1], (1, 3 * dim)),
        "w_out":  nb(ks[2], (dim, dim)),
        "b_out":  nf(ks[3], (1, dim)),
        "g1":     jnp.ones((1, dim), jnp.float32),
        "be1":    jnp.zeros((1, dim), jnp.float32),
        "w_fc":   nb(ks[4], (dim, 4 * dim)),
        "b_fc":   nf(ks[5], (1, 4 * dim)),
        "w_proj": nb(ks[6], (4 * dim, dim)),
        "b_proj": nf(ks[7], (1, dim)),
        "g2":     jnp.ones((1, dim), jnp.float32),
        "be2":    jnp.zeros((1, dim), jnp.float32),
    }


if __name__ == "__main__":
    B, T, DIM, NHEAD = 2, 8, 256, 2   # head_dim = 128 (lane-aligned head slices)

    key = jax.random.PRNGKey(0)
    kx, kp = jax.random.split(key)
    x = jax.random.normal(kx, (B, T, DIM), dtype=jnp.float32)
    params = make_params(kp, DIM)
    kparams = fold_attention_scale(params, NHEAD)   # one-time host transform

    out = jax.block_until_ready(resblock_forward(x, kparams, nhead=NHEAD))

    ref = ref_forward(x, params, nhead=NHEAD)
    assert out.shape == (B, T, DIM)
    out_f32 = out.astype(jnp.float32)
    max_err = jnp.max(jnp.abs(out_f32 - ref))
    assert jnp.allclose(out_f32, ref, atol=4e-2, rtol=4e-2), \
        f"mismatch vs reference (max abs err {max_err})"

    print("KERNEL_OK")
</pallas_src>

<mosaic_0001>
module attributes {stable_mosaic.version = 11 : i64} {
  func.func @resblock_kernel(%arg0: i32, %arg1: memref<1x8x256xbf16, #tpu.memory_space<vmem>>, %arg2: memref<256x768xbf16, #tpu.memory_space<vmem>>, %arg3: memref<1x768xf32, #tpu.memory_space<vmem>>, %arg4: memref<256x256xbf16, #tpu.memory_space<vmem>>, %arg5: memref<1x256xf32, #tpu.memory_space<vmem>>, %arg6: memref<1x256xf32, #tpu.memory_space<vmem>>, %arg7: memref<1x256xf32, #tpu.memory_space<vmem>>, %arg8: memref<256x1024xbf16, #tpu.memory_space<vmem>>, %arg9: memref<1x1024xf32, #tpu.memory_space<vmem>>, %arg10: memref<1024x256xbf16, #tpu.memory_space<vmem>>, %arg11: memref<1x256xf32, #tpu.memory_space<vmem>>, %arg12: memref<1x256xf32, #tpu.memory_space<vmem>>, %arg13: memref<1x256xf32, #tpu.memory_space<vmem>>, %arg14: memref<1x8x256xbf16, #tpu.memory_space<vmem>>, %arg15: memref<1x8x256xbf16, #tpu.memory_space<vmem>>) attributes {dimension_semantics = [#tpu.dimension_semantics<parallel>], iteration_bounds = array<i64: 2>, scalar_prefetch = 0 : i64, scratch_operands = 1 : i64, tpu.core_type = #tpu.core_type<tc>, window_params = [{transform_indices = @transform_0, window_bounds = array<i64: 1, 8, 256>}, {pipeline_mode = #tpu.pipeline_mode<synchronous>, transform_indices = @transform_1, window_bounds = array<i64: 256, 768>}, {pipeline_mode = #tpu.pipeline_mode<synchronous>, transform_indices = @transform_2, window_bounds = array<i64: 1, 768>}, {pipeline_mode = #tpu.pipeline_mode<synchronous>, transform_indices = @transform_3, window_bounds = array<i64: 256, 256>}, {pipeline_mode = #tpu.pipeline_mode<synchronous>, transform_indices = @transform_4, window_bounds = array<i64: 1, 256>}, {pipeline_mode = #tpu.pipeline_mode<synchronous>, transform_indices = @transform_5, window_bounds = array<i64: 1, 256>}, {pipeline_mode = #tpu.pipeline_mode<synchronous>, transform_indices = @transform_6, window_bounds = array<i64: 1, 256>}, {pipeline_mode = #tpu.pipeline_mode<synchronous>, transform_indices = @transform_7, window_bounds = array<i64: 256, 1024>}, {pipeline_mode = #tpu.pipeline_mode<synchronous>, transform_indices = @transform_8, window_bounds = array<i64: 1, 1024>}, {pipeline_mode = #tpu.pipeline_mode<synchronous>, transform_indices = @transform_9, window_bounds = array<i64: 1024, 256>}, {pipeline_mode = #tpu.pipeline_mode<synchronous>, transform_indices = @transform_10, window_bounds = array<i64: 1, 256>}, {pipeline_mode = #tpu.pipeline_mode<synchronous>, transform_indices = @transform_11, window_bounds = array<i64: 1, 256>}, {pipeline_mode = #tpu.pipeline_mode<synchronous>, transform_indices = @transform_12, window_bounds = array<i64: 1, 256>}, {transform_indices = @transform_13, window_bounds = array<i64: 1, 8, 256>}]} {
    %c0 = arith.constant 0 : index
    %c0_0 = arith.constant 0 : index
    %c0_1 = arith.constant 0 : index
    %0 = vector.load %arg1[%c0, %c0_0, %c0_1] : memref<1x8x256xbf16, #tpu.memory_space<vmem>>, vector<1x8x256xbf16>
    %1 = vector.shape_cast %0 : vector<1x8x256xbf16> to vector<8x256xbf16>
    %2 = arith.extf %1 : vector<8x256xbf16> to vector<8x256xf32>
    %c0_2 = arith.constant 0 : index
    %c0_3 = arith.constant 0 : index
    %3 = vector.load %arg6[%c0_2, %c0_3] : memref<1x256xf32, #tpu.memory_space<vmem>>, vector<1x256xf32>
    %c0_4 = arith.constant 0 : index
    %c0_5 = arith.constant 0 : index
    %4 = vector.load %arg7[%c0_4, %c0_5] : memref<1x256xf32, #tpu.memory_space<vmem>>, vector<1x256xf32>
    %cst = arith.constant dense<0.000000e+00> : vector<8xf32>
    %5 = vector.multi_reduction <add>, %2, %cst [1] : vector<8x256xf32> to vector<8xf32>
    %6 = vector.shape_cast %5 : vector<8xf32> to vector<8x1xf32>
    %cst_6 = arith.constant 2.560000e+02 : f32
    %7 = vector.broadcast %cst_6 : f32 to vector<8x1xf32>
    %8 = arith.divf %6, %7 : vector<8x1xf32>
    %9 = vector.broadcast %8 : vector<8x1xf32> to vector<8x256xf32>
    %10 = arith.subf %2, %9 : vector<8x256xf32>
    %11 = arith.mulf %10, %10 : vector<8x256xf32>
    %cst_7 = arith.constant dense<0.000000e+00> : vector<8xf32>
    %12 = vector.multi_reduction <add>, %11, %cst_7 [1] : vector<8x256xf32> to vector<8xf32>
    %13 = vector.shape_cast %12 : vector<8xf32> to vector<8x1xf32>
    %cst_8 = arith.constant 2.560000e+02 : f32
    %14 = vector.broadcast %cst_8 : f32 to vector<8x1xf32>
    %15 = arith.divf %13, %14 : vector<8x1xf32>
    %16 = vector.broadcast %8 : vector<8x1xf32> to vector<8x256xf32>
    %17 = arith.subf %2, %16 : vector<8x256xf32>
    %cst_9 = arith.constant 9.99999974E-6 : f32
    %18 = vector.broadcast %cst_9 : f32 to vector<8x1xf32>
    %19 = arith.addf %15, %18 : vector<8x1xf32>
    %20 = math.rsqrt %19 : vector<8x1xf32>
    %21 = vector.broadcast %20 : vector<8x1xf32> to vector<8x256xf32>
    %22 = arith.mulf %17, %21 : vector<8x256xf32>
    %23 = vector.broadcast %3 : vector<1x256xf32> to vector<8x256xf32>
    %24 = arith.mulf %22, %23 : vector<8x256xf32>
    %25 = vector.broadcast %4 : vector<1x256xf32> to vector<8x256xf32>
    %26 = arith.addf %24, %25 : vector<8x256xf32>
    %27 = arith.truncf %26 : vector<8x256xf32> to vector<8x256xbf16>
    %c0_10 = arith.constant 0 : index
    %c0_11 = arith.constant 0 : index
    %28 = vector.load %arg2[%c0_10, %c0_11] : memref<256x768xbf16, #tpu.memory_space<vmem>>, vector<256x768xbf16>
    %cst_12 = arith.constant dense<0.000000e+00> : vector<8x768xf32>
    %29 = tpu.matmul %27, %28, %cst_12 {dimension_numbers = #tpu.dot_dimension_numbers<[1], [0], [0], [1], [0, 0, 1, 1], [], []>} : vector<8x256xbf16>, vector<256x768xbf16>, vector<8x768xf32> -> vector<8x768xf32>
    %c0_13 = arith.constant 0 : index
    %c0_14 = arith.constant 0 : index
    %30 = vector.load %arg3[%c0_13, %c0_14] : memref<1x768xf32, #tpu.memory_space<vmem>>, vector<1x768xf32>
    %31 = vector.broadcast %30 : vector<1x768xf32> to vector<8x768xf32>
    %32 = arith.addf %29, %31 : vector<8x768xf32>
    %33 = vector.shape_cast %32 : vector<8x768xf32> to vector<1x8x768xf32>
    %34 = vector.extract_strided_slice %33 {offsets = [0, 0, 0], sizes = [1, 8, 128], strides = [1, 1, 1]} : vector<1x8x768xf32> to vector<1x8x128xf32>
    %35 = arith.truncf %34 : vector<1x8x128xf32> to vector<1x8x128xbf16>
    %36 = vector.extract_strided_slice %33 {offsets = [0, 0, 256], sizes = [1, 8, 128], strides = [1, 1, 1]} : vector<1x8x768xf32> to vector<1x8x128xf32>
    %37 = arith.truncf %36 : vector<1x8x128xf32> to vector<1x8x128xbf16>
    %38 = vector.extract_strided_slice %33 {offsets = [0, 0, 512], sizes = [1, 8, 128], strides = [1, 1, 1]} : vector<1x8x768xf32> to vector<1x8x128xf32>
    %39 = arith.truncf %38 : vector<1x8x128xf32> to vector<1x8x128xbf16>
    "tpu.trace_start"() <{level = 10 : i32, message = "bqd,bkd->bqk"}> : () -> ()
    %cst_15 = arith.constant dense<0.000000e+00> : vector<1x8x8xf32>
    %40 = tpu.matmul %35, %37, %cst_15 {dimension_numbers = #tpu.dot_dimension_numbers<[2], [2], [1], [1], [0, 0, 0, 1, 1, 1], [0], [0]>} : vector<1x8x128xbf16>, vector<1x8x128xbf16>, vector<1x8x8xf32> -> vector<1x8x8xf32>
    "tpu.trace_stop"() : () -> ()
    %cst_16 = arith.constant dense<0xFF800000> : vector<1x8xf32>
    %41 = vector.multi_reduction <maximumf>, %40, %cst_16 [2] : vector<1x8x8xf32> to vector<1x8xf32>
    %42 = vector.shape_cast %41 : vector<1x8xf32> to vector<1x8x1xf32>
    %43 = vector.broadcast %42 : vector<1x8x1xf32> to vector<1x8x8xf32>
    %44 = arith.subf %40, %43 : vector<1x8x8xf32>
    %45 = math.exp %44 : vector<1x8x8xf32>
    %cst_17 = arith.constant dense<0.000000e+00> : vector<1x8xf32>
    %46 = vector.multi_reduction <add>, %45, %cst_17 [2] : vector<1x8x8xf32> to vector<1x8xf32>
    %47 = vector.shape_cast %46 : vector<1x8xf32> to vector<1x8x1xf32>
    %48 = tpu.reciprocal %47 {approx = true} : vector<1x8x1xf32> -> vector<1x8x1xf32>
    %49 = vector.broadcast %48 : vector<1x8x1xf32> to vector<1x8x8xf32>
    %50 = arith.mulf %45, %49 : vector<1x8x8xf32>
    %51 = arith.truncf %50 : vector<1x8x8xf32> to vector<1x8x8xbf16>
    "tpu.trace_start"() <{level = 10 : i32, message = "bqk,bkd->bqd"}> : () -> ()
    %cst_18 = arith.constant dense<0.000000e+00> : vector<1x8x128xf32>
    %52 = tpu.matmul %51, %39, %cst_18 {dimension_numbers = #tpu.dot_dimension_numbers<[2], [1], [1], [2], [0, 0, 0, 1, 1, 2], [0], [0]>} : vector<1x8x8xbf16>, vector<1x8x128xbf16>, vector<1x8x128xf32> -> vector<1x8x128xf32>
    "tpu.trace_stop"() : () -> ()
    %53 = arith.truncf %52 : vector<1x8x128xf32> to vector<1x8x128xbf16>
    %c0_19 = arith.constant 0 : index
    %c0_20 = arith.constant 0 : index
    %c0_21 = arith.constant 0 : index
    %54 = vector.load %arg15[%c0_19, %c0_20, %c0_21] : memref<1x8x256xbf16, #tpu.memory_space<vmem>>, vector<1x8x128xbf16>
    tpu.vector_store %arg15[%c0_19, %c0_20, %c0_21], %53 {strides = array<i32>} : memref<1x8x256xbf16, #tpu.memory_space<vmem>>, vector<1x8x128xbf16>,
    %55 = vector.extract_strided_slice %33 {offsets = [0, 0, 128], sizes = [1, 8, 128], strides = [1, 1, 1]} : vector<1x8x768xf32> to vector<1x8x128xf32>
    %56 = arith.truncf %55 : vector<1x8x128xf32> to vector<1x8x128xbf16>
    %57 = vector.extract_strided_slice %33 {offsets = [0, 0, 384], sizes = [1, 8, 128], strides = [1, 1, 1]} : vector<1x8x768xf32> to vector<1x8x128xf32>
    %58 = arith.truncf %57 : vector<1x8x128xf32> to vector<1x8x128xbf16>
    %59 = vector.extract_strided_slice %33 {offsets = [0, 0, 640], sizes = [1, 8, 128], strides = [1, 1, 1]} : vector<1x8x768xf32> to vector<1x8x128xf32>
    %60 = arith.truncf %59 : vector<1x8x128xf32> to vector<1x8x128xbf16>
    "tpu.trace_start"() <{level = 10 : i32, message = "bqd,bkd->bqk"}> : () -> ()
    %cst_22 = arith.constant dense<0.000000e+00> : vector<1x8x8xf32>
    %61 = tpu.matmul %56, %58, %cst_22 {dimension_numbers = #tpu.dot_dimension_numbers<[2], [2], [1], [1], [0, 0, 0, 1, 1, 1], [0], [0]>} : vector<1x8x128xbf16>, vector<1x8x128xbf16>, vector<1x8x8xf32> -> vector<1x8x8xf32>
    "tpu.trace_stop"() : () -> ()
    %cst_23 = arith.constant dense<0xFF800000> : vector<1x8xf32>
    %62 = vector.multi_reduction <maximumf>, %61, %cst_23 [2] : vector<1x8x8xf32> to vector<1x8xf32>
    %63 = vector.shape_cast %62 : vector<1x8xf32> to vector<1x8x1xf32>
    %64 = vector.broadcast %63 : vector<1x8x1xf32> to vector<1x8x8xf32>
    %65 = arith.subf %61, %64 : vector<1x8x8xf32>
    %66 = math.exp %65 : vector<1x8x8xf32>
    %cst_24 = arith.constant dense<0.000000e+00> : vector<1x8xf32>
    %67 = vector.multi_reduction <add>, %66, %cst_24 [2] : vector<1x8x8xf32> to vector<1x8xf32>
    %68 = vector.shape_cast %67 : vector<1x8xf32> to vector<1x8x1xf32>
    %69 = tpu.reciprocal %68 {approx = true} : vector<1x8x1xf32> -> vector<1x8x1xf32>
    %70 = vector.broadcast %69 : vector<1x8x1xf32> to vector<1x8x8xf32>
    %71 = arith.mulf %66, %70 : vector<1x8x8xf32>
    %72 = arith.truncf %71 : vector<1x8x8xf32> to vector<1x8x8xbf16>
    "tpu.trace_start"() <{level = 10 : i32, message = "bqk,bkd->bqd"}> : () -> ()
    %cst_25 = arith.constant dense<0.000000e+00> : vector<1x8x128xf32>
    %73 = tpu.matmul %72, %60, %cst_25 {dimension_numbers = #tpu.dot_dimension_numbers<[2], [1], [1], [2], [0, 0, 0, 1, 1, 2], [0], [0]>} : vector<1x8x8xbf16>, vector<1x8x128xbf16>, vector<1x8x128xf32> -> vector<1x8x128xf32>
    "tpu.trace_stop"() : () -> ()
    %74 = arith.truncf %73 : vector<1x8x128xf32> to vector<1x8x128xbf16>
    %c0_26 = arith.constant 0 : index
    %c0_27 = arith.constant 0 : index
    %c128 = arith.constant 128 : index
    %75 = vector.load %arg15[%c0_26, %c0_27, %c128] : memref<1x8x256xbf16, #tpu.memory_space<vmem>>, vector<1x8x128xbf16>
    tpu.vector_store %arg15[%c0_26, %c0_27, %c128], %74 {strides = array<i32>} : memref<1x8x256xbf16, #tpu.memory_space<vmem>>, vector<1x8x128xbf16>,
    %c0_28 = arith.constant 0 : index
    %c0_29 = arith.constant 0 : index
    %c0_30 = arith.constant 0 : index
    %76 = vector.load %arg15[%c0_28, %c0_29, %c0_30] : memref<1x8x256xbf16, #tpu.memory_space<vmem>>, vector<1x8x256xbf16>
    %77 = vector.shape_cast %76 : vector<1x8x256xbf16> to vector<8x256xbf16>
    %c0_31 = arith.constant 0 : index
    %c0_32 = arith.constant 0 : index
    %78 = vector.load %arg4[%c0_31, %c0_32] : memref<256x256xbf16, #tpu.memory_space<vmem>>, vector<256x256xbf16>
    %cst_33 = arith.constant dense<0.000000e+00> : vector<8x256xf32>
    %79 = tpu.matmul %77, %78, %cst_33 {dimension_numbers = #tpu.dot_dimension_numbers<[1], [0], [0], [1], [0, 0, 1, 1], [], []>} : vector<8x256xbf16>, vector<256x256xbf16>, vector<8x256xf32> -> vector<8x256xf32>
    %c0_34 = arith.constant 0 : index
    %c0_35 = arith.constant 0 : index
    %80 = vector.load %arg5[%c0_34, %c0_35] : memref<1x256xf32, #tpu.memory_space<vmem>>, vector<1x256xf32>
    %81 = vector.broadcast %80 : vector<1x256xf32> to vector<8x256xf32>
    %82 = arith.addf %79, %81 : vector<8x256xf32>
    %83 = arith.addf %2, %82 : vector<8x256xf32>
    %c0_36 = arith.constant 0 : index
    %c0_37 = arith.constant 0 : index
    %84 = vector.load %arg12[%c0_36, %c0_37] : memref<1x256xf32, #tpu.memory_space<vmem>>, vector<1x256xf32>
    %c0_38 = arith.constant 0 : index
    %c0_39 = arith.constant 0 : index
    %85 = vector.load %arg13[%c0_38, %c0_39] : memref<1x256xf32, #tpu.memory_space<vmem>>, vector<1x256xf32>
    %cst_40 = arith.constant dense<0.000000e+00> : vector<8xf32>
    %86 = vector.multi_reduction <add>, %83, %cst_40 [1] : vector<8x256xf32> to vector<8xf32>
    %87 = vector.shape_cast %86 : vector<8xf32> to vector<8x1xf32>
    %cst_41 = arith.constant 2.560000e+02 : f32
    %88 = vector.broadcast %cst_41 : f32 to vector<8x1xf32>
    %89 = arith.divf %87, %88 : vector<8x1xf32>
    %90 = vector.broadcast %89 : vector<8x1xf32> to vector<8x256xf32>
    %91 = arith.subf %83, %90 : vector<8x256xf32>
    %92 = arith.mulf %91, %91 : vector<8x256xf32>
    %cst_42 = arith.constant dense<0.000000e+00> : vector<8xf32>
    %93 = vector.multi_reduction <add>, %92, %cst_42 [1] : vector<8x256xf32> to vector<8xf32>
    %94 = vector.shape_cast %93 : vector<8xf32> to vector<8x1xf32>
    %cst_43 = arith.constant 2.560000e+02 : f32
    %95 = vector.broadcast %cst_43 : f32 to vector<8x1xf32>
    %96 = arith.divf %94, %95 : vector<8x1xf32>
    %97 = vector.broadcast %89 : vector<8x1xf32> to vector<8x256xf32>
    %98 = arith.subf %83, %97 : vector<8x256xf32>
    %cst_44 = arith.constant 9.99999974E-6 : f32
    %99 = vector.broadcast %cst_44 : f32 to vector<8x1xf32>
    %100 = arith.addf %96, %99 : vector<8x1xf32>
    %101 = math.rsqrt %100 : vector<8x1xf32>
    %102 = vector.broadcast %101 : vector<8x1xf32> to vector<8x256xf32>
    %103 = arith.mulf %98, %102 : vector<8x256xf32>
    %104 = vector.broadcast %84 : vector<1x256xf32> to vector<8x256xf32>
    %105 = arith.mulf %103, %104 : vector<8x256xf32>
    %106 = vector.broadcast %85 : vector<1x256xf32> to vector<8x256xf32>
    %107 = arith.addf %105, %106 : vector<8x256xf32>
    %108 = arith.truncf %107 : vector<8x256xf32> to vector<8x256xbf16>
    %c0_45 = arith.constant 0 : index
    %c0_46 = arith.constant 0 : index
    %109 = vector.load %arg8[%c0_45, %c0_46] : memref<256x1024xbf16, #tpu.memory_space<vmem>>, vector<256x1024xbf16>
    %cst_47 = arith.constant dense<0.000000e+00> : vector<8x1024xf32>
    %110 = tpu.matmul %108, %109, %cst_47 {dimension_numbers = #tpu.dot_dimension_numbers<[1], [0], [0], [1], [0, 0, 1, 1], [], []>} : vector<8x256xbf16>, vector<256x1024xbf16>, vector<8x1024xf32> -> vector<8x1024xf32>
    %c0_48 = arith.constant 0 : index
    %c0_49 = arith.constant 0 : index
    %111 = vector.load %arg9[%c0_48, %c0_49] : memref<1x1024xf32, #tpu.memory_space<vmem>>, vector<1x1024xf32>
    %112 = vector.broadcast %111 : vector<1x1024xf32> to vector<8x1024xf32>
    %113 = arith.addf %110, %112 : vector<8x1024xf32>
    %cst_50 = arith.constant 1.702000e+00 : f32
    %114 = vector.broadcast %cst_50 : f32 to vector<8x1024xf32>
    %115 = arith.mulf %114, %113 : vector<8x1024xf32>
    %116 = arith.negf %115 : vector<8x1024xf32>
    %117 = math.exp %116 : vector<8x1024xf32>
    %cst_51 = arith.constant 1.000000e+00 : f32
    %118 = vector.broadcast %cst_51 : f32 to vector<8x1024xf32>
    %119 = arith.addf %118, %117 : vector<8x1024xf32>
    %120 = arith.divf %118, %119 : vector<8x1024xf32>
    %121 = arith.mulf %113, %120 : vector<8x1024xf32>
    %122 = arith.truncf %121 : vector<8x1024xf32> to vector<8x1024xbf16>
    %c0_52 = arith.constant 0 : index
    %c0_53 = arith.constant 0 : index
    %123 = vector.load %arg10[%c0_52, %c0_53] : memref<1024x256xbf16, #tpu.memory_space<vmem>>, vector<1024x256xbf16>
    %cst_54 = arith.constant dense<0.000000e+00> : vector<8x256xf32>
    %124 = tpu.matmul %122, %123, %cst_54 {dimension_numbers = #tpu.dot_dimension_numbers<[1], [0], [0], [1], [0, 0, 1, 1], [], []>} : vector<8x1024xbf16>, vector<1024x256xbf16>, vector<8x256xf32> -> vector<8x256xf32>
    %c0_55 = arith.constant 0 : index
    %c0_56 = arith.constant 0 : index
    %125 = vector.load %arg11[%c0_55, %c0_56] : memref<1x256xf32, #tpu.memory_space<vmem>>, vector<1x256xf32>
    %126 = vector.broadcast %125 : vector<1x256xf32> to vector<8x256xf32>
    %127 = arith.addf %124, %126 : vector<8x256xf32>
    %128 = arith.addf %83, %127 : vector<8x256xf32>
    %129 = vector.shape_cast %128 : vector<8x256xf32> to vector<1x8x256xf32>
    %130 = arith.truncf %129 : vector<1x8x256xf32> to vector<1x8x256xbf16>
    %c0_57 = arith.constant 0 : index
    %c0_58 = arith.constant 0 : index
    %c0_59 = arith.constant 0 : index
    %131 = vector.load %arg14[%c0_57, %c0_58, %c0_59] : memref<1x8x256xbf16, #tpu.memory_space<vmem>>, vector<1x8x256xbf16>
    tpu.vector_store %arg14[%c0_57, %c0_58, %c0_59], %130 {strides = array<i32>} : memref<1x8x256xbf16, #tpu.memory_space<vmem>>, vector<1x8x256xbf16>,
    return
  }
  func.func @transform_0(%arg0: i32) -> (i32, i32, i32) {
    %c0_i32 = arith.constant 0 : i32
    %c0_i32_0 = arith.constant 0 : i32
    %c0_i32_1 = arith.constant 0 : i32
    return %arg0, %c0_i32, %c0_i32_0 : i32, i32, i32
  }
  func.func @transform_1(%arg0: i32) -> (i32, i32) {
    %c0_i32 = arith.constant 0 : i32
    %c0_i32_0 = arith.constant 0 : i32
    %c0_i32_1 = arith.constant 0 : i32
    return %c0_i32, %c0_i32_0 : i32, i32
  }
  func.func @transform_2(%arg0: i32) -> (i32, i32) {
    %c0_i32 = arith.constant 0 : i32
    %c0_i32_0 = arith.constant 0 : i32
    %c0_i32_1 = arith.constant 0 : i32
    return %c0_i32, %c0_i32_0 : i32, i32
  }
  func.func @transform_3(%arg0: i32) -> (i32, i32) {
    %c0_i32 = arith.constant 0 : i32
    %c0_i32_0 = arith.constant 0 : i32
    %c0_i32_1 = arith.constant 0 : i32
    return %c0_i32, %c0_i32_0 : i32, i32
  }
  func.func @transform_4(%arg0: i32) -> (i32, i32) {
    %c0_i32 = arith.constant 0 : i32
    %c0_i32_0 = arith.constant 0 : i32
    %c0_i32_1 = arith.constant 0 : i32
    return %c0_i32, %c0_i32_0 : i32, i32
  }
  func.func @transform_5(%arg0: i32) -> (i32, i32) {
    %c0_i32 = arith.constant 0 : i32
    %c0_i32_0 = arith.constant 0 : i32
    %c0_i32_1 = arith.constant 0 : i32
    return %c0_i32, %c0_i32_0 : i32, i32
  }
  func.func @transform_6(%arg0: i32) -> (i32, i32) {
    %c0_i32 = arith.constant 0 : i32
    %c0_i32_0 = arith.constant 0 : i32
    %c0_i32_1 = arith.constant 0 : i32
    return %c0_i32, %c0_i32_0 : i32, i32
  }
  func.func @transform_7(%arg0: i32) -> (i32, i32) {
    %c0_i32 = arith.constant 0 : i32
    %c0_i32_0 = arith.constant 0 : i32
    %c0_i32_1 = arith.constant 0 : i32
    return %c0_i32, %c0_i32_0 : i32, i32
  }
  func.func @transform_8(%arg0: i32) -> (i32, i32) {
    %c0_i32 = arith.constant 0 : i32
    %c0_i32_0 = arith.constant 0 : i32
    %c0_i32_1 = arith.constant 0 : i32
    return %c0_i32, %c0_i32_0 : i32, i32
  }
  func.func @transform_9(%arg0: i32) -> (i32, i32) {
    %c0_i32 = arith.constant 0 : i32
    %c0_i32_0 = arith.constant 0 : i32
    %c0_i32_1 = arith.constant 0 : i32
    return %c0_i32, %c0_i32_0 : i32, i32
  }
  func.func @transform_10(%arg0: i32) -> (i32, i32) {
    %c0_i32 = arith.constant 0 : i32
    %c0_i32_0 = arith.constant 0 : i32
    %c0_i32_1 = arith.constant 0 : i32
    return %c0_i32, %c0_i32_0 : i32, i32
  }
  func.func @transform_11(%arg0: i32) -> (i32, i32) {
    %c0_i32 = arith.constant 0 : i32
    %c0_i32_0 = arith.constant 0 : i32
    %c0_i32_1 = arith.constant 0 : i32
    return %c0_i32, %c0_i32_0 : i32, i32
  }
  func.func @transform_12(%arg0: i32) -> (i32, i32) {
    %c0_i32 = arith.constant 0 : i32
    %c0_i32_0 = arith.constant 0 : i32
    %c0_i32_1 = arith.constant 0 : i32
    return %c0_i32, %c0_i32_0 : i32, i32
  }
  func.func @transform_13(%arg0: i32) -> (i32, i32, i32) {
    %c0_i32 = arith.constant 0 : i32
    %c0_i32_0 = arith.constant 0 : i32
    %c0_i32_1 = arith.constant 0 : i32
    return %arg0, %c0_i32, %c0_i32_0 : i32, i32, i32
  }
}

module attributes {stable_mosaic.version = 11 : i64} {
  func.func @resblock_kernel(%arg0: i32, %arg1: memref<1x8x256xbf16, #tpu.memory_space<vmem>>, %arg2: memref<256x768xbf16, #tpu.memory_space<vmem>>, %arg3: memref<1x768xf32, #tpu.memory_space<vmem>>, %arg4: memref<256x256xbf16, #tpu.memory_space<vmem>>, %arg5: memref<1x256xf32, #tpu.memory_space<vmem>>, %arg6: memref<1x256xf32, #tpu.memory_space<vmem>>, %arg7: memref<1x256xf32, #tpu.memory_space<vmem>>, %arg8: memref<256x1024xbf16, #tpu.memory_space<vmem>>, %arg9: memref<1x1024xf32, #tpu.memory_space<vmem>>, %arg10: memref<1024x256xbf16, #tpu.memory_space<vmem>>, %arg11: memref<1x256xf32, #tpu.memory_space<vmem>>, %arg12: memref<1x256xf32, #tpu.memory_space<vmem>>, %arg13: memref<1x256xf32, #tpu.memory_space<vmem>>, %arg14: memref<1x8x256xbf16, #tpu.memory_space<vmem>>, %arg15: memref<1x8x256xbf16, #tpu.memory_space<vmem>>) attributes {dimension_semantics = [#tpu.dimension_semantics<parallel>], iteration_bounds = array<i64: 2>, scalar_prefetch = 0 : i64, scratch_operands = 1 : i64, tpu.core_type = #tpu.core_type<tc>, window_params = [{transform_indices = @transform_0, window_bounds = array<i64: 1, 8, 256>}, {pipeline_mode = #tpu.pipeline_mode<synchronous>, transform_indices = @transform_1, window_bounds = array<i64: 256, 768>}, {pipeline_mode = #tpu.pipeline_mode<synchronous>, transform_indices = @transform_2, window_bounds = array<i64: 1, 768>}, {pipeline_mode = #tpu.pipeline_mode<synchronous>, transform_indices = @transform_3, window_bounds = array<i64: 256, 256>}, {pipeline_mode = #tpu.pipeline_mode<synchronous>, transform_indices = @transform_4, window_bounds = array<i64: 1, 256>}, {pipeline_mode = #tpu.pipeline_mode<synchronous>, transform_indices = @transform_5, window_bounds = array<i64: 1, 256>}, {pipeline_mode = #tpu.pipeline_mode<synchronous>, transform_indices = @transform_6, window_bounds = array<i64: 1, 256>}, {pipeline_mode = #tpu.pipeline_mode<synchronous>, transform_indices = @transform_7, window_bounds = array<i64: 256, 1024>}, {pipeline_mode = #tpu.pipeline_mode<synchronous>, transform_indices = @transform_8, window_bounds = array<i64: 1, 1024>}, {pipeline_mode = #tpu.pipeline_mode<synchronous>, transform_indices = @transform_9, window_bounds = array<i64: 1024, 256>}, {pipeline_mode = #tpu.pipeline_mode<synchronous>, transform_indices = @transform_10, window_bounds = array<i64: 1, 256>}, {pipeline_mode = #tpu.pipeline_mode<synchronous>, transform_indices = @transform_11, window_bounds = array<i64: 1, 256>}, {pipeline_mode = #tpu.pipeline_mode<synchronous>, transform_indices = @transform_12, window_bounds = array<i64: 1, 256>}, {transform_indices = @transform_13, window_bounds = array<i64: 1, 8, 256>}]} {
    %c0 = arith.constant 0 : index
    %c0_0 = arith.constant 0 : index
    %c0_1 = arith.constant 0 : index
    %0 = vector.load %arg1[%c0, %c0_0, %c0_1] : memref<1x8x256xbf16, #tpu.memory_space<vmem>>, vector<1x8x256xbf16>
    %1 = vector.shape_cast %0 : vector<1x8x256xbf16> to vector<8x256xbf16>
    %2 = arith.extf %1 : vector<8x256xbf16> to vector<8x256xf32>
    %c0_2 = arith.constant 0 : index
    %c0_3 = arith.constant 0 : index
    %3 = vector.load %arg6[%c0_2, %c0_3] : memref<1x256xf32, #tpu.memory_space<vmem>>, vector<1x256xf32>
    %c0_4 = arith.constant 0 : index
    %c0_5 = arith.constant 0 : index
    %4 = vector.load %arg7[%c0_4, %c0_5] : memref<1x256xf32, #tpu.memory_space<vmem>>, vector<1x256xf32>
    %cst = arith.constant dense<0.000000e+00> : vector<8xf32>
    %5 = vector.multi_reduction <add>, %2, %cst [1] : vector<8x256xf32> to vector<8xf32>
    %6 = vector.shape_cast %5 : vector<8xf32> to vector<8x1xf32>
    %cst_6 = arith.constant 2.560000e+02 : f32
    %7 = vector.broadcast %cst_6 : f32 to vector<8x1xf32>
    %8 = arith.divf %6, %7 : vector<8x1xf32>
    %9 = vector.broadcast %8 : vector<8x1xf32> to vector<8x256xf32>
    %10 = arith.subf %2, %9 : vector<8x256xf32>
    %11 = arith.mulf %10, %10 : vector<8x256xf32>
    %cst_7 = arith.constant dense<0.000000e+00> : vector<8xf32>
    %12 = vector.multi_reduction <add>, %11, %cst_7 [1] : vector<8x256xf32> to vector<8xf32>
    %13 = vector.shape_cast %12 : vector<8xf32> to vector<8x1xf32>
    %cst_8 = arith.constant 2.560000e+02 : f32
    %14 = vector.broadcast %cst_8 : f32 to vector<8x1xf32>
    %15 = arith.divf %13, %14 : vector<8x1xf32>
    %16 = vector.broadcast %8 : vector<8x1xf32> to vector<8x256xf32>
    %17 = arith.subf %2, %16 : vector<8x256xf32>
    %cst_9 = arith.constant 9.99999974E-6 : f32
    %18 = vector.broadcast %cst_9 : f32 to vector<8x1xf32>
    %19 = arith.addf %15, %18 : vector<8x1xf32>
    %20 = math.rsqrt %19 : vector<8x1xf32>
    %21 = vector.broadcast %20 : vector<8x1xf32> to vector<8x256xf32>
    %22 = arith.mulf %17, %21 : vector<8x256xf32>
    %23 = vector.broadcast %3 : vector<1x256xf32> to vector<8x256xf32>
    %24 = arith.mulf %22, %23 : vector<8x256xf32>
    %25 = vector.broadcast %4 : vector<1x256xf32> to vector<8x256xf32>
    %26 = arith.addf %24, %25 : vector<8x256xf32>
    %27 = arith.truncf %26 : vector<8x256xf32> to vector<8x256xbf16>
    %c0_10 = arith.constant 0 : index
    %c0_11 = arith.constant 0 : index
    %28 = vector.load %arg2[%c0_10, %c0_11] : memref<256x768xbf16, #tpu.memory_space<vmem>>, vector<256x768xbf16>
    %cst_12 = arith.constant dense<0.000000e+00> : vector<8x768xf32>
    %29 = tpu.matmul %27, %28, %cst_12 {dimension_numbers = #tpu.dot_dimension_numbers<[1], [0], [0], [1], [0, 0, 1, 1], [], []>} : vector<8x256xbf16>, vector<256x768xbf16>, vector<8x768xf32> -> vector<8x768xf32>
    %c0_13 = arith.constant 0 : index
    %c0_14 = arith.constant 0 : index
    %30 = vector.load %arg3[%c0_13, %c0_14] : memref<1x768xf32, #tpu.memory_space<vmem>>, vector<1x768xf32>
    %31 = vector.broadcast %30 : vector<1x768xf32> to vector<8x768xf32>
    %32 = arith.addf %29, %31 : vector<8x768xf32>
    %33 = vector.shape_cast %32 : vector<8x768xf32> to vector<1x8x768xf32>
    %34 = vector.extract_strided_slice %33 {offsets = [0, 0, 0], sizes = [1, 8, 128], strides = [1, 1, 1]} : vector<1x8x768xf32> to vector<1x8x128xf32>
    %35 = arith.truncf %34 : vector<1x8x128xf32> to vector<1x8x128xbf16>
    %36 = vector.extract_strided_slice %33 {offsets = [0, 0, 256], sizes = [1, 8, 128], strides = [1, 1, 1]} : vector<1x8x768xf32> to vector<1x8x128xf32>
    %37 = arith.truncf %36 : vector<1x8x128xf32> to vector<1x8x128xbf16>
    %38 = vector.extract_strided_slice %33 {offsets = [0, 0, 512], sizes = [1, 8, 128], strides = [1, 1, 1]} : vector<1x8x768xf32> to vector<1x8x128xf32>
    %39 = arith.truncf %38 : vector<1x8x128xf32> to vector<1x8x128xbf16>
    "tpu.trace_start"() <{level = 10 : i32, message = "bqd,bkd->bqk"}> : () -> ()
    %cst_15 = arith.constant dense<0.000000e+00> : vector<1x8x8xf32>
    %40 = tpu.matmul %35, %37, %cst_15 {dimension_numbers = #tpu.dot_dimension_numbers<[2], [2], [1], [1], [0, 0, 0, 1, 1, 1], [0], [0]>} : vector<1x8x128xbf16>, vector<1x8x128xbf16>, vector<1x8x8xf32> -> vector<1x8x8xf32>
    "tpu.trace_stop"() : () -> ()
    %cst_16 = arith.constant dense<0xFF800000> : vector<1x8xf32>
    %41 = vector.multi_reduction <maximumf>, %40, %cst_16 [2] : vector<1x8x8xf32> to vector<1x8xf32>
    %42 = vector.shape_cast %41 : vector<1x8xf32> to vector<1x8x1xf32>
    %43 = vector.broadcast %42 : vector<1x8x1xf32> to vector<1x8x8xf32>
    %44 = arith.subf %40, %43 : vector<1x8x8xf32>
    %45 = math.exp %44 : vector<1x8x8xf32>
    %cst_17 = arith.constant dense<0.000000e+00> : vector<1x8xf32>
    %46 = vector.multi_reduction <add>, %45, %cst_17 [2] : vector<1x8x8xf32> to vector<1x8xf32>
    %47 = vector.shape_cast %46 : vector<1x8xf32> to vector<1x8x1xf32>
    %48 = tpu.reciprocal %47 {approx = true} : vector<1x8x1xf32> -> vector<1x8x1xf32>
    %49 = vector.broadcast %48 : vector<1x8x1xf32> to vector<1x8x8xf32>
    %50 = arith.mulf %45, %49 : vector<1x8x8xf32>
    %51 = arith.truncf %50 : vector<1x8x8xf32> to vector<1x8x8xbf16>
    "tpu.trace_start"() <{level = 10 : i32, message = "bqk,bkd->bqd"}> : () -> ()
    %cst_18 = arith.constant dense<0.000000e+00> : vector<1x8x128xf32>
    %52 = tpu.matmul %51, %39, %cst_18 {dimension_numbers = #tpu.dot_dimension_numbers<[2], [1], [1], [2], [0, 0, 0, 1, 1, 2], [0], [0]>} : vector<1x8x8xbf16>, vector<1x8x128xbf16>, vector<1x8x128xf32> -> vector<1x8x128xf32>
    "tpu.trace_stop"() : () -> ()
    %53 = arith.truncf %52 : vector<1x8x128xf32> to vector<1x8x128xbf16>
    %c0_19 = arith.constant 0 : index
    %c0_20 = arith.constant 0 : index
    %c0_21 = arith.constant 0 : index
    %54 = vector.load %arg15[%c0_19, %c0_20, %c0_21] : memref<1x8x256xbf16, #tpu.memory_space<vmem>>, vector<1x8x128xbf16>
    tpu.vector_store %arg15[%c0_19, %c0_20, %c0_21], %53 {strides = array<i32>} : memref<1x8x256xbf16, #tpu.memory_space<vmem>>, vector<1x8x128xbf16>,
    %55 = vector.extract_strided_slice %33 {offsets = [0, 0, 128], sizes = [1, 8, 128], strides = [1, 1, 1]} : vector<1x8x768xf32> to vector<1x8x128xf32>
    %56 = arith.truncf %55 : vector<1x8x128xf32> to vector<1x8x128xbf16>
    %57 = vector.extract_strided_slice %33 {offsets = [0, 0, 384], sizes = [1, 8, 128], strides = [1, 1, 1]} : vector<1x8x768xf32> to vector<1x8x128xf32>
    %58 = arith.truncf %57 : vector<1x8x128xf32> to vector<1x8x128xbf16>
    %59 = vector.extract_strided_slice %33 {offsets = [0, 0, 640], sizes = [1, 8, 128], strides = [1, 1, 1]} : vector<1x8x768xf32> to vector<1x8x128xf32>
    %60 = arith.truncf %59 : vector<1x8x128xf32> to vector<1x8x128xbf16>
    "tpu.trace_start"() <{level = 10 : i32, message = "bqd,bkd->bqk"}> : () -> ()
    %cst_22 = arith.constant dense<0.000000e+00> : vector<1x8x8xf32>
    %61 = tpu.matmul %56, %58, %cst_22 {dimension_numbers = #tpu.dot_dimension_numbers<[2], [2], [1], [1], [0, 0, 0, 1, 1, 1], [0], [0]>} : vector<1x8x128xbf16>, vector<1x8x128xbf16>, vector<1x8x8xf32> -> vector<1x8x8xf32>
    "tpu.trace_stop"() : () -> ()
    %cst_23 = arith.constant dense<0xFF800000> : vector<1x8xf32>
    %62 = vector.multi_reduction <maximumf>, %61, %cst_23 [2] : vector<1x8x8xf32> to vector<1x8xf32>
    %63 = vector.shape_cast %62 : vector<1x8xf32> to vector<1x8x1xf32>
    %64 = vector.broadcast %63 : vector<1x8x1xf32> to vector<1x8x8xf32>
    %65 = arith.subf %61, %64 : vector<1x8x8xf32>
    %66 = math.exp %65 : vector<1x8x8xf32>
    %cst_24 = arith.constant dense<0.000000e+00> : vector<1x8xf32>
    %67 = vector.multi_reduction <add>, %66, %cst_24 [2] : vector<1x8x8xf32> to vector<1x8xf32>
    %68 = vector.shape_cast %67 : vector<1x8xf32> to vector<1x8x1xf32>
    %69 = tpu.reciprocal %68 {approx = true} : vector<1x8x1xf32> -> vector<1x8x1xf32>
    %70 = vector.broadcast %69 : vector<1x8x1xf32> to vector<1x8x8xf32>
    %71 = arith.mulf %66, %70 : vector<1x8x8xf32>
    %72 = arith.truncf %71 : vector<1x8x8xf32> to vector<1x8x8xbf16>
    "tpu.trace_start"() <{level = 10 : i32, message = "bqk,bkd->bqd"}> : () -> ()
    %cst_25 = arith.constant dense<0.000000e+00> : vector<1x8x128xf32>
    %73 = tpu.matmul %72, %60, %cst_25 {dimension_numbers = #tpu.dot_dimension_numbers<[2], [1], [1], [2], [0, 0, 0, 1, 1, 2], [0], [0]>} : vector<1x8x8xbf16>, vector<1x8x128xbf16>, vector<1x8x128xf32> -> vector<1x8x128xf32>
    "tpu.trace_stop"() : () -> ()
    %74 = arith.truncf %73 : vector<1x8x128xf32> to vector<1x8x128xbf16>
    %c0_26 = arith.constant 0 : index
    %c0_27 = arith.constant 0 : index
    %c128 = arith.constant 128 : index
    %75 = vector.load %arg15[%c0_26, %c0_27, %c128] : memref<1x8x256xbf16, #tpu.memory_space<vmem>>, vector<1x8x128xbf16>
    tpu.vector_store %arg15[%c0_26, %c0_27, %c128], %74 {strides = array<i32>} : memref<1x8x256xbf16, #tpu.memory_space<vmem>>, vector<1x8x128xbf16>,
    %c0_28 = arith.constant 0 : index
    %c0_29 = arith.constant 0 : index
    %c0_30 = arith.constant 0 : index
    %76 = vector.load %arg15[%c0_28, %c0_29, %c0_30] : memref<1x8x256xbf16, #tpu.memory_space<vmem>>, vector<1x8x256xbf16>
    %77 = vector.shape_cast %76 : vector<1x8x256xbf16> to vector<8x256xbf16>
    %c0_31 = arith.constant 0 : index
    %c0_32 = arith.constant 0 : index
    %78 = vector.load %arg4[%c0_31, %c0_32] : memref<256x256xbf16, #tpu.memory_space<vmem>>, vector<256x256xbf16>
    %cst_33 = arith.constant dense<0.000000e+00> : vector<8x256xf32>
    %79 = tpu.matmul %77, %78, %cst_33 {dimension_numbers = #tpu.dot_dimension_numbers<[1], [0], [0], [1], [0, 0, 1, 1], [], []>} : vector<8x256xbf16>, vector<256x256xbf16>, vector<8x256xf32> -> vector<8x256xf32>
    %c0_34 = arith.constant 0 : index
    %c0_35 = arith.constant 0 : index
    %80 = vector.load %arg5[%c0_34, %c0_35] : memref<1x256xf32, #tpu.memory_space<vmem>>, vector<1x256xf32>
    %81 = vector.broadcast %80 : vector<1x256xf32> to vector<8x256xf32>
    %82 = arith.addf %79, %81 : vector<8x256xf32>
    %83 = arith.addf %2, %82 : vector<8x256xf32>
    %c0_36 = arith.constant 0 : index
    %c0_37 = arith.constant 0 : index
    %84 = vector.load %arg12[%c0_36, %c0_37] : memref<1x256xf32, #tpu.memory_space<vmem>>, vector<1x256xf32>
    %c0_38 = arith.constant 0 : index
    %c0_39 = arith.constant 0 : index
    %85 = vector.load %arg13[%c0_38, %c0_39] : memref<1x256xf32, #tpu.memory_space<vmem>>, vector<1x256xf32>
    %cst_40 = arith.constant dense<0.000000e+00> : vector<8xf32>
    %86 = vector.multi_reduction <add>, %83, %cst_40 [1] : vector<8x256xf32> to vector<8xf32>
    %87 = vector.shape_cast %86 : vector<8xf32> to vector<8x1xf32>
    %cst_41 = arith.constant 2.560000e+02 : f32
    %88 = vector.broadcast %cst_41 : f32 to vector<8x1xf32>
    %89 = arith.divf %87, %88 : vector<8x1xf32>
    %90 = vector.broadcast %89 : vector<8x1xf32> to vector<8x256xf32>
    %91 = arith.subf %83, %90 : vector<8x256xf32>
    %92 = arith.mulf %91, %91 : vector<8x256xf32>
    %cst_42 = arith.constant dense<0.000000e+00> : vector<8xf32>
    %93 = vector.multi_reduction <add>, %92, %cst_42 [1] : vector<8x256xf32> to vector<8xf32>
    %94 = vector.shape_cast %93 : vector<8xf32> to vector<8x1xf32>
    %cst_43 = arith.constant 2.560000e+02 : f32
    %95 = vector.broadcast %cst_43 : f32 to vector<8x1xf32>
    %96 = arith.divf %94, %95 : vector<8x1xf32>
    %97 = vector.broadcast %89 : vector<8x1xf32> to vector<8x256xf32>
    %98 = arith.subf %83, %97 : vector<8x256xf32>
    %cst_44 = arith.constant 9.99999974E-6 : f32
    %99 = vector.broadcast %cst_44 : f32 to vector<8x1xf32>
    %100 = arith.addf %96, %99 : vector<8x1xf32>
    %101 = math.rsqrt %100 : vector<8x1xf32>
    %102 = vector.broadcast %101 : vector<8x1xf32> to vector<8x256xf32>
    %103 = arith.mulf %98, %102 : vector<8x256xf32>
    %104 = vector.broadcast %84 : vector<1x256xf32> to vector<8x256xf32>
    %105 = arith.mulf %103, %104 : vector<8x256xf32>
    %106 = vector.broadcast %85 : vector<1x256xf32> to vector<8x256xf32>
    %107 = arith.addf %105, %106 : vector<8x256xf32>
    %108 = arith.truncf %107 : vector<8x256xf32> to vector<8x256xbf16>
    %c0_45 = arith.constant 0 : index
    %c0_46 = arith.constant 0 : index
    %109 = vector.load %arg8[%c0_45, %c0_46] : memref<256x1024xbf16, #tpu.memory_space<vmem>>, vector<256x1024xbf16>
    %cst_47 = arith.constant dense<0.000000e+00> : vector<8x1024xf32>
    %110 = tpu.matmul %108, %109, %cst_47 {dimension_numbers = #tpu.dot_dimension_numbers<[1], [0], [0], [1], [0, 0, 1, 1], [], []>} : vector<8x256xbf16>, vector<256x1024xbf16>, vector<8x1024xf32> -> vector<8x1024xf32>
    %c0_48 = arith.constant 0 : index
    %c0_49 = arith.constant 0 : index
    %111 = vector.load %arg9[%c0_48, %c0_49] : memref<1x1024xf32, #tpu.memory_space<vmem>>, vector<1x1024xf32>
    %112 = vector.broadcast %111 : vector<1x1024xf32> to vector<8x1024xf32>
    %113 = arith.addf %110, %112 : vector<8x1024xf32>
    %cst_50 = arith.constant 1.702000e+00 : f32
    %114 = vector.broadcast %cst_50 : f32 to vector<8x1024xf32>
    %115 = arith.mulf %114, %113 : vector<8x1024xf32>
    %116 = arith.negf %115 : vector<8x1024xf32>
    %117 = math.exp %116 : vector<8x1024xf32>
    %cst_51 = arith.constant 1.000000e+00 : f32
    %118 = vector.broadcast %cst_51 : f32 to vector<8x1024xf32>
    %119 = arith.addf %118, %117 : vector<8x1024xf32>
    %120 = arith.divf %118, %119 : vector<8x1024xf32>
    %121 = arith.mulf %113, %120 : vector<8x1024xf32>
    %122 = arith.truncf %121 : vector<8x1024xf32> to vector<8x1024xbf16>
    %c0_52 = arith.constant 0 : index
    %c0_53 = arith.constant 0 : index
    %123 = vector.load %arg10[%c0_52, %c0_53] : memref<1024x256xbf16, #tpu.memory_space<vmem>>, vector<1024x256xbf16>
    %cst_54 = arith.constant dense<0.000000e+00> : vector<8x256xf32>
    %124 = tpu.matmul %122, %123, %cst_54 {dimension_numbers = #tpu.dot_dimension_numbers<[1], [0], [0], [1], [0, 0, 1, 1], [], []>} : vector<8x1024xbf16>, vector<1024x256xbf16>, vector<8x256xf32> -> vector<8x256xf32>
    %c0_55 = arith.constant 0 : index
    %c0_56 = arith.constant 0 : index
    %125 = vector.load %arg11[%c0_55, %c0_56] : memref<1x256xf32, #tpu.memory_space<vmem>>, vector<1x256xf32>
    %126 = vector.broadcast %125 : vector<1x256xf32> to vector<8x256xf32>
    %127 = arith.addf %124, %126 : vector<8x256xf32>
    %128 = arith.addf %83, %127 : vector<8x256xf32>
    %129 = vector.shape_cast %128 : vector<8x256xf32> to vector<1x8x256xf32>
    %130 = arith.truncf %129 : vector<1x8x256xf32> to vector<1x8x256xbf16>
    %c0_57 = arith.constant 0 : index
    %c0_58 = arith.constant 0 : index
    %c0_59 = arith.constant 0 : index
    %131 = vector.load %arg14[%c0_57, %c0_58, %c0_59] : memref<1x8x256xbf16, #tpu.memory_space<vmem>>, vector<1x8x256xbf16>
    tpu.vector_store %arg14[%c0_57, %c0_58, %c0_59], %130 {strides = array<i32>} : memref<1x8x256xbf16, #tpu.memory_space<vmem>>, vector<1x8x256xbf16>,
    return
  }
  func.func @transform_0(%arg0: i32) -> (i32, i32, i32) {
    %c0_i32 = arith.constant 0 : i32
    %c0_i32_0 = arith.constant 0 : i32
    %c0_i32_1 = arith.constant 0 : i32
    return %arg0, %c0_i32, %c0_i32_0 : i32, i32, i32
  }
  func.func @transform_1(%arg0: i32) -> (i32, i32) {
    %c0_i32 = arith.constant 0 : i32
    %c0_i32_0 = arith.constant 0 : i32
    %c0_i32_1 = arith.constant 0 : i32
    return %c0_i32, %c0_i32_0 : i32, i32
  }
  func.func @transform_2(%arg0: i32) -> (i32, i32) {
    %c0_i32 = arith.constant 0 : i32
    %c0_i32_0 = arith.constant 0 : i32
    %c0_i32_1 = arith.constant 0 : i32
    return %c0_i32, %c0_i32_0 : i32, i32
  }
  func.func @transform_3(%arg0: i32) -> (i32, i32) {
    %c0_i32 = arith.constant 0 : i32
    %c0_i32_0 = arith.constant 0 : i32
    %c0_i32_1 = arith.constant 0 : i32
    return %c0_i32, %c0_i32_0 : i32, i32
  }
  func.func @transform_4(%arg0: i32) -> (i32, i32) {
    %c0_i32 = arith.constant 0 : i32
    %c0_i32_0 = arith.constant 0 : i32
    %c0_i32_1 = arith.constant 0 : i32
    return %c0_i32, %c0_i32_0 : i32, i32
  }
  func.func @transform_5(%arg0: i32) -> (i32, i32) {
    %c0_i32 = arith.constant 0 : i32
    %c0_i32_0 = arith.constant 0 : i32
    %c0_i32_1 = arith.constant 0 : i32
    return %c0_i32, %c0_i32_0 : i32, i32
  }
  func.func @transform_6(%arg0: i32) -> (i32, i32) {
    %c0_i32 = arith.constant 0 : i32
    %c0_i32_0 = arith.constant 0 : i32
    %c0_i32_1 = arith.constant 0 : i32
    return %c0_i32, %c0_i32_0 : i32, i32
  }
  func.func @transform_7(%arg0: i32) -> (i32, i32) {
    %c0_i32 = arith.constant 0 : i32
    %c0_i32_0 = arith.constant 0 : i32
    %c0_i32_1 = arith.constant 0 : i32
    return %c0_i32, %c0_i32_0 : i32, i32
  }
  func.func @transform_8(%arg0: i32) -> (i32, i32) {
    %c0_i32 = arith.constant 0 : i32
    %c0_i32_0 = arith.constant 0 : i32
    %c0_i32_1 = arith.constant 0 : i32
    return %c0_i32, %c0_i32_0 : i32, i32
  }
  func.func @transform_9(%arg0: i32) -> (i32, i32) {
    %c0_i32 = arith.constant 0 : i32
    %c0_i32_0 = arith.constant 0 : i32
    %c0_i32_1 = arith.constant 0 : i32
    return %c0_i32, %c0_i32_0 : i32, i32
  }
  func.func @transform_10(%arg0: i32) -> (i32, i32) {
    %c0_i32 = arith.constant 0 : i32
    %c0_i32_0 = arith.constant 0 : i32
    %c0_i32_1 = arith.constant 0 : i32
    return %c0_i32, %c0_i32_0 : i32, i32
  }
  func.func @transform_11(%arg0: i32) -> (i32, i32) {
    %c0_i32 = arith.constant 0 : i32
    %c0_i32_0 = arith.constant 0 : i32
    %c0_i32_1 = arith.constant 0 : i32
    return %c0_i32, %c0_i32_0 : i32, i32
  }
  func.func @transform_12(%arg0: i32) -> (i32, i32) {
    %c0_i32 = arith.constant 0 : i32
    %c0_i32_0 = arith.constant 0 : i32
    %c0_i32_1 = arith.constant 0 : i32
    return %c0_i32, %c0_i32_0 : i32, i32
  }
  func.func @transform_13(%arg0: i32) -> (i32, i32, i32) {
    %c0_i32 = arith.constant 0 : i32
    %c0_i32_0 = arith.constant 0 : i32
    %c0_i32_1 = arith.constant 0 : i32
    return %arg0, %c0_i32, %c0_i32_0 : i32, i32, i32
  }
}

</mosaic_0001>

<bundles_post_ra>
// kernel: tpu_custom_call.1
= control target key start
LH: loop header
LB: loop body
LE: loop exit
PB: predicated region body
PF: predicated region fallthrough
CT: control target
= control target key end

     0   :  { %s5739_s0 = inlined_call_operand.hbm [shape: bf16[2,8,256], index: 0, kind: input, shape index: {}]   ;;  %s5740_s1 = inlined_call_operand.hbm [shape: bf16[256,768], index: 1, kind: input, shape index: {}]   ;;  %s5741_s2 = inlined_call_operand.vmem [shape: f32[1,768], index: 2, kind: input, shape index: {}]   ;;  %s5742_s3 = inlined_call_operand.hbm [shape: bf16[256,256], index: 3, kind: input, shape index: {}]   ;;  %s5743_s4 = inlined_call_operand.hbm [shape: f32[1,256], index: 4, kind: input, shape index: {}]   ;;  %s5744_s5 = inlined_call_operand.vmem [shape: f32[1,256], index: 5, kind: input, shape index: {}]   ;;  %s5745_s6 = inlined_call_operand.vmem [shape: f32[1,256], index: 6, kind: input, shape index: {}]   ;;  %s5746_s7 = inlined_call_operand.hbm [shape: bf16[256,1024], index: 7, kind: input, shape index: {}]   ;;  %s5747_s8 = inlined_call_operand.vmem [shape: f32[1,1024], index: 8, kind: input, shape index: {}]   ;;  %s5748_s9 = inlined_call_operand.hbm [shape: bf16[1024,256], index: 9, kind: input, shape index: {}]   ;;  %s5749_s10 = inlined_call_operand.vmem [shape: f32[1,256], index: 10, kind: input, shape index: {}]   ;;  %s5750_s11 = inlined_call_operand.vmem [shape: f32[1,256], index: 11, kind: input, shape index: {}]   ;;  %s5751_s12 = inlined_call_operand.vmem [shape: f32[1,256], index: 12, kind: input, shape index: {}]   ;;  %s5752_s13 = inlined_call_operand.hbm [shape: bf16[2,8,256], index: 13, kind: output, shape index: {}]  }
   0x1   :  { %5759 = sst [smem:[#allocation20_spill]] %s5747_s8 }
   0x2   :  { %5760 = sst [smem:[#allocation21_spill]] %s5749_s10 }
   0x3   :  { %5761 = sst [smem:[#allocation22_spill]] %s5750_s11 }
   0x4   :  { %5762 = sst [smem:[#allocation23_spill]] %s5751_s12 }
   0x5   :  { %5763 = sst [smem:[#allocation24_spill]] %s5752_s13 }
   0x6   :  { %18 = vsyncpa [#allocation4], 0 }
   0x7   :  { %20 = vsyncpa [#allocation4 + $0x1], 0 }
   0x8   :  { %21 = vsyncpa [#allocation7], 0 }
   0x9   :  { %22 = vsyncpa [#allocation10], 0 }
   0xa   :  { %23 = vsyncpa [#allocation13], 0 }
   0xb   :  { %24 = vsyncpa [#allocation5], 0 }
   0xc   :  { %26 = vsyncpa [#allocation5 + $0x1], 0  ;;  %s5279_s25 = smov 0   ;;  %s5281_s26 = smov 0  }
   0xd   :  { %s5283_s27 = smov 0   ;;  %s5285_s28 = smov 0  }
   0xe LB: > { %s5194_s29 = smov [#allocation6]   ;;  %s5300_s14 = sadd.s32 4294967295, %s5192_s28   ;;  %s5192_s28 = sphi %s5285_s28, %s5792_s28   ;;  %s5188_s27 = sphi %s5283_s27, %s5791_s27   ;;  %s5184_s26 = sphi %s5281_s26, %s5790_s26   ;;  %s5180_s25 = sphi %s5279_s25, %s5789_s25  }
   0xf   : > { %s353_s30 = sshll.u32 %s5194_s29, 4  ;;  %p3954_p0 = scmp.ge.s32.totalorder %s5192_s28, 1  ;;  %s5305_s30 = int_to_ptr.vmem [resolvable:$true] %s353_s30 }
  0x10   : > { %p5754_p1 = scmp.eq.s32.totalorder %s5300_s14, 0  ;;  %p341_p2 = scmp.lt.s32.totalorder %s5192_s28, 3 }
  0x11   : > { %s5195_s16 = smov [#allocation9]   ;;  %s5196_s19 = smov [#allocation8]  }
  0x12   : > { %p5307_p3 = pnand %p3954_p0, %p341_p2  ;;  %s383_s17 = sshll.u32 %s5195_s16, 4  ;;  %s5320_s17 = int_to_ptr.vmem [resolvable:$true] %s383_s17 }
  0x13   : > { %s369_s20 = sshll.u32 %s5196_s19, 4  ;;  %s4944_s23 = scalar_lea.hbm %s5740_s1, 12288  ;;  %s5322_s20 = int_to_ptr.vmem [resolvable:$true] %s369_s20 }
  0x14   : > { %s5764_s15 = scalar_select %p5307_p3, 1, 0 }
  0x15   : > { %p4433_p5 = pneg %p5307_p3  ;;  %p4945_p7 = scmp.ne.s32.totalorder %s5740_s1, %s4944_s23 }
  0x16   : > { %p4951_p11 = scmp.lt.u32.totalorder %s4944_s23, %s5740_s1 }
  0x17   : > { %p5316_p6 = pnand %p4433_p5, %p5754_p1 }
  0x19   : > { %p5332_p8 = pneg %p5316_p6 }
  0x1b   : > { %p4947_p9 = pnand %p5332_p8, %p4945_p7 }
  0x1d   : > { %p4948_p10 = pneg %p4947_p9 }
  0x1f   : > { %p4953_p12 = pnand %p4951_p11, %p4948_p10 }
  0x21   : > { %4956 = shalt.err (!%p4953_p12)
}
  0x22   : > { %s4957_s21 = scalar_lea.vmem %s5305_s30, 12288  ;;  %p4965_p5 = scmp.lt.s32.totalorder %s5305_s30, %s5305_s30 }
  0x23   : > { %p4958_p13 = scmp.ne.s32.totalorder %s5305_s30, %s4957_s21  ;;  %p4966_p4 = scmp.lt.s32.totalorder %s4957_s21, %s4957_s21 }
  0x25   : > { %p4960_p0 = pnand %p4958_p13, %p5332_p8  ;;  %p4967_p7 = por %p4966_p4, %p4965_p5 }
  0x27   : > { %p4961_p2 = pneg %p4960_p0 }
  0x29   : > { %p4968_p9 = pnand %p4967_p7, %p4961_p2 }
  0x2b   : > { %4971 = shalt.err (!%p4968_p9)
}
  0x2c   : > { %s5197_s22 = smov 384   ;;  %s5198_s13 = smov 24  }
  0x2d   : > { %4436 = dma.hbm_to_vmem [thread:$0]  (!%p5316_p6), %s5740_s1, 12288, %s5305_s30, [#allocation7], %s5197_s22, %s5197_s22, %s5198_s13  }
  0x2e   : > { %s4972_s10 = scalar_lea.hbm %s5743_s4, 32 }
  0x2f   : > { %p4973_p4 = scmp.ne.s32.totalorder %s5743_s4, %s4972_s10  ;;  %p4979_p12 = scmp.lt.u32.totalorder %s4972_s10, %s5743_s4 }
  0x31   : > { %p4975_p10 = pnand %p4973_p4, %p5332_p8 }
  0x33   : > { %p4976_p11 = pneg %p4975_p10 }
  0x35   : > { %p4981_p13 = pnand %p4979_p12, %p4976_p11 }
  0x37   : > { %4984 = shalt.err (!%p4981_p13)
}
  0x38   : > { %s4985_s30 = scalar_lea.vmem %s5320_s17, 32  ;;  %p4993_p7 = scmp.lt.s32.totalorder %s5320_s17, %s5320_s17 }
  0x39   : > { %p4986_p0 = scmp.ne.s32.totalorder %s5320_s17, %s4985_s30  ;;  %p4994_p9 = scmp.lt.s32.totalorder %s4985_s30, %s4985_s30 }
  0x3b   : > { %p4988_p2 = pnand %p4986_p0, %p5332_p8  ;;  %p4995_p4 = por %p4994_p9, %p4993_p7 }
  0x3d   : > { %p4989_p5 = pneg %p4988_p2 }
  0x3f   : > { %p4996_p10 = pnand %p4995_p4, %p4989_p5 }
  0x41   : > { %4999 = shalt.err (!%p4996_p10)
}
  0x42   : > { %4442 = dma.hbm_to_vmem [thread:$0]  (!%p5316_p6), %s5743_s4, 32, %s5320_s17, [#allocation10]  }
  0x43   : > { %s5000_s22 = scalar_lea.hbm %s5742_s3, 4096 }
  0x44   : > { %p5001_p11 = scmp.ne.s32.totalorder %s5742_s3, %s5000_s22  ;;  %p5007_p0 = scmp.lt.u32.totalorder %s5000_s22, %s5742_s3 }
  0x46   : > { %p5003_p12 = pnand %p5001_p11, %p5332_p8 }
  0x48   : > { %p5004_p13 = pneg %p5003_p12 }
  0x4a   : > { %p5009_p2 = pnand %p5007_p0, %p5004_p13 }
  0x4c   : > { %5012 = shalt.err (!%p5009_p2)
}
  0x4d   : > { %s5013_s17 = scalar_lea.vmem %s5322_s20, 4096  ;;  %p5021_p4 = scmp.lt.s32.totalorder %s5322_s20, %s5322_s20 }
  0x4e   : > { %p5014_p5 = scmp.ne.s32.totalorder %s5322_s20, %s5013_s17  ;;  %p5022_p10 = scmp.lt.s32.totalorder %s5013_s17, %s5013_s17 }
  0x50   : > { %p5016_p7 = pnand %p5014_p5, %p5332_p8  ;;  %p5023_p11 = por %p5022_p10, %p5021_p4 }
  0x52   : > { %p5017_p9 = pneg %p5016_p7 }
  0x54   : > { %p5024_p12 = pnand %p5023_p11, %p5017_p9 }
  0x56   : > { %5027 = shalt.err (!%p5024_p12)
}
  0x57   : > { %s5756_s19 = smov 128   ;;  %s5757_s21 = smov 8  }
  0x58   : > { %4439 = dma.hbm_to_vmem [thread:$0]  (!%p5316_p6), %s5742_s3, 4096, %s5322_s20, [#allocation7], %s5756_s19, %s5756_s19, %s5757_s21  }
  0x59   : > { %s5201_s10 = smov [#allocation11]   ;;  %s5028_s13 = scalar_lea.hbm %s5746_s7, 16384 }
  0x5a   : > { %s399_s11 = sshll.u32 %s5201_s10, 4  ;;  %p5029_p13 = scmp.ne.s32.totalorder %s5746_s7, %s5028_s13  ;;  %s400_s11 = int_to_ptr.vmem [resolvable:$true] %s399_s11 }
  0x5b   : > { %p5035_p5 = scmp.lt.u32.totalorder %s5028_s13, %s5746_s7 }
  0x5c   : > { %p5031_p0 = pnand %p5029_p13, %p5332_p8 }
  0x5e   : > { %p5032_p2 = pneg %p5031_p0 }
  0x60   : > { %p5037_p7 = pnand %p5035_p5, %p5032_p2 }
  0x62   : > { %5040 = shalt.err (!%p5037_p7)
}
  0x63   : > { %s5041_s20 = scalar_lea.vmem %s400_s11, 16384  ;;  %p5049_p11 = scmp.lt.s32.totalorder %s400_s11, %s400_s11 }
  0x64   : > { %p5042_p9 = scmp.ne.s32.totalorder %s400_s11, %s5041_s20  ;;  %p5050_p12 = scmp.lt.s32.totalorder %s5041_s20, %s5041_s20 }
  0x66   : > { %p5044_p4 = pnand %p5042_p9, %p5332_p8  ;;  %p5051_p1 = por %p5050_p12, %p5049_p11 }
  0x68   : > { %p5045_p10 = pneg %p5044_p4 }
  0x6a   : > { %p5052_p3 = pnand %p5051_p1, %p5045_p10 }
  0x6c   : > { %5055 = shalt.err (!%p5052_p3)
}
  0x6d   : > { %s5202_s30 = smov 512   ;;  %s5203_s8 = smov 32  }
  0x6e   : > { %4445 = dma.hbm_to_vmem [thread:$0]  (!%p5316_p6), %s5746_s7, 16384, %s400_s11, [#allocation10], %s5202_s30, %s5202_s30, %s5203_s8  }
  0x6f   : > { %s5204_s22 = smov [#allocation12]   ;;  %s5056_s29 = scalar_lea.hbm %s5748_s9, 16384 }
  0x70   : > { %s415_s13 = sshll.u32 %s5204_s22, 4  ;;  %p5057_p1 = scmp.ne.s32.totalorder %s5748_s9, %s5056_s29  ;;  %s416_s13 = int_to_ptr.vmem [resolvable:$true] %s415_s13 }
  0x71   : > { %p5063_p0 = scmp.lt.u32.totalorder %s5056_s29, %s5748_s9 }
  0x72   : > { %p5059_p3 = pnand %p5057_p1, %p5332_p8 }
  0x74   : > { %p5060_p13 = pneg %p5059_p3 }
  0x76   : > { %p5065_p2 = pnand %p5063_p0, %p5060_p13 }
  0x78   : > { %5068 = shalt.err (!%p5065_p2)
}
  0x79   : > { %s5069_s11 = scalar_lea.vmem %s416_s13, 16384  ;;  %p5077_p4 = scmp.lt.s32.totalorder %s416_s13, %s416_s13 }
  0x7a   : > { %p5070_p5 = scmp.ne.s32.totalorder %s416_s13, %s5069_s11  ;;  %p5078_p10 = scmp.lt.s32.totalorder %s5069_s11, %s5069_s11 }
  0x7c   : > { %p5072_p7 = pnand %p5070_p5, %p5332_p8  ;;  %p5079_p11 = por %p5078_p10, %p5077_p4 }
  0x7e   : > { %p5073_p9 = pneg %p5072_p7 }
  0x80   : > { %p5080_p12 = pnand %p5079_p11, %p5073_p9 }
  0x82   : > { %5083 = shalt.err (!%p5080_p12)
}
  0x83   : > { %s5767_s30 = smov 8   ;;  %s5768_s8 = smov 128  }
  0x84   : > { %4448 = dma.hbm_to_vmem [thread:$0]  (!%p5316_p6), %s5748_s9, 16384, %s416_s13, [#allocation13], %s5768_s8, %s5768_s8, %s5767_s30  }
  0x85   : > { %s3953_s18 = sadd.s32 4294967294, %s5192_s28   ;;  %s5443_s16 = sadd.s32 1, %s5192_s28  }
  0x86   : > { %s39_s10 = sadd.s32 1, %s5188_s27  ;;  %s36_s12 = ssub.s32 %s5192_s28, %s5443_s16 }
  0x87   : > { %p46_p8 = scmp.ne.s32.totalorder %s5188_s27, %s5184_s26  ;;  %p37_p1 = scmp.eq.s32.totalorder %s36_s12, 0 }
  0x88   : > { %p47_p3 = scmp.eq.s32.totalorder %s5192_s28, 0  ;;  %p52_p13 = scmp.ne.s32.totalorder %s5184_s26, %s5180_s25 }
  0x89   : > { %p328_p0 = scmp.eq.s32.totalorder %s5300_s14, 1  ;;  %p5769_p5 = scmp.eq.s32.totalorder %s5300_s14, 0 }
  0x8a   : > { %s5455_s22 = scalar_select %p37_p1, %s5188_s27, %s39_s10  }
  0x8b   : > { %p48_p2 = por %p47_p3, %p46_p8  ;;  %p5459_p7 = por %p5769_p5, %p52_p13 }
  0x8c   : > { %p5463_p6 = por %p328_p0, %p46_p8  ;;  %p334_p9 = scmp.eq.s32.totalorder %s3953_s18, 1 }
  0x8d   : > { %p4462_p4 = scmp.lt.s32.totalorder %s5192_s28, 2  ;;  %s438_s24 = sand.u32 1, %s5188_s27  }
  0x8e   : > { %s5771_s13 = scalar_select %p5463_p6, 1, 0 }
  0x8f   : > { %p5469_p10 = por %p334_p9, %p52_p13  ;;  %s3961_s17 = sshll.u32 %s438_s24, 3 }
  0x90   : > { %s4374_s20 = sshll.u32 %s5192_s28, 7  ;;  %s442_s19 = scalar_lea.vmem [#allocation3], %s3961_s17 }
  0x91   : > { %s5772_s29 = scalar_select %p5469_p10, 1, 0 }
  0x92   : > { %s5477_s8 = scalar_lea.hbm %s5739_s0, %s4374_s20  ;;  %s450_s21 = sshll.u32 %s442_s19, 4  ;;  %s5483_s21 = int_to_ptr.vmem [resolvable:$true] %s450_s21 }
  0x93   : > { %p5479_p11 = pnand %p4462_p4, %p48_p2  ;;  %s439_s10 = scalar_lea.sflag [#allocation4], %s438_s24 }
  0x94   : > { %s5084_s12 = scalar_lea.hbm %s5477_s8, 128  ;;  %s5089_s11 = scalar_lea.hbm %s5739_s0, 256 }
  0x95   : > { %p5085_p12 = scmp.ne.s32.totalorder %s5477_s8, %s5084_s12  ;;  %p5086_p8 = pneg %p5479_p11 }
  0x96   : > { %p5090_p13 = scmp.lt.u32.totalorder %s5477_s8, %s5739_s0  ;;  %p5091_p0 = scmp.lt.u32.totalorder %s5089_s11, %s5084_s12 }
  0x97   : > { %p5087_p1 = pnand %p5086_p8, %p5085_p12  ;;  %p5093_p5 = scmp.lt.u32.totalorder %s5084_s12, %s5477_s8 }
  0x98   : > { %p5092_p2 = por %p5091_p0, %p5090_p13 }
  0x99   : > { %p5088_p3 = pneg %p5087_p1 }
  0x9a   : > { %p5094_p9 = por %p5093_p5, %p5092_p2 }
  0x9c   : > { %p5095_p4 = pnand %p5094_p9, %p5088_p3 }
  0x9e   : > { %5098 = shalt.err (!%p5095_p4)
}
  0x9f   : > { %s5099_s24 = scalar_lea.vmem %s5483_s21, 128  ;;  %s5205_s20 = smov [#allocation3]  }
  0xa0   : > { %p5100_p12 = scmp.ne.s32.totalorder %s5483_s21, %s5099_s24  ;;  %s5104_s17 = sshll.u32 %s5205_s20, 4  ;;  %s5105_s17 = int_to_ptr.vmem [resolvable:$false] %s5104_s17 }
  0xa1   : > { %s5106_s30 = scalar_lea.vmem %s5105_s17, 256  ;;  %p5107_p6 = scmp.lt.s32.totalorder %s5483_s21, %s5105_s17 }
  0xa2   : > { %p5102_p1 = pnand %p5100_p12, %p5086_p8  ;;  %p5108_p13 = scmp.lt.s32.totalorder %s5106_s30, %s5099_s24 }
  0xa4   : > { %p5103_p10 = pneg %p5102_p1  ;;  %p5109_p0 = por %p5108_p13, %p5107_p6 }
  0xa6   : > { %p5110_p2 = pnand %p5109_p0, %p5103_p10 }
  0xa8   : > { %5113 = shalt.err (!%p5110_p2)
}
  0xa9   : > { %4452 = dma.hbm_to_vmem [thread:$0]  (!%p5479_p11), %s5477_s8, 128, %s5483_s21, %s439_s10  }
  0xaa   : > { %p5774_p3 = scmp.ne.s32.totalorder %s5764_s15, 0 }
  0xab   : > { %s5513_s12 = sand.u32 (!%p5774_p3), 1, %s5184_s26  }
  0xac   : > { %459 = sbr.rel (%p5774_p3) target bundleno = 2573 (0xa0d), region = 72  ;;  %s3965_s11 = sshll.u32 (!%p5774_p3), %s5513_s12, 3 }
  0xad   : > { %s462_s19 = scalar_lea.sflag (!%p5774_p3), [#allocation4], %s5513_s12  ;;  %s465_s24 = scalar_lea.vmem (!%p5774_p3), [#allocation3], %s3965_s11 }
  0xb3   : > { %5159 = dma.done.wait (%p5459_p7), %s462_s19, 128  }
  0xb4   : > { %5161 = vsyncadd (%p5459_p7), %s462_s19, 4294967168  ;;  %p5775_p6 = scmp.eq.s32.totalorder %s5300_s14, 0 }
  0xb6   : > { %5163 = dma.done.wait (%p5775_p6), [#allocation7], 16384   ;;  %p5776_p10 = pmov %p5775_p6 }
  0xb7   : > { %p5777_p11 = pmov %p5775_p6 }
  0xb8   : > { %5165 = vsyncadd (%p5776_p10), [#allocation7], 4294950912 }
  0xb9   : > { %5167 = dma.done.wait (%p5777_p11), [#allocation10], 16416   ;;  %p5778_p8 = pmov %p5775_p6 }
  0xba   : > { %p5779_p5 = pmov %p5775_p6 }
  0xbb   : > { %5169 = vsyncadd (%p5778_p8), [#allocation10], 4294950880 }
  0xbc   : > { %5171 = dma.done.wait (%p5779_p5), [#allocation13], 16384   ;;  %p5780_p9 = pmov %p5779_p5 }
  0xbd   : > { %v529_v0 = vld [vmem:[%s465_s24] sm:$0xff]  ;;  %v4517_v6 = vld [vmem:[#allocation6 + $0xc] ss:$24 sps:$4 sm:$0xff]   ;;  %v4519_v7 = vld [vmem:[#allocation6 + $0x8] ss:$24 sps:$4 sm:$0xff]   ;;  %vm5207_vm0 = vmmov 0  }
  0xbe   : > { %5173 = vsyncadd (%p5780_p9), [#allocation13], 4294950912  ;;  %v5535_v1 = vunpack.c.l.bf16 %v529_v0  ;;  %v5537_v2 = vunpack.c.h.bf16 %v529_v0  ;;  %v4514_v4 = vld [vmem:[#allocation6 + $0x4] ss:$24 sps:$4 sm:$0xff]   ;;  %v4516_v5 = vld [vmem:[#allocation6] ss:$24 sps:$4 sm:$0xff]   ;;  %1228 = vmatprep.subr.bf16.mxu1 %v4517_v6 }
  0xbf   : > { %v4520_v8 = vld [vmem:[#allocation6 + $0x34] ss:$24 sps:$4 sm:$0xff]   ;;  %1187 = vmatprep.subr.bf16.mxu0 %v4514_v4  ;;  %1229 = vmatpush1.bf16.msra.mxu1 %v4519_v7  ;;  %v4522_v10 = vld [vmem:[#allocation6 + $0x30] ss:$24 sps:$4 sm:$0xff]   ;;  %v4526_v12 = vld [vmem:[#allocation6 + $0x64] ss:$24 sps:$4 sm:$0xff]  }
  0xc0   : > { %v534_v3 = vadd.f32 %v5537_v2, %v5535_v1  ;;  %v4523_v9 = vld [vmem:[#allocation6 + $0x3c] ss:$24 sps:$4 sm:$0xff]   ;;  %1188 = vmatpush1.bf16.msra.mxu0 %v4516_v5  ;;  %v4525_v11 = vld [vmem:[#allocation6 + $0x38] ss:$24 sps:$4 sm:$0xff]   ;;  %v4529_v13 = vld [vmem:[#allocation6 + $0x6c] ss:$24 sps:$4 sm:$0xff]  }
  0xc1   : > { %1189 = vmatprep.subr.bf16.mxu0 %v4520_v8  ;;  %1230 = vmatprep.subr.bf16.mxu1 %v4523_v9  ;;  %v4528_v14 = vld [vmem:[#allocation6 + $0x60] ss:$24 sps:$4 sm:$0xff]   ;;  %v4532_v16 = vld [vmem:[#allocation6 + $0x94] ss:$24 sps:$4 sm:$0xff]   ;;  %v4534_v18 = vld [vmem:[#allocation6 + $0x90] ss:$24 sps:$4 sm:$0xff]  }
  0xc2   : > { %535 = vadd.xlane.f32.xlu0 %v534_v3  ;;  %v4531_v15 = vld [vmem:[#allocation6 + $0x68] ss:$24 sps:$4 sm:$0xff]   ;;  %v4535_v17 = vld [vmem:[#allocation6 + $0x9c] ss:$24 sps:$4 sm:$0xff]   ;;  %v4537_v19 = vld [vmem:[#allocation6 + $0x98] ss:$24 sps:$4 sm:$0xff]  }
  0xc3   : > { %1231 = vmatpush1.bf16.msra.mxu1 %v4525_v11  ;;  %v4538_v20 = vld [vmem:[#allocation6 + $0xc4] ss:$24 sps:$4 sm:$0xff]   ;;  %v4540_v22 = vld [vmem:[#allocation6 + $0xc0] ss:$24 sps:$4 sm:$0xff]   ;;  %v4544_v24 = vld [vmem:[#allocation6 + $0xf4] ss:$24 sps:$4 sm:$0xff]  }
  0xc4   : > { %1190 = vmatpush1.bf16.msra.mxu0 %v4522_v10  ;;  %1232 = vmatprep.subr.bf16.mxu1 %v4529_v13  ;;  %v4541_v21 = vld [vmem:[#allocation6 + $0xcc] ss:$24 sps:$4 sm:$0xff]   ;;  %v4543_v23 = vld [vmem:[#allocation6 + $0xc8] ss:$24 sps:$4 sm:$0xff]   ;;  %v4547_v25 = vld [vmem:[#allocation6 + $0xfc] ss:$24 sps:$4 sm:$0xff]  }
  0xc5   : > { %1191 = vmatprep.subr.bf16.mxu0 %v4526_v12  ;;  %v4546_v26 = vld [vmem:[#allocation6 + $0xf0] ss:$24 sps:$4 sm:$0xff]   ;;  %v4550_v28 = vld [vmem:[#allocation6 + $0x124] ss:$24 sps:$4 sm:$0xff]   ;;  %v4552_v30 = vld [vmem:[#allocation6 + $0x120] ss:$24 sps:$4 sm:$0xff]  }
  0xc6   : > { %v4549_v27 = vld [vmem:[#allocation6 + $0xf8] ss:$24 sps:$4 sm:$0xff]   ;;  %v4553_v29 = vld [vmem:[#allocation6 + $0x12c] ss:$24 sps:$4 sm:$0xff]   ;;  %v4555_v31 = vld [vmem:[#allocation6 + $0x128] ss:$24 sps:$4 sm:$0xff]  }
  0xc7   : > { %1233 = vmatpush1.bf16.msra.mxu1 %v4531_v15  ;;  %v4556_v32 = vld [vmem:[#allocation6 + $0x154] ss:$24 sps:$4 sm:$0xff]   ;;  %v4558_v34 = vld [vmem:[#allocation6 + $0x150] ss:$24 sps:$4 sm:$0xff]   ;;  %v4562_v36 = vld [vmem:[#allocation6 + $0x184] ss:$24 sps:$4 sm:$0xff]  }
  0xc8   : > { %1192 = vmatpush1.bf16.msra.mxu0 %v4528_v14  ;;  %1234 = vmatprep.subr.bf16.mxu1 %v4535_v17  ;;  %v4559_v33 = vld [vmem:[#allocation6 + $0x15c] ss:$24 sps:$4 sm:$0xff]   ;;  %v4561_v35 = vld [vmem:[#allocation6 + $0x158] ss:$24 sps:$4 sm:$0xff]   ;;  %v4565_v37 = vld [vmem:[#allocation6 + $0x18c] ss:$24 sps:$4 sm:$0xff]  }
  0xc9   : > { %1193 = vmatprep.subr.bf16.mxu0 %v4532_v16  ;;  %v4564_v38 = vld [vmem:[#allocation6 + $0x180] ss:$24 sps:$4 sm:$0xff]   ;;  %v4568_v40 = vld [vmem:[#allocation6 + $0x1b4] ss:$24 sps:$4 sm:$0xff]   ;;  %v4570_v42 = vld [vmem:[#allocation6 + $0x1b0] ss:$24 sps:$4 sm:$0xff]   ;;  %v552_v16 = vlaneseq }
  0xca   : > { %v4567_v39 = vld [vmem:[#allocation6 + $0x188] ss:$24 sps:$4 sm:$0xff]   ;;  %v4571_v41 = vld [vmem:[#allocation6 + $0x1bc] ss:$24 sps:$4 sm:$0xff]   ;;  %v4573_v43 = vld [vmem:[#allocation6 + $0x1b8] ss:$24 sps:$4 sm:$0xff]  }
  0xcb   : > { %1235 = vmatpush1.bf16.msra.mxu1 %v4537_v19  ;;  %v4574_v44 = vld [vmem:[#allocation6 + $0x1e4] ss:$24 sps:$4 sm:$0xff]   ;;  %v4576_v52 = vld [vmem:[#allocation6 + $0x1e0] ss:$24 sps:$4 sm:$0xff]   ;;  %v4580_v55 = vld [vmem:[#allocation6 + $0x214] ss:$24 sps:$4 sm:$0xff]  }
  0xcc   : > { %1194 = vmatpush1.bf16.msra.mxu0 %v4534_v18  ;;  %1236 = vmatprep.subr.bf16.mxu1 %v4541_v21  ;;  %v4577_v53 = vld [vmem:[#allocation6 + $0x1ec] ss:$24 sps:$4 sm:$0xff]   ;;  %v4579_v54 = vld [vmem:[#allocation6 + $0x1e8] ss:$24 sps:$4 sm:$0xff]   ;;  %v4583_v57 = vld [vmem:[#allocation6 + $0x21c] ss:$24 sps:$4 sm:$0xff]  }
  0xcd   : > { %1195 = vmatprep.subr.bf16.mxu0 %v4538_v20  ;;  %v4582_v56 = vld [vmem:[#allocation6 + $0x210] ss:$24 sps:$4 sm:$0xff]   ;;  %v4586_v59 = vld [vmem:[#allocation6 + $0x244] ss:$24 sps:$4 sm:$0xff]   ;;  %v4588_v60 = vld [vmem:[#allocation6 + $0x240] ss:$24 sps:$4 sm:$0xff]  }
  0xce   : > { %v4585_v58 = vld [vmem:[#allocation6 + $0x218] ss:$24 sps:$4 sm:$0xff]   ;;  %v4589_v61 = vld [vmem:[#allocation6 + $0x24c] ss:$24 sps:$4 sm:$0xff]   ;;  %v4591_v62 = vld [vmem:[#allocation6 + $0x248] ss:$24 sps:$4 sm:$0xff]  }
  0xcf   : > { %1237 = vmatpush1.bf16.msra.mxu1 %v4543_v23  ;;  %v4592_v63 = vld [vmem:[#allocation6 + $0x274] ss:$24 sps:$4 sm:$0xff]   ;;  %v4594_v3 = vld [vmem:[#allocation6 + $0x270] ss:$24 sps:$4 sm:$0xff]   ;;  %v4598_v5 = vld [vmem:[#allocation6 + $0x2a4] ss:$24 sps:$4 sm:$0xff]  }
  0xd0   : > { %1196 = vmatpush1.bf16.msra.mxu0 %v4540_v22  ;;  %1238 = vmatprep.subr.bf16.mxu1 %v4547_v25  ;;  %v4595_v0 = vld [vmem:[#allocation6 + $0x27c] ss:$24 sps:$4 sm:$0xff]   ;;  %v4597_v4 = vld [vmem:[#allocation6 + $0x278] ss:$24 sps:$4 sm:$0xff]   ;;  %v4601_v6 = vld [vmem:[#allocation6 + $0x2ac] ss:$24 sps:$4 sm:$0xff]  }
  0xd1   : > { %1197 = vmatprep.subr.bf16.mxu0 %v4544_v24  ;;  %v4600_v7 = vld [vmem:[#allocation6 + $0x2a0] ss:$24 sps:$4 sm:$0xff]   ;;  %v4604_v9 = vld [vmem:[#allocation6 + $0x2d4] ss:$24 sps:$4 sm:$0xff]   ;;  %v4606_v11 = vld [vmem:[#allocation6 + $0x2d0] ss:$24 sps:$4 sm:$0xff]  }
  0xd2   : > { %v4603_v8 = vld [vmem:[#allocation6 + $0x2a8] ss:$24 sps:$4 sm:$0xff]   ;;  %v4607_v10 = vld [vmem:[#allocation6 + $0x2dc] ss:$24 sps:$4 sm:$0xff]   ;;  %v4609_v12 = vld [vmem:[#allocation6 + $0x2d8] ss:$24 sps:$4 sm:$0xff]  }
  0xd3   : > { %1239 = vmatpush1.bf16.msra.mxu1 %v4549_v27  ;;  %v4612_v13 = vld [vmem:[#allocation6 + $0x14] ss:$24 sps:$4 sm:$0xff]   ;;  %v5551_v18 = vshrl.u32 %v552_v16, 7  ;;  %v532_v21 = vld [vmem:[%s5744_s5] sm:$0x3]  ;;  %vm1369_vm1 = vcmask 1043456  }
  0xd4   : > { %1198 = vmatpush1.bf16.msra.mxu0 %v4546_v26  ;;  %1240 = vmatprep.subr.bf16.mxu1 %v4553_v29  ;;  %v533_v22 = vld [vmem:[%s5745_s6] sm:$0x3]  ;;  %vm1353_vm2 = vcmask 64512   ;;  %s5781_s30 = sld [smem:[#allocation22_spill]]  ;;  %s5782_s15 = sld [smem:[#allocation23_spill]] }
  0xd5   : > { %1199 = vmatprep.subr.bf16.mxu0 %v4550_v28  ;;  %v5554_v19 = vsub.s32 1, %v5551_v18  ;;  %v5557_v20 = vsub.s32 0, %v5551_v18  ;;  %s5783_s21 = sld [smem:[#allocation20_spill]]  ;;  %s5784_s20 = sld [smem:[#allocation21_spill]] }
  0xd6   : > { %s4376_s17 = sshll.u32 %s5300_s14, 7  ;;  %s5785_s23 = sld [smem:[#allocation24_spill]] }
  0xd7   : > { %1241 = vmatpush1.bf16.msra.mxu1 %v4555_v31  ;;  %v559_v23 = vrot.slane %v532_v21, %v5554_v19  ;;  %v555_v24 = vrot.slane %v532_v21, %v5557_v20  ;;  %v572_v27 = vrot.slane %v533_v22, %v5554_v19  ;;  %v568_v29 = vrot.slane %v533_v22, %v5557_v20  ;;  %p5786_p4 = scmp.ne.s32.totalorder %s5771_s13, 0  ;;  %s5208_s14 = smov [#allocation14]  }
  0xd8   : > { %1200 = vmatpush1.bf16.msra.mxu0 %v4552_v30  ;;  %1242 = vmatprep.subr.bf16.mxu1 %v4559_v33 }
  0xd9   : > { %1201 = vmatprep.subr.bf16.mxu0 %v4556_v32 }
  0xdb   : > { %1243 = vmatpush1.bf16.msra.mxu1 %v4561_v35  ;;  %v4610_v35 = vld [vmem:[#allocation6 + $0x10] ss:$24 sps:$4 sm:$0xff]  }
  0xdc   : > { %1202 = vmatpush1.bf16.msra.mxu0 %v4558_v34  ;;  %1244 = vmatprep.subr.bf16.mxu1 %v4565_v37  ;;  %v4615_v37 = vld [vmem:[#allocation6 + $0x44] ss:$24 sps:$4 sm:$0xff]   ;;  %s5695_s8 = scalar_lea.hbm %s5785_s23, %s4376_s17 }
  0xdd   : > { %1203 = vmatprep.subr.bf16.mxu0 %v4562_v36 }
  0xdf   : > { %1245 = vmatpush1.bf16.msra.mxu1 %v4567_v39  ;;  %v4618_v39 = vld [vmem:[#allocation6 + $0x74] ss:$24 sps:$4 sm:$0xff]  }
  0xe0   : > { %1204 = vmatpush1.bf16.msra.mxu0 %v4564_v38  ;;  %1246 = vmatprep.subr.bf16.mxu1 %v4571_v41  ;;  %v4613_v38 = vld [vmem:[#allocation6 + $0x40] ss:$24 sps:$4 sm:$0xff]   ;;  %v4621_v41 = vld [vmem:[#allocation6 + $0xa4] ss:$24 sps:$4 sm:$0xff]  }
  0xe1   : > { %1205 = vmatprep.subr.bf16.mxu0 %v4568_v40  ;;  %v4616_v40 = vld [vmem:[#allocation6 + $0x70] ss:$24 sps:$4 sm:$0xff]  }
  0xe3   : > { %1247 = vmatpush1.bf16.msra.mxu1 %v4573_v43  ;;  %v4624_v43 = vld [vmem:[#allocation6 + $0xd4] ss:$24 sps:$4 sm:$0xff]  }
  0xe4   : > { %1206 = vmatpush1.bf16.msra.mxu0 %v4570_v42  ;;  %1248 = vmatprep.subr.bf16.mxu1 %v4577_v53  ;;  %v4619_v42 = vld [vmem:[#allocation6 + $0xa0] ss:$24 sps:$4 sm:$0xff]   ;;  %v4639_v53 = vld [vmem:[#allocation6 + $0x1c4] ss:$24 sps:$4 sm:$0xff]  }
  0xe5   : > { %1207 = vmatprep.subr.bf16.mxu0 %v4574_v44  ;;  %v4622_v44 = vld [vmem:[#allocation6 + $0xd0] ss:$24 sps:$4 sm:$0xff]  }
  0xe7   : > { %1249 = vmatpush1.bf16.msra.mxu1 %v4579_v54  ;;  %v4637_v54 = vld [vmem:[#allocation6 + $0x1c0] ss:$24 sps:$4 sm:$0xff]  }
  0xe8   : > { %1208 = vmatpush1.bf16.msra.mxu0 %v4576_v52  ;;  %1250 = vmatprep.subr.bf16.mxu1 %v4583_v57  ;;  %v4634_v52 = vld [vmem:[#allocation6 + $0x190] ss:$24 sps:$4 sm:$0xff]   ;;  %v4645_v57 = vld [vmem:[#allocation6 + $0x224] ss:$24 sps:$4 sm:$0xff]  }
  0xe9   : > { %1209 = vmatprep.subr.bf16.mxu0 %v4580_v55  ;;  %v4642_v55 = vld [vmem:[#allocation6 + $0x1f4] ss:$24 sps:$4 sm:$0xff]  }
  0xeb   : > { %1251 = vmatpush1.bf16.msra.mxu1 %v4585_v58  ;;  %v4643_v58 = vld [vmem:[#allocation6 + $0x220] ss:$24 sps:$4 sm:$0xff]  }
  0xec   : > { %1210 = vmatpush1.bf16.msra.mxu0 %v4582_v56  ;;  %1252 = vmatprep.subr.bf16.mxu1 %v4589_v61  ;;  %v4640_v56 = vld [vmem:[#allocation6 + $0x1f0] ss:$24 sps:$4 sm:$0xff]   ;;  %v4651_v61 = vld [vmem:[#allocation6 + $0x284] ss:$24 sps:$4 sm:$0xff]  }
  0xed   : > { %1211 = vmatprep.subr.bf16.mxu0 %v4586_v59  ;;  %v4648_v59 = vld [vmem:[#allocation6 + $0x254] ss:$24 sps:$4 sm:$0xff]  }
  0xef   : > { %1253 = vmatpush1.bf16.msra.mxu1 %v4591_v62  ;;  %v4649_v62 = vld [vmem:[#allocation6 + $0x280] ss:$24 sps:$4 sm:$0xff]  }
  0xf0   : > { %1212 = vmatpush1.bf16.msra.mxu0 %v4588_v60  ;;  %1254 = vmatprep.subr.bf16.mxu1 %v4595_v0  ;;  %v4646_v60 = vld [vmem:[#allocation6 + $0x250] ss:$24 sps:$4 sm:$0xff]  }
  0xf1   : > { %1213 = vmatprep.subr.bf16.mxu0 %v4592_v63  ;;  %v4654_v63 = vld [vmem:[#allocation6 + $0x2b4] ss:$24 sps:$4 sm:$0xff]   ;;  %v4652_v0 = vld [vmem:[#allocation6 + $0x2b0] ss:$24 sps:$4 sm:$0xff]  }
  0xf3   : > { %1255 = vmatpush1.bf16.msra.mxu1 %v4597_v4  ;;  %v4655_v4 = vld [vmem:[#allocation6 + $0x2e0] ss:$24 sps:$4 sm:$0xff]  }
  0xf4   : > { %1214 = vmatpush1.bf16.msra.mxu0 %v4594_v3  ;;  %1256 = vmatprep.subr.bf16.mxu1 %v4601_v6  ;;  %v4657_v3 = vld [vmem:[#allocation6 + $0x2e4] ss:$24 sps:$4 sm:$0xff]   ;;  %v687_v6 = vsub.s32 2, %v5551_v18 }
  0xf5   : > { %1215 = vmatprep.subr.bf16.mxu0 %v4598_v5  ;;  %v5206_v5 = vmov 0.0  }
  0xf7   : > { %1257 = vmatpush1.bf16.msra.mxu1 %v4603_v8  ;;  %v691_v8 = vsub.s32 3, %v5551_v18 }
  0xf8   : > { %1216 = vmatpush1.bf16.msra.mxu0 %v4600_v7  ;;  %1258 = vmatprep.subr.bf16.mxu1 %v4607_v10  ;;  %v675_v7 = vld [vmem:[%s5741_s2] sm:$0x3f] }
  0xf9   : > { %1217 = vmatprep.subr.bf16.mxu0 %v4604_v9  ;;  %v688_v9 = vrot.slane %v675_v7, %v687_v6  ;;  %v692_v10 = vrot.slane %v675_v7, %v691_v8  ;;  %v680_v16 = vrot.slane %v675_v7, %v5557_v20 }
  0xfb   : > { %1259 = vmatpush1.bf16.msra.mxu1 %v4609_v12 }
  0xfc   : > { %1218 = vmatpush1.bf16.msra.mxu0 %v4606_v11  ;;  %4397 = vmatprep.subr.bf16.mxu1 %v5206_v5 }
  0xfd   : > { %1269 = vmatprep.subr.bf16.mxu0 %v4612_v13 }
 0x14f   : > { %v536_v45 = vpop.xlane.xlu0 %535 }
 0x150   : > { %v538_v46 = vmul.f32 0.00390625, %v536_v45  ;;  %v4627_v45 = vld [vmem:[#allocation6 + $0x104] ss:$24 sps:$4 sm:$0xff]  }
 0x152   : > { %v5542_v47 = vsub.f32 %v5535_v1, %v538_v46  ;;  %v5545_v48 = vsub.f32 %v5537_v2, %v538_v46  ;;  %v4625_v46 = vld [vmem:[#allocation6 + $0x100] ss:$24 sps:$4 sm:$0xff]  }
 0x154   : > { %v541_v49 = vmul.f32 %v5542_v47, %v5542_v47  ;;  %v542_v50 = vmul.f32 %v5545_v48, %v5545_v48 }
 0x156   : > { %v543_v51 = vadd.f32 %v542_v50, %v541_v49  ;;  %v4633_v49 = vld [vmem:[#allocation6 + $0x164] ss:$24 sps:$4 sm:$0xff]   ;;  %v4631_v50 = vld [vmem:[#allocation6 + $0x160] ss:$24 sps:$4 sm:$0xff]  }
 0x158   : > { %544 = vadd.xlane.f32.xlu0 %v543_v51  ;;  %v4636_v51 = vld [vmem:[#allocation6 + $0x194] ss:$24 sps:$4 sm:$0xff]  }
 0x1e5   : > { %v545_v14 = vpop.xlane.xlu0 %544 }
 0x1e6   : > { %v546_v15 = vmul.f32 0.00390625, %v545_v14 }
 0x1e8   : > { %v547_v17 = vadd.f32 1e-05, %v546_v15 }
 0x1ea   : > { %4900 = vrsqrt.f32 %v547_v17 }
 0x1f4   : > { %v4901_v25 = vpop.eup %4900 }
 0x1f5   : > { %v550_v26 = vmul.f32 %v4901_v25, %v5545_v48  ;;  %v549_v28 = vmul.f32 %v4901_v25, %v5542_v47  ;;  %v4630_v47 = vld [vmem:[#allocation6 + $0x134] ss:$24 sps:$4 sm:$0xff]   ;;  %v4628_v48 = vld [vmem:[#allocation6 + $0x130] ss:$24 sps:$4 sm:$0xff]  }
 0x1f7   : > { %v563_v30 = vmul.f32 %v559_v23, %v550_v26  ;;  %v562_v31 = vmul.f32 %v555_v24, %v549_v28  ;;  %v684_v24 = vrot.slane %v675_v7, %v5554_v19 }
 0x1f9   : > { %v576_v32 = vadd.f32 %v572_v27, %v563_v30  ;;  %v575_v33 = vadd.f32 %v568_v29, %v562_v31 }
 0x1fb   : > { %v578_v34 = vpack.c.bf16 %v576_v32, %v576_v32  ;;  %v5571_v36 = vpack.c.bf16 %v575_v33, %v575_v33  ;;  %v695_v32 = vsub.s32 4, %v5551_v18  ;;  %v699_v33 = vsub.s32 5, %v5551_v18 }
 0x1fd   : > { %1219 = vmatprep.mubr.bf16.mxu0 %v578_v34  ;;  %1260 = vmatprep.mubr.bf16.mxu1 %v578_v34 }
 0x1fe   : > { %1220 = vmatmul.mubr.bf16.vlgmr.msra.gmra.mrb[0].mxu0 %v5571_v36  ;;  %1261 = vmatmul.mubr.bf16.vlgmr.msra.gmra.mrb[0].mxu1 %v5571_v36 }
 0x1ff   : > { %1270 = vmatpush1.bf16.msra.mxu0 %v4610_v35  ;;  %1301 = vmatprep.mubr.bf16.mxu0 %v578_v34  ;;  %v696_v34 = vrot.slane %v675_v7, %v695_v32  ;;  %v700_v35 = vrot.slane %v675_v7, %v699_v33 }
 0x200   : > { %1271 = vmatprep.subr.bf16.mxu0 %v4615_v37  ;;  %4399 = vmatprep.mubr.msk.bf16.mxu1 %vm5207_vm0, %v5206_v5 }
 0x203   : > { %1272 = vmatpush1.bf16.msra.mxu0 %v4613_v38 }
 0x204   : > { %1273 = vmatprep.subr.bf16.mxu0 %v4618_v39 }
 0x207   : > { %1274 = vmatpush1.bf16.msra.mxu0 %v4616_v40 }
 0x208   : > { %1275 = vmatprep.subr.bf16.mxu0 %v4621_v41 }
 0x20b   : > { %1276 = vmatpush1.bf16.msra.mxu0 %v4619_v42 }
 0x20c   : > { %1277 = vmatprep.subr.bf16.mxu0 %v4624_v43 }
 0x20f   : > { %1278 = vmatpush1.bf16.msra.mxu0 %v4622_v44 }
 0x210   : > { %1279 = vmatprep.subr.bf16.mxu0 %v4627_v45 }
 0x213   : > { %1280 = vmatpush1.bf16.msra.mxu0 %v4625_v46 }
 0x214   : > { %1281 = vmatprep.subr.bf16.mxu0 %v4630_v47 }
 0x217   : > { %1282 = vmatpush1.bf16.msra.mxu0 %v4628_v48 }
 0x218   : > { %1283 = vmatprep.subr.bf16.mxu0 %v4633_v49 }
 0x21b   : > { %1284 = vmatpush1.bf16.msra.mxu0 %v4631_v50 }
 0x21c   : > { %1285 = vmatprep.subr.bf16.mxu0 %v4636_v51 }
 0x21f   : > { %1286 = vmatpush1.bf16.msra.mxu0 %v4634_v52 }
 0x220   : > { %1287 = vmatprep.subr.bf16.mxu0 %v4639_v53 }
 0x223   : > { %1288 = vmatpush1.bf16.msra.mxu0 %v4637_v54 }
 0x224   : > { %1289 = vmatprep.subr.bf16.mxu0 %v4642_v55 }
 0x227   : > { %1290 = vmatpush1.bf16.msra.mxu0 %v4640_v56 }
 0x228   : > { %1291 = vmatprep.subr.bf16.mxu0 %v4645_v57 }
 0x22b   : > { %1292 = vmatpush1.bf16.msra.mxu0 %v4643_v58 }
 0x22c   : > { %1293 = vmatprep.subr.bf16.mxu0 %v4648_v59 }
 0x22f   : > { %1294 = vmatpush1.bf16.msra.mxu0 %v4646_v60 }
 0x230   : > { %1295 = vmatprep.subr.bf16.mxu0 %v4651_v61 }
 0x233   : > { %1296 = vmatpush1.bf16.msra.mxu0 %v4649_v62 }
 0x234   : > { %1297 = vmatprep.subr.bf16.mxu0 %v4654_v63 }
 0x237   : > { %1298 = vmatpush1.bf16.msra.mxu0 %v4652_v0 }
 0x238   : > { %1299 = vmatprep.subr.bf16.mxu0 %v4657_v3 }
 0x23b   : > { %1300 = vmatpush1.bf16.msra.mxu0 %v4655_v4  ;;  %v4660_v4 = vld [vmem:[#allocation8 + $0x4] ss:$8 sps:$4 sm:$0xff]  }
 0x23c   : > { %4385 = vmatprep.subr.bf16.mxu0 %v5206_v5 }
 0x23e   : > { %1302 = vmatmul.mubr.bf16.vlgmr.msra.gmra.mrb[4].mxu0 %v5571_v36 }
 0x23f   : > { %4387 = vmatprep.mubr.msk.bf16.mxu0 %vm5207_vm0, %v5206_v5 }
 0x2d1   : > { %v1221_v11 = vpop.f32.mrb[0].mxu0  ;;  %v1262_v12 = vpop.f32.mrb[0].mxu1 }
 0x2d2   : > { %v1263_v13 = vadd.f32 %v1262_v12, %v688_v9  ;;  %v1223_v14 = vpop.f32.mrb[1].mxu0  ;;  %v1264_v15 = vpop.f32.mrb[1].mxu1  ;;  %v1222_v28 = vadd.f32 %v1221_v11, %v680_v16  ;;  %v4663_v16 = vld [vmem:[#allocation8 + $0x14] ss:$8 sps:$4 sm:$0xff]  }
 0x2d3   : > { %v1265_v17 = vadd.f32 %v1264_v15, %v692_v10  ;;  %v1225_v21 = vpop.f32.mrb[2].mxu0  ;;  %v1266_v22 = vpop.f32.mrb[2].mxu1  ;;  %v1224_v29 = vadd.f32 %v1223_v14, %v684_v24  ;;  %v4658_v14 = vld [vmem:[#allocation8] ss:$8 sps:$4 sm:$0xff]   ;;  %v4667_v24 = vld [vmem:[#allocation8 + $0x30] ss:$8 sps:$4 sm:$0xff]  }
 0x2d4   : > { %v1311_v23 = vpack.c.bf16 %v1263_v13, %v1263_v13  ;;  %v1226_v25 = vpop.f32.mrb[3].mxu0  ;;  %v1267_v26 = vpop.f32.mrb[3].mxu1  ;;  %v1310_v30 = vpack.c.bf16 %v1222_v28, %v1222_v28  ;;  %v4666_v21 = vld [vmem:[#allocation8 + $0x24] ss:$8 sps:$4 sm:$0xff]   ;;  %v4664_v22 = vld [vmem:[#allocation8 + $0x20] ss:$8 sps:$4 sm:$0xff]  }
 0x2d5   : > { %v1416_v27 = vpack.c.bf16 %v1265_v17, %v1265_v17  ;;  %v1415_v31 = vpack.c.bf16 %v1224_v29, %v1224_v29  ;;  %v4661_v17 = vld [vmem:[#allocation8 + $0x10] ss:$8 sps:$4 sm:$0xff]   ;;  %v4672_v25 = vld [vmem:[#allocation8 + $0x44] ss:$8 sps:$4 sm:$0xff]   ;;  %v4670_v26 = vld [vmem:[#allocation8 + $0x40] ss:$8 sps:$4 sm:$0xff]  }
 0x2d6   : > { %4386 = vmatpush3.bf16.xpose.msra.mxu0 %v1311_v23  ;;  %v4669_v23 = vld [vmem:[#allocation8 + $0x34] ss:$8 sps:$4 sm:$0xff]   ;;  %v4673_v28 = vld [vmem:[#allocation8 + $0x50] ss:$8 sps:$4 sm:$0xff]   ;;  %v4678_v29 = vld [vmem:[#allocation8 + $0x64] ss:$8 sps:$4 sm:$0xff]  }
 0x2d7   : > { %4398 = vmatpush3.bf16.xpose.msra.mxu1 %v1416_v27  ;;  %4391 = vmatprep.subr.bf16.mxu0 %v5206_v5  ;;  %v4675_v27 = vld [vmem:[#allocation8 + $0x54] ss:$8 sps:$4 sm:$0xff]  }
 0x2d8   : > { %4403 = vmatprep.subr.bf16.mxu1 %v5206_v5 }
 0x2dd   : > { %4388 = vmatmul.mubr.bf16.vlgmr.msra.gmra.mrb[8].mxu0 %v1310_v30  ;;  %v4676_v30 = vld [vmem:[#allocation8 + $0x60] ss:$8 sps:$4 sm:$0xff]  }
 0x2de   : > { %4400 = vmatmul.mubr.bf16.vlgmr.msra.gmra.mrb[4].mxu1 %v1415_v31  ;;  %4393 = vmatprep.mubr.msk.bf16.mxu0 %vm5207_vm0, %v5206_v5  ;;  %v4681_v31 = vld [vmem:[#allocation8 + $0x74] ss:$8 sps:$4 sm:$0xff]  }
 0x2df   : > { %4405 = vmatprep.mubr.msk.bf16.mxu1 %vm5207_vm0, %v5206_v5 }
 0x311   : > { %v1303_v36 = vpop.f32.mrb[4].mxu0 }
 0x312   : > { %v1304_v37 = vadd.f32 %v1303_v36, %v696_v34  ;;  %v1305_v38 = vpop.f32.mrb[5].mxu0  ;;  %v4679_v34 = vld [vmem:[#allocation8 + $0x70] ss:$8 sps:$4 sm:$0xff]   ;;  %v4682_v36 = vld [vmem:[#allocation8 + $0x80] ss:$8 sps:$4 sm:$0xff]  }
 0x313   : > { %v1306_v39 = vadd.f32 %v1305_v38, %v700_v35  ;;  %v1307_v40 = vpop.f32.mrb[6].mxu0  ;;  %v4684_v35 = vld [vmem:[#allocation8 + $0x84] ss:$8 sps:$4 sm:$0xff]   ;;  %v4685_v38 = vld [vmem:[#allocation8 + $0x90] ss:$8 sps:$4 sm:$0xff]  }
 0x314   : > { %v1312_v41 = vpack.c.bf16 %v1304_v37, %v1304_v37  ;;  %v1308_v42 = vpop.f32.mrb[7].mxu0  ;;  %v4687_v37 = vld [vmem:[#allocation8 + $0x94] ss:$8 sps:$4 sm:$0xff]   ;;  %v4688_v40 = vld [vmem:[#allocation8 + $0xa0] ss:$8 sps:$4 sm:$0xff]  }
 0x315   : > { %v1417_v43 = vpack.c.bf16 %v1306_v39, %v1306_v39  ;;  %v4690_v39 = vld [vmem:[#allocation8 + $0xa4] ss:$8 sps:$4 sm:$0xff]   ;;  %v4691_v42 = vld [vmem:[#allocation8 + $0xb0] ss:$8 sps:$4 sm:$0xff]  }
 0x316   : > { %v1371_v44 = vsel %vm1369_vm1, %v1312_v41, 0  ;;  %v4693_v41 = vld [vmem:[#allocation8 + $0xb4] ss:$8 sps:$4 sm:$0xff]  }
 0x317   : > { %v1474_v45 = vsel %vm1369_vm1, %v1417_v43, 0  ;;  %4392 = vmatpush3.bf16.msra.mxu0 %v1371_v44  ;;  %v4696_v43 = vld [vmem:[#allocation8 + $0xc4] ss:$8 sps:$4 sm:$0xff]   ;;  %v4694_v44 = vld [vmem:[#allocation8 + $0xc0] ss:$8 sps:$4 sm:$0xff]  }
 0x318   : > { %4404 = vmatpush3.bf16.msra.mxu1 %v1474_v45  ;;  %v4699_v45 = vld [vmem:[#allocation8 + $0xd4] ss:$8 sps:$4 sm:$0xff]  }
 0x319   : > { %1730 = vmatprep.subr.bf16.mxu1 %v4660_v4 }
 0x3b0   : > { %v1347_v46 = vpop.f32.mrb[8].mxu0 }
 0x3b1   : > { %v4389_v47 = vpop.f32.mrb[9].mxu0  ;;  %v1452_v48 = vpop.f32.mrb[4].mxu1  ;;  %v1354_v49 = vsel %vm1353_vm2, %v1347_v46, -inf }
 0x3b2   : > { %v4401_v50 = vpop.f32.mrb[5].mxu1  ;;  %1355 = vmax.xlane.f32.xlu1 %v1354_v49  ;;  %v1350_v51 = vpop.f32.mrb[10].mxu0  ;;  %v1458_v55 = vsel %vm1353_vm2, %v1452_v48, -inf  ;;  %v4702_v47 = vld [vmem:[#allocation8 + $0xe4] ss:$8 sps:$4 sm:$0xff]  }
 0x3b3   : > { %v4390_v52 = vpop.f32.mrb[11].mxu0  ;;  %v1455_v53 = vpop.f32.mrb[6].mxu1  ;;  %v4705_v49 = vld [vmem:[#allocation8 + $0xf4] ss:$8 sps:$4 sm:$0xff]   ;;  %v4703_v50 = vld [vmem:[#allocation8 + $0xf0] ss:$8 sps:$4 sm:$0xff]  }
 0x3b4   : > { %v4402_v54 = vpop.f32.mrb[7].mxu1 }
 0x3b6   : > { %1459 = vmax.xlane.f32.xlu1 %v1458_v55 }
 0x43f   : > { %v1356_v56 = vpop.xlane.xlu1 %1355 }
 0x440   : > { %v1357_v57 = vsub.f32 %v1347_v46, %v1356_v56  ;;  %v4697_v46 = vld [vmem:[#allocation8 + $0xd0] ss:$8 sps:$4 sm:$0xff]  }
 0x442   : > { %v1358_v58 = vmul.f32 1.442695, %v1357_v57 }
 0x443   : > { %v1460_v59 = vpop.xlane.xlu1 %1459 }
 0x444   : > { %4902 = vpow2.f32 %v1358_v58  ;;  %v1461_v60 = vsub.f32 %v1452_v48, %v1460_v59  ;;  %v4700_v48 = vld [vmem:[#allocation8 + $0xe0] ss:$8 sps:$4 sm:$0xff]  }
 0x446   : > { %v1462_v61 = vmul.f32 1.442695, %v1461_v60 }
 0x448   : > { %4904 = vpow2.f32 %v1462_v61 }
 0x44e   : > { %v4903_v62 = vpop.eup %4902 }
 0x44f   : > { %v1360_v63 = vsel %vm1353_vm2, %v4903_v62, 0.0 }
 0x450   : > { %1361 = vadd.xlane.f32.xlu0 %v1360_v63 }
 0x452   : > { %v4905_v0 = vpop.eup %4904 }
 0x453   : > { %v1464_v3 = vsel %vm1353_vm2, %v4905_v0, 0.0 }
 0x454   : > { %1465 = vadd.xlane.f32.xlu1 %v1464_v3 }
 0x4dd   : > { %v1362_v5 = vpop.xlane.xlu0 %1361 }
 0x4de   : > { %4906 = vrcp.f32 %v1362_v5 }
 0x4e1   : > { %v1466_v7 = vpop.xlane.xlu1 %1465 }
 0x4e2   : > { %4908 = vrcp.f32 %v1466_v7 }
 0x4e8   : > { %v4907_v9 = vpop.eup %4906 }
 0x4e9   : > { %v1364_v10 = vmul.f32 %v4907_v9, %v4903_v62 }
 0x4eb   : > { %v1365_v11 = vpack.c.bf16 %v1364_v10, %v1364_v10 }
 0x4ec   : > { %v4909_v12 = vpop.eup %4908 }
 0x4ed   : > { %v1468_v13 = vmul.f32 %v4909_v12, %v4905_v0  ;;  %4394 = vmatmul.mubr.msk.bf16.vlgmr.msra.gmra.mrb[12].mxu0 %vm1353_vm2, %v1365_v11  ;;  %v1551_v0 = vld [vmem:[#allocation9] sm:$0x3] }
 0x4ee   : > { %v1556_v3 = vrot.slane %v1551_v0, %v5557_v20  ;;  %v1560_v4 = vrot.slane %v1551_v0, %v5554_v19 }
 0x4ef   : > { %v1469_v15 = vpack.c.bf16 %v1468_v13, %v1468_v13 }
 0x4f1   : > { %4406 = vmatmul.mubr.msk.bf16.vlgmr.msra.gmra.mrb[8].mxu1 %vm1353_vm2, %v1469_v15 }
 0x4f2   : > { %1731 = vmatpush1.bf16.msra.mxu1 %v4658_v14 }
 0x4f3   : > { %1732 = vmatprep.subr.bf16.mxu1 %v4663_v16  ;;  %v1819_v16 = vld [vmem:[#allocation11] sm:$0xff] }
 0x4f6   : > { %1733 = vmatpush1.bf16.msra.mxu1 %v4661_v17  ;;  %v1823_v17 = vld [vmem:[#allocation11 + $0x20] sm:$0xff] }
 0x4f7   : > { %1734 = vmatprep.subr.bf16.mxu1 %v4666_v21  ;;  %v1820_v21 = vld [vmem:[#allocation11 + $0x8] sm:$0xff] }
 0x4fa   : > { %1735 = vmatpush1.bf16.msra.mxu1 %v4664_v22  ;;  %v4104_v22 = vcombine.low %v1819_v16, %v1823_v17 }
 0x4fb   : > { %1736 = vmatprep.subr.bf16.mxu1 %v4669_v23  ;;  %v4105_v23 = vcombine.high %v1819_v16, %v1823_v17  ;;  %v1879_v16 = vld [vmem:[#allocation11 + $0x1e0] sm:$0xff]  ;;  %v1876_v17 = vld [vmem:[#allocation11 + $0x1c8] sm:$0xff] }
 0x4fd   : > { %2629 = vmatprep.subr.bf16.mxu0 %v4105_v23 }
 0x4fe   : > { %1737 = vmatpush1.bf16.msra.mxu1 %v4667_v24  ;;  %v1824_v24 = vld [vmem:[#allocation11 + $0x28] sm:$0xff]  ;;  %2630 = vmatpush1.bf16.msra.mxu0 %v4104_v22 }
 0x4ff   : > { %1738 = vmatprep.subr.bf16.mxu1 %v4672_v25  ;;  %v1827_v25 = vld [vmem:[#allocation11 + $0x40] sm:$0xff] }
 0x502   : > { %1739 = vmatpush1.bf16.msra.mxu1 %v4670_v26  ;;  %v1831_v26 = vld [vmem:[#allocation11 + $0x60] sm:$0xff] }
 0x503   : > { %1740 = vmatprep.subr.bf16.mxu1 %v4675_v27  ;;  %v4106_v27 = vcombine.low %v1820_v21, %v1824_v24 }
 0x506   : > { %1741 = vmatpush1.bf16.msra.mxu1 %v4673_v28  ;;  %v4107_v28 = vcombine.high %v1820_v21, %v1824_v24  ;;  %v1880_v21 = vld [vmem:[#allocation11 + $0x1e8] sm:$0xff] }
 0x507   : > { %1742 = vmatprep.subr.bf16.mxu1 %v4678_v29  ;;  %v1828_v29 = vld [vmem:[#allocation11 + $0x48] sm:$0xff] }
 0x50a   : > { %1743 = vmatpush1.bf16.msra.mxu1 %v4676_v30  ;;  %v1832_v30 = vld [vmem:[#allocation11 + $0x68] sm:$0xff] }
 0x50b   : > { %1744 = vmatprep.subr.bf16.mxu1 %v4681_v31  ;;  %v1835_v31 = vld [vmem:[#allocation11 + $0x80] sm:$0xff] }
 0x50e   : > { %1745 = vmatpush1.bf16.msra.mxu1 %v4679_v34  ;;  %v1839_v34 = vld [vmem:[#allocation11 + $0xa0] sm:$0xff] }
 0x50f   : > { %1746 = vmatprep.subr.bf16.mxu1 %v4684_v35  ;;  %v1836_v35 = vld [vmem:[#allocation11 + $0x88] sm:$0xff] }
 0x512   : > { %1747 = vmatpush1.bf16.msra.mxu1 %v4682_v36  ;;  %v1840_v36 = vld [vmem:[#allocation11 + $0xa8] sm:$0xff] }
 0x513   : > { %1748 = vmatprep.subr.bf16.mxu1 %v4687_v37  ;;  %v4112_v37 = vcombine.low %v1827_v25, %v1831_v26 }
 0x516   : > { %1749 = vmatpush1.bf16.msra.mxu1 %v4685_v38  ;;  %v4114_v38 = vcombine.low %v1828_v29, %v1832_v30 }
 0x517   : > { %1750 = vmatprep.subr.bf16.mxu1 %v4690_v39  ;;  %v4121_v39 = vcombine.high %v1835_v31, %v1839_v34 }
 0x51a   : > { %1751 = vmatpush1.bf16.msra.mxu1 %v4688_v40  ;;  %v4123_v40 = vcombine.high %v1836_v35, %v1840_v36 }
 0x51b   : > { %1752 = vmatprep.subr.bf16.mxu1 %v4693_v41  ;;  %v1843_v41 = vld [vmem:[#allocation11 + $0xc0] sm:$0xff] }
 0x51e   : > { %1753 = vmatpush1.bf16.msra.mxu1 %v4691_v42  ;;  %v1847_v42 = vld [vmem:[#allocation11 + $0xe0] sm:$0xff] }
 0x51f   : > { %1754 = vmatprep.subr.bf16.mxu1 %v4696_v43  ;;  %v1844_v43 = vld [vmem:[#allocation11 + $0xc8] sm:$0xff] }
 0x522   : > { %1755 = vmatpush1.bf16.msra.mxu1 %v4694_v44  ;;  %v1848_v44 = vld [vmem:[#allocation11 + $0xe8] sm:$0xff] }
 0x523   : > { %1756 = vmatprep.subr.bf16.mxu1 %v4699_v45  ;;  %v4120_v45 = vcombine.low %v1835_v31, %v1839_v34  ;;  %v1891_v34 = vld [vmem:[#allocation11 + $0x240] sm:$0xff] }
 0x526   : > { %1757 = vmatpush1.bf16.msra.mxu1 %v4697_v46  ;;  %v4122_v46 = vcombine.low %v1836_v35, %v1840_v36  ;;  %v1895_v35 = vld [vmem:[#allocation11 + $0x260] sm:$0xff]  ;;  %v1892_v36 = vld [vmem:[#allocation11 + $0x248] sm:$0xff] }
 0x527   : > { %1758 = vmatprep.subr.bf16.mxu1 %v4702_v47  ;;  %v4129_v47 = vcombine.high %v1843_v41, %v1847_v42 }
 0x52a   : > { %1759 = vmatpush1.bf16.msra.mxu1 %v4700_v48  ;;  %v4131_v48 = vcombine.high %v1844_v43, %v1848_v44 }
 0x52b   : > { %1760 = vmatprep.subr.bf16.mxu1 %v4705_v49  ;;  %v1851_v49 = vld [vmem:[#allocation11 + $0x100] sm:$0xff] }
 0x52e   : > { %1761 = vmatpush1.bf16.msra.mxu1 %v4703_v50  ;;  %v1855_v50 = vld [vmem:[#allocation11 + $0x120] sm:$0xff] }
 0x52f   : > { %2670 = vmatprep.subr.bf16.mxu1 %v4107_v28  ;;  %v1884_v28 = vld [vmem:[#allocation11 + $0x208] sm:$0xff] }
 0x5c0   : > { %v1407_v51 = vpop.f32.mrb[12].mxu0 }
 0x5c1   : > { %v1413_v52 = vpack.c.bf16 %v1407_v51, %v1407_v51  ;;  %v4395_v53 = vpop.f32.mrb[13].mxu0  ;;  %v1852_v51 = vld [vmem:[#allocation11 + $0x108] sm:$0xff] }
 0x5c2   : > { %v1410_v54 = vpop.f32.mrb[14].mxu0  ;;  %v4128_v53 = vcombine.low %v1843_v41, %v1847_v42  ;;  %v1899_v42 = vld [vmem:[#allocation11 + $0x280] sm:$0xff] }
 0x5c3   : > { %1414 = vst [vmem:[#allocation2] sm:$0xf] %v1413_v52  ;;  %v4396_v55 = vpop.f32.mrb[15].mxu0  ;;  %v1856_v52 = vld [vmem:[#allocation11 + $0x128] sm:$0xff]  ;;  %v4130_v54 = vcombine.low %v1844_v43, %v1848_v44  ;;  %v1903_v43 = vld [vmem:[#allocation11 + $0x2a0] sm:$0xff] }
 0x5c4   : > { %v1510_v56 = vpop.f32.mrb[8].mxu1  ;;  %v4137_v55 = vcombine.high %v1851_v49, %v1855_v50  ;;  %v1900_v44 = vld [vmem:[#allocation11 + $0x288] sm:$0xff] }
 0x5c5   : > { %v1516_v57 = vpack.c.bf16 %v1510_v56, %v1510_v56  ;;  %v4407_v58 = vpop.f32.mrb[9].mxu1  ;;  %v4139_v56 = vcombine.high %v1852_v51, %v1856_v52 }
 0x5c6   : > { %v1513_v59 = vpop.f32.mrb[10].mxu1  ;;  %v1863_v58 = vld [vmem:[#allocation11 + $0x160] sm:$0xff] }
 0x5c7   : > { %1517 = vst [vmem:[#allocation2 + $0x4] sm:$0xf] %v1516_v57  ;;  %v4408_v60 = vpop.f32.mrb[11].mxu1  ;;  %v1859_v57 = vld [vmem:[#allocation11 + $0x140] sm:$0xff]  ;;  %v1860_v59 = vld [vmem:[#allocation11 + $0x148] sm:$0xff] }
 0x5c8   : > { %v1864_v60 = vld [vmem:[#allocation11 + $0x168] sm:$0xff] }
 0x5c9   : > { %v4147_v0 = vcombine.high %v1860_v59, %v1864_v60 }
 0x5ce   : > { %v1518_v61 = vld [vmem:[#allocation2] sm:$0xff] }
 0x5cf   : > { %v4070_v62 = vcombine.low %v1518_v61, %v1518_v61  ;;  %v4071_v63 = vcombine.high %v1518_v61, %v1518_v61  ;;  %v4136_v61 = vcombine.low %v1851_v49, %v1855_v50  ;;  %v4184_v50 = vcombine.low %v1899_v42, %v1903_v43 }
 0x5d1   : > { %1762 = vmatprep.mubr.bf16.mxu1 %v4071_v63  ;;  %v4145_v63 = vcombine.high %v1859_v57, %v1863_v58 }
 0x5d2   : > { %1763 = vmatmul.mubr.bf16.vlgmr.msra.gmra.mrb[12].mxu1 %v4070_v62  ;;  %v4138_v62 = vcombine.low %v1852_v51, %v1856_v52 }
 0x5d3   : > { %2671 = vmatpush1.bf16.msra.mxu1 %v4106_v27  ;;  %v1887_v27 = vld [vmem:[#allocation11 + $0x220] sm:$0xff] }
 0x6a5   : > { %v1764_v5 = vpop.f32.mrb[12].mxu1 }
 0x6a6   : > { %v1765_v7 = vadd.f32 %v1764_v5, %v1556_v3  ;;  %v1766_v9 = vpop.f32.mrb[13].mxu1  ;;  %v1867_v3 = vld [vmem:[#allocation11 + $0x180] sm:$0xff]  ;;  %v1868_v5 = vld [vmem:[#allocation11 + $0x188] sm:$0xff] }
 0x6a7   : > { %v1767_v10 = vadd.f32 %v1766_v9, %v1560_v4  ;;  %v1768_v11 = vpop.f32.mrb[14].mxu1  ;;  %v1871_v4 = vld [vmem:[#allocation11 + $0x1a0] sm:$0xff]  ;;  %v4144_v9 = vcombine.low %v1859_v57, %v1863_v58 }
 0x6a8   : > { %v5606_v12 = vadd.f32 %v1765_v7, %v5535_v1  ;;  %v1769_v13 = vpop.f32.mrb[15].mxu1  ;;  %v4113_v1 = vcombine.high %v1827_v25, %v1831_v26  ;;  %v1872_v7 = vld [vmem:[#allocation11 + $0x1a8] sm:$0xff]  ;;  %v4153_v11 = vcombine.high %v1867_v3, %v1871_v4  ;;  %v4152_v22 = vcombine.low %v1867_v3, %v1871_v4  ;;  %v1883_v26 = vld [vmem:[#allocation11 + $0x200] sm:$0xff] }
 0x6a9   : > { %v5609_v14 = vadd.f32 %v1767_v10, %v5537_v2  ;;  %v4115_v2 = vcombine.high %v1828_v29, %v1832_v30  ;;  %v4146_v10 = vcombine.low %v1860_v59, %v1864_v60  ;;  %v4155_v13 = vcombine.high %v1868_v5, %v1872_v7  ;;  %v1907_v59 = vld [vmem:[#allocation11 + $0x2c0] sm:$0xff] }
 0x6aa   : > { %2631 = vmatprep.subr.bf16.mxu0 %v4113_v1  ;;  %v4154_v23 = vcombine.low %v1868_v5, %v1872_v7  ;;  %v4163_v25 = vcombine.high %v1876_v17, %v1880_v21  ;;  %v1888_v1 = vld [vmem:[#allocation11 + $0x228] sm:$0xff]  ;;  %v4162_v30 = vcombine.low %v1876_v17, %v1880_v21  ;;  %v4169_v31 = vcombine.high %v1883_v26, %v1887_v27  ;;  %v1911_v60 = vld [vmem:[#allocation11 + $0x2e0] sm:$0xff] }
 0x6ab   : > { %v1775_v15 = vadd.f32 %v5609_v14, %v5606_v12  ;;  %2672 = vmatprep.subr.bf16.mxu1 %v4115_v2  ;;  %2632 = vmatpush1.bf16.msra.mxu0 %v4112_v37  ;;  %v4171_v2 = vcombine.high %v1884_v28, %v1888_v1  ;;  %v1896_v37 = vld [vmem:[#allocation11 + $0x268] sm:$0xff]  ;;  %v1915_v5 = vld [vmem:[#allocation11 + $0x300] sm:$0xff] }
 0x6ac   : > { %2673 = vmatpush1.bf16.msra.mxu1 %v4114_v38  ;;  %2633 = vmatprep.subr.bf16.mxu0 %v4121_v39  ;;  %v4168_v38 = vcombine.low %v1883_v26, %v1887_v27  ;;  %v4170_v39 = vcombine.low %v1884_v28, %v1888_v1  ;;  %v4179_v41 = vcombine.high %v1892_v36, %v1896_v37  ;;  %v1919_v7 = vld [vmem:[#allocation11 + $0x320] sm:$0xff] }
 0x6ad   : > { %1776 = vadd.xlane.f32.xlu0 %v1775_v15  ;;  %2674 = vmatprep.subr.bf16.mxu1 %v4123_v40  ;;  %v1875_v15 = vld [vmem:[#allocation11 + $0x1c0] sm:$0xff]  ;;  %v4177_v40 = vcombine.high %v1891_v34, %v1895_v35 }
 0x6ae   : > { %v4161_v24 = vcombine.high %v1875_v15, %v1879_v16  ;;  %v4160_v29 = vcombine.low %v1875_v15, %v1879_v16  ;;  %v1923_v17 = vld [vmem:[#allocation11 + $0x340] sm:$0xff] }
 0x6af   : > { %2634 = vmatpush1.bf16.msra.mxu0 %v4120_v45  ;;  %v1904_v45 = vld [vmem:[#allocation11 + $0x2a8] sm:$0xff]  ;;  %v1927_v21 = vld [vmem:[#allocation11 + $0x360] sm:$0xff] }
 0x6b0   : > { %2675 = vmatpush1.bf16.msra.mxu1 %v4122_v46  ;;  %2635 = vmatprep.subr.bf16.mxu0 %v4129_v47  ;;  %v4176_v46 = vcombine.low %v1891_v34, %v1895_v35  ;;  %v4178_v47 = vcombine.low %v1892_v36, %v1896_v37  ;;  %v4187_v49 = vcombine.high %v1900_v44, %v1904_v45  ;;  %v1931_v28 = vld [vmem:[#allocation11 + $0x380] sm:$0xff] }
 0x6b1   : > { %2676 = vmatprep.subr.bf16.mxu1 %v4131_v48  ;;  %v4185_v48 = vcombine.high %v1899_v42, %v1903_v43  ;;  %v4186_v51 = vcombine.low %v1900_v44, %v1904_v45  ;;  %v1935_v1 = vld [vmem:[#allocation11 + $0x3a0] sm:$0xff]  ;;  %v1821_v44 = vld [vmem:[#allocation11 + $0x10] sm:$0xff] }
 0x6b2   : > { %v1939_v36 = vld [vmem:[#allocation11 + $0x3c0] sm:$0xff]  ;;  %v1825_v45 = vld [vmem:[#allocation11 + $0x30] sm:$0xff] }
 0x6b3   : > { %2636 = vmatpush1.bf16.msra.mxu0 %v4128_v53  ;;  %v1943_v37 = vld [vmem:[#allocation11 + $0x3e0] sm:$0xff] }
 0x6b4   : > { %2677 = vmatpush1.bf16.msra.mxu1 %v4130_v54  ;;  %2637 = vmatprep.subr.bf16.mxu0 %v4137_v55 }
 0x6b5   : > { %2678 = vmatprep.subr.bf16.mxu1 %v4139_v56 }
 0x6b7   : > { %2638 = vmatpush1.bf16.msra.mxu0 %v4136_v61  ;;  %v1908_v61 = vld [vmem:[#allocation11 + $0x2c8] sm:$0xff] }
 0x6b8   : > { %2679 = vmatpush1.bf16.msra.mxu1 %v4138_v62  ;;  %2639 = vmatprep.subr.bf16.mxu0 %v4145_v63  ;;  %v4193_v62 = vcombine.high %v1907_v59, %v1911_v60  ;;  %v1912_v63 = vld [vmem:[#allocation11 + $0x2e8] sm:$0xff] }
 0x6b9   : > { %2680 = vmatprep.subr.bf16.mxu1 %v4147_v0  ;;  %v4192_v0 = vcombine.low %v1907_v59, %v1911_v60  ;;  %v4194_v3 = vcombine.low %v1908_v61, %v1912_v63  ;;  %v4195_v4 = vcombine.high %v1908_v61, %v1912_v63 }
 0x6bb   : > { %2640 = vmatpush1.bf16.msra.mxu0 %v4144_v9  ;;  %v1916_v9 = vld [vmem:[#allocation11 + $0x308] sm:$0xff] }
 0x6bc   : > { %2681 = vmatpush1.bf16.msra.mxu1 %v4146_v10  ;;  %2641 = vmatprep.subr.bf16.mxu0 %v4153_v11  ;;  %v4201_v10 = vcombine.high %v1915_v5, %v1919_v7  ;;  %v1920_v11 = vld [vmem:[#allocation11 + $0x328] sm:$0xff] }
 0x6bd   : > { %2682 = vmatprep.subr.bf16.mxu1 %v4155_v13  ;;  %v4200_v13 = vcombine.low %v1915_v5, %v1919_v7  ;;  %v4202_v15 = vcombine.low %v1916_v9, %v1920_v11  ;;  %v4203_v16 = vcombine.high %v1916_v9, %v1920_v11  ;;  %v1833_v11 = vld [vmem:[#allocation11 + $0x70] sm:$0xff] }
 0x6bf   : > { %2642 = vmatpush1.bf16.msra.mxu0 %v4152_v22  ;;  %v1924_v22 = vld [vmem:[#allocation11 + $0x348] sm:$0xff] }
 0x6c0   : > { %2683 = vmatpush1.bf16.msra.mxu1 %v4154_v23  ;;  %2643 = vmatprep.subr.bf16.mxu0 %v4161_v24  ;;  %v4209_v23 = vcombine.high %v1923_v17, %v1927_v21  ;;  %v1928_v24 = vld [vmem:[#allocation11 + $0x368] sm:$0xff] }
 0x6c1   : > { %2684 = vmatprep.subr.bf16.mxu1 %v4163_v25  ;;  %v4208_v25 = vcombine.low %v1923_v17, %v1927_v21  ;;  %v4210_v26 = vcombine.low %v1924_v22, %v1928_v24  ;;  %v4211_v27 = vcombine.high %v1924_v22, %v1928_v24  ;;  %v1837_v21 = vld [vmem:[#allocation11 + $0x90] sm:$0xff]  ;;  %v1842_v24 = vld [vmem:[#allocation11 + $0xb8] sm:$0xff] }
 0x6c2   : > { %v1841_v22 = vld [vmem:[#allocation11 + $0xb0] sm:$0xff] }
 0x6c3   : > { %2644 = vmatpush1.bf16.msra.mxu0 %v4160_v29  ;;  %v1932_v29 = vld [vmem:[#allocation11 + $0x388] sm:$0xff] }
 0x6c4   : > { %2685 = vmatpush1.bf16.msra.mxu1 %v4162_v30  ;;  %2645 = vmatprep.subr.bf16.mxu0 %v4169_v31  ;;  %v4217_v30 = vcombine.high %v1931_v28, %v1935_v1  ;;  %v1936_v31 = vld [vmem:[#allocation11 + $0x3a8] sm:$0xff] }
 0x6c5   : > { %2686 = vmatprep.subr.bf16.mxu1 %v4171_v2  ;;  %v4216_v2 = vcombine.low %v1931_v28, %v1935_v1  ;;  %v4218_v34 = vcombine.low %v1932_v29, %v1936_v31  ;;  %v4219_v35 = vcombine.high %v1932_v29, %v1936_v31  ;;  %v1845_v1 = vld [vmem:[#allocation11 + $0xd0] sm:$0xff]  ;;  %v1850_v31 = vld [vmem:[#allocation11 + $0xf8] sm:$0xff] }
 0x6c6   : > { %v1849_v29 = vld [vmem:[#allocation11 + $0xf0] sm:$0xff] }
 0x6c7   : > { %2646 = vmatpush1.bf16.msra.mxu0 %v4168_v38  ;;  %v1940_v38 = vld [vmem:[#allocation11 + $0x3c8] sm:$0xff] }
 0x6c8   : > { %2687 = vmatpush1.bf16.msra.mxu1 %v4170_v39  ;;  %2647 = vmatprep.subr.bf16.mxu0 %v4177_v40  ;;  %v4225_v39 = vcombine.high %v1939_v36, %v1943_v37  ;;  %v1944_v40 = vld [vmem:[#allocation11 + $0x3e8] sm:$0xff] }
 0x6c9   : > { %2688 = vmatprep.subr.bf16.mxu1 %v4179_v41  ;;  %v4224_v41 = vcombine.low %v1939_v36, %v1943_v37  ;;  %v4227_v42 = vcombine.high %v1940_v38, %v1944_v40  ;;  %v4226_v43 = vcombine.low %v1940_v38, %v1944_v40  ;;  %v1853_v37 = vld [vmem:[#allocation11 + $0x110] sm:$0xff]  ;;  %v1858_v40 = vld [vmem:[#allocation11 + $0x138] sm:$0xff] }
 0x6ca   : > { %v1857_v38 = vld [vmem:[#allocation11 + $0x130] sm:$0xff] }
 0x6cb   : > { %2648 = vmatpush1.bf16.msra.mxu0 %v4176_v46  ;;  %v1822_v46 = vld [vmem:[#allocation11 + $0x18] sm:$0xff] }
 0x6cc   : > { %2689 = vmatpush1.bf16.msra.mxu1 %v4178_v47  ;;  %2649 = vmatprep.subr.bf16.mxu0 %v4185_v48  ;;  %v4109_v47 = vcombine.high %v1821_v44, %v1825_v45  ;;  %v1826_v48 = vld [vmem:[#allocation11 + $0x38] sm:$0xff] }
 0x6cd   : > { %2690 = vmatprep.subr.bf16.mxu1 %v4187_v49  ;;  %v4108_v49 = vcombine.low %v1821_v44, %v1825_v45  ;;  %v1861_v45 = vld [vmem:[#allocation11 + $0x150] sm:$0xff] }
 0x6cf   : > { %2650 = vmatpush1.bf16.msra.mxu0 %v4184_v50  ;;  %v4110_v50 = vcombine.low %v1822_v46, %v1826_v48 }
 0x6d0   : > { %2691 = vmatpush1.bf16.msra.mxu1 %v4186_v51  ;;  %2651 = vmatprep.subr.bf16.mxu0 %v4193_v62  ;;  %v4111_v51 = vcombine.high %v1822_v46, %v1826_v48  ;;  %v1865_v46 = vld [vmem:[#allocation11 + $0x170] sm:$0xff]  ;;  %v1866_v48 = vld [vmem:[#allocation11 + $0x178] sm:$0xff] }
 0x6d1   : > { %2692 = vmatprep.subr.bf16.mxu1 %v4195_v4 }
 0x6d3   : > { %2652 = vmatpush1.bf16.msra.mxu0 %v4192_v0 }
 0x6d4   : > { %2693 = vmatpush1.bf16.msra.mxu1 %v4194_v3  ;;  %2653 = vmatprep.subr.bf16.mxu0 %v4201_v10  ;;  %v1829_v10 = vld [vmem:[#allocation11 + $0x50] sm:$0xff] }
 0x6d5   : > { %2694 = vmatprep.subr.bf16.mxu1 %v4203_v16 }
 0x6d7   : > { %2654 = vmatpush1.bf16.msra.mxu0 %v4200_v13  ;;  %v1830_v13 = vld [vmem:[#allocation11 + $0x58] sm:$0xff] }
 0x6d8   : > { %2695 = vmatpush1.bf16.msra.mxu1 %v4202_v15  ;;  %2655 = vmatprep.subr.bf16.mxu0 %v4209_v23  ;;  %v1834_v15 = vld [vmem:[#allocation11 + $0x78] sm:$0xff] }
 0x6d9   : > { %2696 = vmatprep.subr.bf16.mxu1 %v4211_v27  ;;  %v1838_v23 = vld [vmem:[#allocation11 + $0x98] sm:$0xff]  ;;  %v4125_v27 = vcombine.high %v1837_v21, %v1841_v22 }
 0x6da   : > { %v4127_v28 = vcombine.high %v1838_v23, %v1842_v24 }
 0x6db   : > { %2656 = vmatpush1.bf16.msra.mxu0 %v4208_v25  ;;  %v4116_v25 = vcombine.low %v1829_v10, %v1833_v11 }
 0x6dc   : > { %2697 = vmatpush1.bf16.msra.mxu1 %v4210_v26  ;;  %2657 = vmatprep.subr.bf16.mxu0 %v4217_v30  ;;  %v4118_v26 = vcombine.low %v1830_v13, %v1834_v15  ;;  %v1846_v30 = vld [vmem:[#allocation11 + $0xd8] sm:$0xff] }
 0x6dd   : > { %2698 = vmatprep.subr.bf16.mxu1 %v4219_v35  ;;  %v4133_v35 = vcombine.high %v1845_v1, %v1849_v29  ;;  %v4135_v36 = vcombine.high %v1846_v30, %v1850_v31 }
 0x6df   : > { %2658 = vmatpush1.bf16.msra.mxu0 %v4216_v2  ;;  %v4124_v2 = vcombine.low %v1837_v21, %v1841_v22 }
 0x6e0   : > { %2699 = vmatpush1.bf16.msra.mxu1 %v4218_v34  ;;  %2659 = vmatprep.subr.bf16.mxu0 %v4225_v39  ;;  %v4126_v34 = vcombine.low %v1838_v23, %v1842_v24  ;;  %v1854_v39 = vld [vmem:[#allocation11 + $0x118] sm:$0xff]  ;;  %v1893_v23 = vld [vmem:[#allocation11 + $0x250] sm:$0xff] }
 0x6e1   : > { %2700 = vmatprep.subr.bf16.mxu1 %v4227_v42  ;;  %v4134_v42 = vcombine.low %v1846_v30, %v1850_v31  ;;  %v4143_v44 = vcombine.high %v1854_v39, %v1858_v40  ;;  %v1897_v24 = vld [vmem:[#allocation11 + $0x270] sm:$0xff] }
 0x6e2   : > { %v1901_v30 = vld [vmem:[#allocation11 + $0x290] sm:$0xff] }
 0x6e3   : > { %2660 = vmatpush1.bf16.msra.mxu0 %v4224_v41  ;;  %v4132_v41 = vcombine.low %v1845_v1, %v1849_v29  ;;  %v4181_v1 = vcombine.high %v1893_v23, %v1897_v24  ;;  %v1905_v31 = vld [vmem:[#allocation11 + $0x2b0] sm:$0xff] }
 0x6e4   : > { %2701 = vmatpush1.bf16.msra.mxu1 %v4226_v43  ;;  %2711 = vmatprep.subr.bf16.mxu0 %v4109_v47  ;;  %v4141_v43 = vcombine.high %v1853_v37, %v1857_v38  ;;  %v1862_v47 = vld [vmem:[#allocation11 + $0x158] sm:$0xff] }
 0x6e5   : > { %2752 = vmatprep.subr.bf16.mxu1 %v4111_v51  ;;  %v4149_v51 = vcombine.high %v1861_v45, %v1865_v46 }
 0x73a   : > { %v1777_v52 = vpop.xlane.xlu0 %1776 }
 0x73b   : > { %v1778_v53 = vmul.f32 0.00390625, %v1777_v52 }
 0x73d   : > { %v5614_v54 = vsub.f32 %v5606_v12, %v1778_v53  ;;  %v5617_v55 = vsub.f32 %v5609_v14, %v1778_v53 }
 0x73f   : > { %v1781_v56 = vmul.f32 %v5614_v54, %v5614_v54  ;;  %v1782_v57 = vmul.f32 %v5617_v55, %v5617_v55 }
 0x741   : > { %v1783_v58 = vadd.f32 %v1782_v57, %v1781_v56  ;;  %v1773_v57 = vld [vmem:[%s5781_s30] sm:$0x3]  ;;  %s527_s30 = scalar_lea.vmem [#allocation14], %s3965_s11  ;;  %s5118_s11 = sshll.u32 %s5208_s14, 4  ;;  %s5119_s11 = int_to_ptr.vmem [resolvable:$false] %s5118_s11 }
 0x742   : > { %v1799_v59 = vrot.slane %v1773_v57, %v5554_v19  ;;  %v1795_v60 = vrot.slane %v1773_v57, %v5557_v20  ;;  %v1870_v57 = vld [vmem:[#allocation11 + $0x198] sm:$0xff]  ;;  %s3835_s19 = sshll.u32 %s527_s30, 4  ;;  %s5120_s10 = scalar_lea.vmem %s5119_s11, 256  ;;  %s5697_s19 = int_to_ptr.vmem [resolvable:$true] %s3835_s19 }
 0x743   : > { %1784 = vadd.xlane.f32.xlu1 %v1783_v58  ;;  %v1774_v58 = vld [vmem:[%s5782_s15] sm:$0x3]  ;;  %s5114_s18 = scalar_lea.vmem %s5697_s19, 128  ;;  %p5121_p13 = scmp.lt.s32.totalorder %s5697_s19, %s5119_s11 }
 0x744   : > { %v1812_v0 = vrot.slane %v1774_v58, %v5554_v19  ;;  %v1808_v3 = vrot.slane %v1774_v58, %v5557_v20  ;;  %v1874_v58 = vld [vmem:[#allocation11 + $0x1b8] sm:$0xff]  ;;  %p5115_p7 = scmp.ne.s32.totalorder %s5697_s19, %s5114_s18  ;;  %p5122_p0 = scmp.lt.s32.totalorder %s5120_s10, %s5114_s18 }
 0x746   : > { %p5116_p12 = pnand %p5115_p7, %p5786_p4  ;;  %p5123_p2 = por %p5122_p0, %p5121_p13 }
 0x748   : > { %p5117_p1 = pneg %p5116_p12 }
 0x74a   : > { %p5124_p3 = pnand %p5123_p2, %p5117_p1 }
 0x7d0   : > { %v1785_v52 = vpop.xlane.xlu1 %1784 }
 0x7d1   : > { %v1786_v53 = vmul.f32 0.00390625, %v1785_v52  ;;  %v4151_v52 = vcombine.high %v1862_v47, %v1866_v48 }
 0x7d3   : > { %v1787_v56 = vadd.f32 1e-05, %v1786_v53  ;;  %v1869_v53 = vld [vmem:[#allocation11 + $0x190] sm:$0xff] }
 0x7d5   : > { %4910 = vrsqrt.f32 %v1787_v56  ;;  %v1873_v56 = vld [vmem:[#allocation11 + $0x1b0] sm:$0xff] }
 0x7df   : > { %v4911_v61 = vpop.eup %4910 }
 0x7e0   : > { %v1789_v62 = vmul.f32 %v4911_v61, %v5614_v54  ;;  %v1790_v63 = vmul.f32 %v4911_v61, %v5617_v55  ;;  %v4117_v54 = vcombine.high %v1829_v10, %v1833_v11  ;;  %v4119_v55 = vcombine.high %v1830_v13, %v1834_v15  ;;  %v1885_v11 = vld [vmem:[#allocation11 + $0x210] sm:$0xff]  ;;  %v1886_v15 = vld [vmem:[#allocation11 + $0x218] sm:$0xff] }
 0x7e1   : > { %v4157_v61 = vcombine.high %v1869_v53, %v1873_v56  ;;  %v1889_v13 = vld [vmem:[#allocation11 + $0x230] sm:$0xff] }
 0x7e2   : > { %v1803_v4 = vmul.f32 %v1799_v59, %v1790_v63  ;;  %v1802_v5 = vmul.f32 %v1795_v60, %v1789_v62  ;;  %v4148_v59 = vcombine.low %v1861_v45, %v1865_v46  ;;  %v4150_v60 = vcombine.low %v1862_v47, %v1866_v48  ;;  %v1877_v63 = vld [vmem:[#allocation11 + $0x1d0] sm:$0xff] }
 0x7e3   : > { %v4159_v62 = vcombine.high %v1870_v57, %v1874_v58  ;;  %v1917_v47 = vld [vmem:[#allocation11 + $0x310] sm:$0xff] }
 0x7e4   : > { %v1816_v7 = vadd.f32 %v1812_v0, %v1803_v4  ;;  %v1815_v9 = vadd.f32 %v1808_v3, %v1802_v5  ;;  %v1881_v0 = vld [vmem:[#allocation11 + $0x1f0] sm:$0xff]  ;;  %v1878_v3 = vld [vmem:[#allocation11 + $0x1d8] sm:$0xff]  ;;  %v4156_v5 = vcombine.low %v1869_v53, %v1873_v56 }
 0x7e5   : > { %v1882_v4 = vld [vmem:[#allocation11 + $0x1f8] sm:$0xff]  ;;  %v4164_v21 = vcombine.low %v1877_v63, %v1881_v0  ;;  %v1921_v48 = vld [vmem:[#allocation11 + $0x330] sm:$0xff] }
 0x7e6   : > { %v1818_v16 = vpack.c.bf16 %v1816_v7, %v1816_v7  ;;  %v5635_v17 = vpack.c.bf16 %v1815_v9, %v1815_v9  ;;  %v4158_v7 = vcombine.low %v1870_v57, %v1874_v58  ;;  %v4165_v9 = vcombine.high %v1877_v63, %v1881_v0  ;;  %v1925_v57 = vld [vmem:[#allocation11 + $0x350] sm:$0xff] }
 0x7e7   : > { %v4167_v10 = vcombine.high %v1878_v3, %v1882_v4  ;;  %v4205_v53 = vcombine.high %v1917_v47, %v1921_v48  ;;  %v1929_v58 = vld [vmem:[#allocation11 + $0x370] sm:$0xff] }
 0x7e8   : > { %2661 = vmatprep.mubr.bf16.mxu0 %v1818_v16  ;;  %2702 = vmatprep.mubr.bf16.mxu1 %v1818_v16  ;;  %v4213_v63 = vcombine.high %v1925_v57, %v1929_v58 }
 0x7e9   : > { %2662 = vmatmul.mubr.bf16.vlgmr.msra.gmra.mrb[16].mxu0 %v5635_v17  ;;  %2703 = vmatmul.mubr.bf16.vlgmr.msra.gmra.mrb[16].mxu1 %v5635_v17 }
 0x7ea   : > { %2712 = vmatpush1.bf16.msra.mxu0 %v4108_v49  ;;  %2753 = vmatpush1.bf16.msra.mxu1 %v4110_v50  ;;  %v4140_v49 = vcombine.low %v1853_v37, %v1857_v38  ;;  %v4142_v50 = vcombine.low %v1854_v39, %v1858_v40  ;;  %v4189_v37 = vcombine.high %v1901_v30, %v1905_v31  ;;  %v1909_v39 = vld [vmem:[#allocation11 + $0x2d0] sm:$0xff] }
 0x7eb   : > { %2743 = vmatprep.mubr.bf16.mxu0 %v1818_v16  ;;  %2784 = vmatprep.mubr.bf16.mxu1 %v1818_v16  ;;  %v1890_v16 = vld [vmem:[#allocation11 + $0x238] sm:$0xff]  ;;  %v1913_v40 = vld [vmem:[#allocation11 + $0x2f0] sm:$0xff] }
 0x7ec   : > { %2713 = vmatprep.subr.bf16.mxu0 %v4117_v54  ;;  %2754 = vmatprep.subr.bf16.mxu1 %v4119_v55  ;;  %v4166_v54 = vcombine.low %v1878_v3, %v1882_v4  ;;  %v4173_v55 = vcombine.high %v1885_v11, %v1889_v13  ;;  %v4175_v22 = vcombine.high %v1886_v15, %v1890_v16  ;;  %v1933_v3 = vld [vmem:[#allocation11 + $0x390] sm:$0xff] }
 0x7ed   : > { %v4197_v45 = vcombine.high %v1909_v39, %v1913_v40  ;;  %v1937_v4 = vld [vmem:[#allocation11 + $0x3b0] sm:$0xff] }
 0x7ee   : > { %2714 = vmatpush1.bf16.msra.mxu0 %v4116_v25  ;;  %2755 = vmatpush1.bf16.msra.mxu1 %v4118_v26  ;;  %v1894_v25 = vld [vmem:[#allocation11 + $0x258] sm:$0xff] }
 0x7ef   : > { %2715 = vmatprep.subr.bf16.mxu0 %v4125_v27  ;;  %2756 = vmatprep.subr.bf16.mxu1 %v4127_v28  ;;  %v1898_v26 = vld [vmem:[#allocation11 + $0x278] sm:$0xff]  ;;  %v4172_v27 = vcombine.low %v1885_v11, %v1889_v13  ;;  %v4174_v28 = vcombine.low %v1886_v15, %v1890_v16  ;;  %v4221_v11 = vcombine.high %v1933_v3, %v1937_v4  ;;  %v1941_v15 = vld [vmem:[#allocation11 + $0x3d0] sm:$0xff] }
 0x7f0   : > { %v4183_v29 = vcombine.high %v1894_v25, %v1898_v26  ;;  %v1945_v16 = vld [vmem:[#allocation11 + $0x3f0] sm:$0xff] }
 0x7f2   : > { %2716 = vmatpush1.bf16.msra.mxu0 %v4124_v2  ;;  %2757 = vmatpush1.bf16.msra.mxu1 %v4126_v34  ;;  %v1902_v2 = vld [vmem:[#allocation11 + $0x298] sm:$0xff] }
 0x7f3   : > { %2717 = vmatprep.subr.bf16.mxu0 %v4133_v35  ;;  %2758 = vmatprep.subr.bf16.mxu1 %v4135_v36  ;;  %v1906_v34 = vld [vmem:[#allocation11 + $0x2b8] sm:$0xff]  ;;  %v4180_v35 = vcombine.low %v1893_v23, %v1897_v24  ;;  %v4182_v36 = vcombine.low %v1894_v25, %v1898_v26  ;;  %v4229_v23 = vcombine.high %v1941_v15, %v1945_v16 }
 0x7f4   : > { %v4191_v38 = vcombine.high %v1902_v2, %v1906_v34  ;;  %v4228_v25 = vcombine.low %v1941_v15, %v1945_v16  ;;  %v4779_v15 = vld [vmem:[#allocation12 + $0x1b4] ss:$8 sps:$4 sm:$0xff]   ;;  %v4774_v16 = vld [vmem:[#allocation12 + $0xb0] ss:$8 sps:$4 sm:$0xff]  }
 0x7f6   : > { %2718 = vmatpush1.bf16.msra.mxu0 %v4132_v41  ;;  %2759 = vmatpush1.bf16.msra.mxu1 %v4134_v42  ;;  %v1910_v41 = vld [vmem:[#allocation11 + $0x2d8] sm:$0xff] }
 0x7f7   : > { %2719 = vmatprep.subr.bf16.mxu0 %v4141_v43  ;;  %2760 = vmatprep.subr.bf16.mxu1 %v4143_v44  ;;  %v1914_v42 = vld [vmem:[#allocation11 + $0x2f8] sm:$0xff]  ;;  %v4188_v43 = vcombine.low %v1901_v30, %v1905_v31  ;;  %v4190_v44 = vcombine.low %v1902_v2, %v1906_v34 }
 0x7f8   : > { %v4199_v46 = vcombine.high %v1910_v41, %v1914_v42  ;;  %v4716_v30 = vld [vmem:[#allocation12 + $0x14] ss:$8 sps:$4 sm:$0xff]   ;;  %v4714_v2 = vld [vmem:[#allocation12 + $0x10] ss:$8 sps:$4 sm:$0xff]  }
 0x7f9   : > { %v4719_v31 = vld [vmem:[#allocation12 + $0x114] ss:$8 sps:$4 sm:$0xff]   ;;  %v4717_v34 = vld [vmem:[#allocation12 + $0x110] ss:$8 sps:$4 sm:$0xff]  }
 0x7fa   : > { %2720 = vmatpush1.bf16.msra.mxu0 %v4140_v49  ;;  %2761 = vmatpush1.bf16.msra.mxu1 %v4142_v50  ;;  %v1918_v49 = vld [vmem:[#allocation11 + $0x318] sm:$0xff] }
 0x7fb   : > { %2721 = vmatprep.subr.bf16.mxu0 %v4149_v51  ;;  %2762 = vmatprep.subr.bf16.mxu1 %v4151_v52  ;;  %v1922_v50 = vld [vmem:[#allocation11 + $0x338] sm:$0xff]  ;;  %v4196_v51 = vcombine.low %v1909_v39, %v1913_v40  ;;  %v4198_v52 = vcombine.low %v1910_v41, %v1914_v42  ;;  %v4734_v42 = vld [vmem:[#allocation12 + $0x44] ss:$8 sps:$4 sm:$0xff]  }
 0x7fc   : > { %v4207_v56 = vcombine.high %v1918_v49, %v1922_v50  ;;  %v4728_v39 = vld [vmem:[#allocation12 + $0x34] ss:$8 sps:$4 sm:$0xff]   ;;  %v4726_v41 = vld [vmem:[#allocation12 + $0x30] ss:$8 sps:$4 sm:$0xff]  }
 0x7fd   : > { %v4731_v40 = vld [vmem:[#allocation12 + $0x134] ss:$8 sps:$4 sm:$0xff]  }
 0x7fe   : > { %2722 = vmatpush1.bf16.msra.mxu0 %v4148_v59  ;;  %2763 = vmatpush1.bf16.msra.mxu1 %v4150_v60  ;;  %v1926_v59 = vld [vmem:[#allocation11 + $0x358] sm:$0xff] }
 0x7ff   : > { %2723 = vmatprep.subr.bf16.mxu0 %v4157_v61  ;;  %2764 = vmatprep.subr.bf16.mxu1 %v4159_v62  ;;  %v1930_v60 = vld [vmem:[#allocation11 + $0x378] sm:$0xff]  ;;  %v4204_v61 = vcombine.low %v1917_v47, %v1921_v48  ;;  %v4206_v62 = vcombine.low %v1918_v49, %v1922_v50  ;;  %v4746_v50 = vld [vmem:[#allocation12 + $0x64] ss:$8 sps:$4 sm:$0xff]  }
 0x800   : > { %v4215_v0 = vcombine.high %v1926_v59, %v1930_v60  ;;  %v4743_v47 = vld [vmem:[#allocation12 + $0x154] ss:$8 sps:$4 sm:$0xff]   ;;  %v4738_v48 = vld [vmem:[#allocation12 + $0x50] ss:$8 sps:$4 sm:$0xff]  }
 0x801   : > { %v4741_v49 = vld [vmem:[#allocation12 + $0x150] ss:$8 sps:$4 sm:$0xff]  }
 0x802   : > { %2724 = vmatpush1.bf16.msra.mxu0 %v4156_v5  ;;  %2765 = vmatpush1.bf16.msra.mxu1 %v4158_v7  ;;  %v1934_v5 = vld [vmem:[#allocation11 + $0x398] sm:$0xff] }
 0x803   : > { %2725 = vmatprep.subr.bf16.mxu0 %v4165_v9  ;;  %2766 = vmatprep.subr.bf16.mxu1 %v4167_v10  ;;  %v1938_v7 = vld [vmem:[#allocation11 + $0x3b8] sm:$0xff]  ;;  %v4212_v9 = vcombine.low %v1925_v57, %v1929_v58  ;;  %v4214_v10 = vcombine.low %v1926_v59, %v1930_v60  ;;  %v4758_v60 = vld [vmem:[#allocation12 + $0x84] ss:$8 sps:$4 sm:$0xff]  }
 0x804   : > { %v4223_v13 = vcombine.high %v1934_v5, %v1938_v7  ;;  %v4755_v57 = vld [vmem:[#allocation12 + $0x174] ss:$8 sps:$4 sm:$0xff]   ;;  %v4750_v58 = vld [vmem:[#allocation12 + $0x70] ss:$8 sps:$4 sm:$0xff]  }
 0x805   : > { %v4753_v59 = vld [vmem:[#allocation12 + $0x170] ss:$8 sps:$4 sm:$0xff]  }
 0x806   : > { %2726 = vmatpush1.bf16.msra.mxu0 %v4164_v21  ;;  %2767 = vmatpush1.bf16.msra.mxu1 %v4166_v54  ;;  %v1942_v21 = vld [vmem:[#allocation11 + $0x3d8] sm:$0xff] }
 0x807   : > { %2727 = vmatprep.subr.bf16.mxu0 %v4173_v55  ;;  %2768 = vmatprep.subr.bf16.mxu1 %v4175_v22  ;;  %v1946_v54 = vld [vmem:[#allocation11 + $0x3f8] sm:$0xff]  ;;  %v4220_v55 = vcombine.low %v1933_v3, %v1937_v4  ;;  %v4222_v22 = vcombine.low %v1934_v5, %v1938_v7  ;;  %v4770_v7 = vld [vmem:[#allocation12 + $0xa4] ss:$8 sps:$4 sm:$0xff]  }
 0x808   : > { %v4231_v24 = vcombine.high %v1942_v21, %v1946_v54  ;;  %v4230_v26 = vcombine.low %v1942_v21, %v1946_v54  ;;  %v4767_v3 = vld [vmem:[#allocation12 + $0x194] ss:$8 sps:$4 sm:$0xff]   ;;  %v4762_v4 = vld [vmem:[#allocation12 + $0x90] ss:$8 sps:$4 sm:$0xff]   ;;  %v4782_v54 = vld [vmem:[#allocation12 + $0xc4] ss:$8 sps:$4 sm:$0xff]  }
 0x809   : > { %v4765_v5 = vld [vmem:[#allocation12 + $0x190] ss:$8 sps:$4 sm:$0xff]  }
 0x80a   : > { %2728 = vmatpush1.bf16.msra.mxu0 %v4172_v27  ;;  %2769 = vmatpush1.bf16.msra.mxu1 %v4174_v28  ;;  %v4710_v27 = vld [vmem:[#allocation12 + $0x4] ss:$8 sps:$4 sm:$0xff]   ;;  %v4777_v21 = vld [vmem:[#allocation12 + $0x1b0] ss:$8 sps:$4 sm:$0xff]  }
 0x80b   : > { %2729 = vmatprep.subr.bf16.mxu0 %v4181_v1  ;;  %2770 = vmatprep.subr.bf16.mxu1 %v4183_v29  ;;  %v4713_v28 = vld [vmem:[#allocation12 + $0x104] ss:$8 sps:$4 sm:$0xff]   ;;  %v4708_v1 = vld [vmem:[#allocation12] ss:$8 sps:$4 sm:$0xff]  }
 0x80c   : > { %v4711_v29 = vld [vmem:[#allocation12 + $0x100] ss:$8 sps:$4 sm:$0xff]  }
 0x80e   : > { %2730 = vmatpush1.bf16.msra.mxu0 %v4180_v35  ;;  %2771 = vmatpush1.bf16.msra.mxu1 %v4182_v36  ;;  %v4722_v35 = vld [vmem:[#allocation12 + $0x24] ss:$8 sps:$4 sm:$0xff]  }
 0x80f   : > { %2731 = vmatprep.subr.bf16.mxu0 %v4189_v37  ;;  %2772 = vmatprep.subr.bf16.mxu1 %v4191_v38  ;;  %v4725_v36 = vld [vmem:[#allocation12 + $0x124] ss:$8 sps:$4 sm:$0xff]   ;;  %v4720_v37 = vld [vmem:[#allocation12 + $0x20] ss:$8 sps:$4 sm:$0xff]  }
 0x810   : > { %v4723_v38 = vld [vmem:[#allocation12 + $0x120] ss:$8 sps:$4 sm:$0xff]  }
 0x812   : > { %2732 = vmatpush1.bf16.msra.mxu0 %v4188_v43  ;;  %2773 = vmatpush1.bf16.msra.mxu1 %v4190_v44  ;;  %v4737_v43 = vld [vmem:[#allocation12 + $0x144] ss:$8 sps:$4 sm:$0xff]   ;;  %v4732_v44 = vld [vmem:[#allocation12 + $0x40] ss:$8 sps:$4 sm:$0xff]  }
 0x813   : > { %2733 = vmatprep.subr.bf16.mxu0 %v4197_v45  ;;  %2774 = vmatprep.subr.bf16.mxu1 %v4199_v46  ;;  %v4735_v45 = vld [vmem:[#allocation12 + $0x140] ss:$8 sps:$4 sm:$0xff]   ;;  %v4740_v46 = vld [vmem:[#allocation12 + $0x54] ss:$8 sps:$4 sm:$0xff]  }
 0x816   : > { %2734 = vmatpush1.bf16.msra.mxu0 %v4196_v51  ;;  %2775 = vmatpush1.bf16.msra.mxu1 %v4198_v52  ;;  %v4749_v51 = vld [vmem:[#allocation12 + $0x164] ss:$8 sps:$4 sm:$0xff]   ;;  %v4744_v52 = vld [vmem:[#allocation12 + $0x60] ss:$8 sps:$4 sm:$0xff]  }
 0x817   : > { %2735 = vmatprep.subr.bf16.mxu0 %v4205_v53  ;;  %2776 = vmatprep.subr.bf16.mxu1 %v4207_v56  ;;  %v4747_v53 = vld [vmem:[#allocation12 + $0x160] ss:$8 sps:$4 sm:$0xff]   ;;  %v4752_v56 = vld [vmem:[#allocation12 + $0x74] ss:$8 sps:$4 sm:$0xff]  }
 0x81a   : > { %2736 = vmatpush1.bf16.msra.mxu0 %v4204_v61  ;;  %2777 = vmatpush1.bf16.msra.mxu1 %v4206_v62  ;;  %v4761_v61 = vld [vmem:[#allocation12 + $0x184] ss:$8 sps:$4 sm:$0xff]   ;;  %v4756_v62 = vld [vmem:[#allocation12 + $0x80] ss:$8 sps:$4 sm:$0xff]  }
 0x81b   : > { %2737 = vmatprep.subr.bf16.mxu0 %v4213_v63  ;;  %2778 = vmatprep.subr.bf16.mxu1 %v4215_v0  ;;  %v4759_v63 = vld [vmem:[#allocation12 + $0x180] ss:$8 sps:$4 sm:$0xff]   ;;  %v4764_v0 = vld [vmem:[#allocation12 + $0x94] ss:$8 sps:$4 sm:$0xff]  }
 0x81e   : > { %2738 = vmatpush1.bf16.msra.mxu0 %v4212_v9  ;;  %2779 = vmatpush1.bf16.msra.mxu1 %v4214_v10  ;;  %v4773_v9 = vld [vmem:[#allocation12 + $0x1a4] ss:$8 sps:$4 sm:$0xff]   ;;  %v4768_v10 = vld [vmem:[#allocation12 + $0xa0] ss:$8 sps:$4 sm:$0xff]  }
 0x81f   : > { %2739 = vmatprep.subr.bf16.mxu0 %v4221_v11  ;;  %2780 = vmatprep.subr.bf16.mxu1 %v4223_v13  ;;  %v4771_v11 = vld [vmem:[#allocation12 + $0x1a0] ss:$8 sps:$4 sm:$0xff]   ;;  %v4776_v13 = vld [vmem:[#allocation12 + $0xb4] ss:$8 sps:$4 sm:$0xff]  }
 0x822   : > { %2740 = vmatpush1.bf16.msra.mxu0 %v4220_v55  ;;  %2781 = vmatpush1.bf16.msra.mxu1 %v4222_v22  ;;  %v4785_v55 = vld [vmem:[#allocation12 + $0x1c4] ss:$8 sps:$4 sm:$0xff]   ;;  %v4780_v22 = vld [vmem:[#allocation12 + $0xc0] ss:$8 sps:$4 sm:$0xff]  }
 0x823   : > { %2741 = vmatprep.subr.bf16.mxu0 %v4229_v23  ;;  %2782 = vmatprep.subr.bf16.mxu1 %v4231_v24  ;;  %v4783_v23 = vld [vmem:[#allocation12 + $0x1c0] ss:$8 sps:$4 sm:$0xff]   ;;  %v4788_v24 = vld [vmem:[#allocation12 + $0xd4] ss:$8 sps:$4 sm:$0xff]  }
 0x826   : > { %2742 = vmatpush1.bf16.msra.mxu0 %v4228_v25  ;;  %2783 = vmatpush1.bf16.msra.mxu1 %v4230_v26  ;;  %v4791_v25 = vld [vmem:[#allocation12 + $0x1d4] ss:$8 sps:$4 sm:$0xff]   ;;  %v4786_v26 = vld [vmem:[#allocation12 + $0xd0] ss:$8 sps:$4 sm:$0xff]  }
 0x827   : > { %3645 = vmatprep.subr.bf16.mxu0 %v4710_v27  ;;  %3686 = vmatprep.subr.bf16.mxu1 %v4713_v28  ;;  %v4789_v27 = vld [vmem:[#allocation12 + $0x1d0] ss:$8 sps:$4 sm:$0xff]   ;;  %v4794_v28 = vld [vmem:[#allocation12 + $0xe4] ss:$8 sps:$4 sm:$0xff]  }
 0x829   : > { %2744 = vmatmul.mubr.bf16.vlgmr.msra.gmra.mrb[20].mxu0 %v5635_v17  ;;  %2785 = vmatmul.mubr.bf16.vlgmr.msra.gmra.mrb[20].mxu1 %v5635_v17  ;;  %v4729_v17 = vld [vmem:[#allocation12 + $0x130] ss:$8 sps:$4 sm:$0xff]  }
 0x82a   : > { %3646 = vmatpush1.bf16.msra.mxu0 %v4708_v1  ;;  %3687 = vmatpush1.bf16.msra.mxu1 %v4711_v29  ;;  %v4797_v1 = vld [vmem:[#allocation12 + $0x1e4] ss:$8 sps:$4 sm:$0xff]   ;;  %v4792_v29 = vld [vmem:[#allocation12 + $0xe0] ss:$8 sps:$4 sm:$0xff]  }
 0x82b   : > { %3647 = vmatprep.subr.bf16.mxu0 %v4716_v30  ;;  %3688 = vmatprep.subr.bf16.mxu1 %v4719_v31  ;;  %v4795_v30 = vld [vmem:[#allocation12 + $0x1e0] ss:$8 sps:$4 sm:$0xff]   ;;  %v4800_v31 = vld [vmem:[#allocation12 + $0xf4] ss:$8 sps:$4 sm:$0xff]  }
 0x82e   : > { %3648 = vmatpush1.bf16.msra.mxu0 %v4714_v2  ;;  %3689 = vmatpush1.bf16.msra.mxu1 %v4717_v34  ;;  %v4803_v2 = vld [vmem:[#allocation12 + $0x1f4] ss:$8 sps:$4 sm:$0xff]   ;;  %v4798_v34 = vld [vmem:[#allocation12 + $0xf0] ss:$8 sps:$4 sm:$0xff]  }
 0x82f   : > { %3649 = vmatprep.subr.bf16.mxu0 %v4722_v35  ;;  %3690 = vmatprep.subr.bf16.mxu1 %v4725_v36  ;;  %v4801_v35 = vld [vmem:[#allocation12 + $0x1f0] ss:$8 sps:$4 sm:$0xff]   ;;  %v4806_v36 = vld [vmem:[#allocation12 + $0x204] ss:$8 sps:$4 sm:$0xff]  }
 0x832   : > { %3650 = vmatpush1.bf16.msra.mxu0 %v4720_v37  ;;  %3691 = vmatpush1.bf16.msra.mxu1 %v4723_v38  ;;  %v4809_v37 = vld [vmem:[#allocation12 + $0x304] ss:$8 sps:$4 sm:$0xff]  }
 0x833   : > { %3651 = vmatprep.subr.bf16.mxu0 %v4728_v39  ;;  %3692 = vmatprep.subr.bf16.mxu1 %v4731_v40  ;;  %v5644_v38 = vld [vmem:[%s5783_s21] sm:$0xff]  ;;  %s3821_s21 = scalar_lea.sflag [#allocation5], %s5513_s12 }
 0x834   : > { %v1952_v39 = vrot.slane %v5644_v38, %v5557_v20  ;;  %v1960_v40 = vrot.slane %v5644_v38, %v687_v6 }
 0x836   : > { %3652 = vmatpush1.bf16.msra.mxu0 %v4726_v41  ;;  %3693 = vmatpush1.bf16.msra.mxu1 %v4729_v17  ;;  %v1956_v41 = vrot.slane %v5644_v38, %v5554_v19  ;;  %v1964_v17 = vrot.slane %v5644_v38, %v691_v8 }
 0x837   : > { %3653 = vmatprep.subr.bf16.mxu0 %v4734_v42  ;;  %3694 = vmatprep.subr.bf16.mxu1 %v4737_v43 }
 0x83a   : > { %3654 = vmatpush1.bf16.msra.mxu0 %v4732_v44  ;;  %3695 = vmatpush1.bf16.msra.mxu1 %v4735_v45 }
 0x83b   : > { %3655 = vmatprep.subr.bf16.mxu0 %v4740_v46  ;;  %3696 = vmatprep.subr.bf16.mxu1 %v4743_v47 }
 0x83e   : > { %3656 = vmatpush1.bf16.msra.mxu0 %v4738_v48  ;;  %3697 = vmatpush1.bf16.msra.mxu1 %v4741_v49 }
 0x83f   : > { %3657 = vmatprep.subr.bf16.mxu0 %v4746_v50  ;;  %3698 = vmatprep.subr.bf16.mxu1 %v4749_v51 }
 0x842   : > { %3658 = vmatpush1.bf16.msra.mxu0 %v4744_v52  ;;  %3699 = vmatpush1.bf16.msra.mxu1 %v4747_v53 }
 0x843   : > { %3659 = vmatprep.subr.bf16.mxu0 %v4752_v56  ;;  %3700 = vmatprep.subr.bf16.mxu1 %v4755_v57 }
 0x846   : > { %3660 = vmatpush1.bf16.msra.mxu0 %v4750_v58  ;;  %3701 = vmatpush1.bf16.msra.mxu1 %v4753_v59 }
 0x847   : > { %3661 = vmatprep.subr.bf16.mxu0 %v4758_v60  ;;  %3702 = vmatprep.subr.bf16.mxu1 %v4761_v61 }
 0x84a   : > { %3662 = vmatpush1.bf16.msra.mxu0 %v4756_v62  ;;  %3703 = vmatpush1.bf16.msra.mxu1 %v4759_v63 }
 0x84b   : > { %3663 = vmatprep.subr.bf16.mxu0 %v4764_v0  ;;  %3704 = vmatprep.subr.bf16.mxu1 %v4767_v3 }
 0x84e   : > { %3664 = vmatpush1.bf16.msra.mxu0 %v4762_v4  ;;  %3705 = vmatpush1.bf16.msra.mxu1 %v4765_v5 }
 0x84f   : > { %3665 = vmatprep.subr.bf16.mxu0 %v4770_v7  ;;  %3706 = vmatprep.subr.bf16.mxu1 %v4773_v9 }
 0x852   : > { %3666 = vmatpush1.bf16.msra.mxu0 %v4768_v10  ;;  %3707 = vmatpush1.bf16.msra.mxu1 %v4771_v11 }
 0x853   : > { %3667 = vmatprep.subr.bf16.mxu0 %v4776_v13  ;;  %3708 = vmatprep.subr.bf16.mxu1 %v4779_v15 }
 0x856   : > { %3668 = vmatpush1.bf16.msra.mxu0 %v4774_v16  ;;  %3709 = vmatpush1.bf16.msra.mxu1 %v4777_v21 }
 0x857   : > { %3669 = vmatprep.subr.bf16.mxu0 %v4782_v54  ;;  %3710 = vmatprep.subr.bf16.mxu1 %v4785_v55 }
 0x85a   : > { %3670 = vmatpush1.bf16.msra.mxu0 %v4780_v22  ;;  %3711 = vmatpush1.bf16.msra.mxu1 %v4783_v23  ;;  %v4804_v23 = vld [vmem:[#allocation12 + $0x200] ss:$8 sps:$4 sm:$0xff]  }
 0x85b   : > { %3671 = vmatprep.subr.bf16.mxu0 %v4788_v24  ;;  %3712 = vmatprep.subr.bf16.mxu1 %v4791_v25 }
 0x85e   : > { %3672 = vmatpush1.bf16.msra.mxu0 %v4786_v26  ;;  %3713 = vmatpush1.bf16.msra.mxu1 %v4789_v27  ;;  %v4807_v26 = vld [vmem:[#allocation12 + $0x300] ss:$8 sps:$4 sm:$0xff]   ;;  %v4812_v27 = vld [vmem:[#allocation12 + $0x214] ss:$8 sps:$4 sm:$0xff]  }
 0x85f   : > { %3673 = vmatprep.subr.bf16.mxu0 %v4794_v28  ;;  %3714 = vmatprep.subr.bf16.mxu1 %v4797_v1  ;;  %v4815_v1 = vld [vmem:[#allocation12 + $0x314] ss:$8 sps:$4 sm:$0xff]  }
 0x862   : > { %3674 = vmatpush1.bf16.msra.mxu0 %v4792_v29  ;;  %3715 = vmatpush1.bf16.msra.mxu1 %v4795_v30  ;;  %v4810_v29 = vld [vmem:[#allocation12 + $0x210] ss:$8 sps:$4 sm:$0xff]  }
 0x863   : > { %3675 = vmatprep.subr.bf16.mxu0 %v4800_v31  ;;  %3716 = vmatprep.subr.bf16.mxu1 %v4803_v2  ;;  %v4813_v30 = vld [vmem:[#allocation12 + $0x310] ss:$8 sps:$4 sm:$0xff]   ;;  %v4818_v31 = vld [vmem:[#allocation12 + $0x224] ss:$8 sps:$4 sm:$0xff]  }
 0x864   : > { %v4821_v2 = vld [vmem:[#allocation12 + $0x324] ss:$8 sps:$4 sm:$0xff]  }
 0x866   : > { %3676 = vmatpush1.bf16.msra.mxu0 %v4798_v34  ;;  %3717 = vmatpush1.bf16.msra.mxu1 %v4801_v35  ;;  %v4816_v34 = vld [vmem:[#allocation12 + $0x220] ss:$8 sps:$4 sm:$0xff]  }
 0x867   : > { %3727 = vmatprep.subr.bf16.mxu0 %v4806_v36  ;;  %3768 = vmatprep.subr.bf16.mxu1 %v4809_v37  ;;  %v4819_v35 = vld [vmem:[#allocation12 + $0x320] ss:$8 sps:$4 sm:$0xff]   ;;  %v4824_v36 = vld [vmem:[#allocation12 + $0x234] ss:$8 sps:$4 sm:$0xff]  }
 0x868   : > { %v4827_v37 = vld [vmem:[#allocation12 + $0x334] ss:$8 sps:$4 sm:$0xff]  }
 0x8bc   : > { %v2663_v42 = vpop.f32.mrb[16].mxu0  ;;  %v2704_v43 = vpop.f32.mrb[16].mxu1 }
 0x8bd   : > { %v2664_v44 = vadd.f32 %v2663_v42, %v1952_v39  ;;  %v2705_v45 = vadd.f32 %v2704_v43, %v1960_v40  ;;  %v2665_v46 = vpop.f32.mrb[17].mxu0  ;;  %v2706_v47 = vpop.f32.mrb[17].mxu1  ;;  %v4822_v39 = vld [vmem:[#allocation12 + $0x230] ss:$8 sps:$4 sm:$0xff]   ;;  %v4828_v42 = vld [vmem:[#allocation12 + $0x240] ss:$8 sps:$4 sm:$0xff]  }
 0x8be   : > { %v2666_v48 = vadd.f32 %v2665_v46, %v1956_v41  ;;  %v2707_v49 = vadd.f32 %v2706_v47, %v1964_v17  ;;  %v2667_v50 = vpop.f32.mrb[18].mxu0  ;;  %v2708_v51 = vpop.f32.mrb[18].mxu1  ;;  %v4825_v40 = vld [vmem:[#allocation12 + $0x330] ss:$8 sps:$4 sm:$0xff]   ;;  %v4830_v41 = vld [vmem:[#allocation12 + $0x244] ss:$8 sps:$4 sm:$0xff]  }
 0x8bf   : > { %v4232_v52 = vmul.f32 -1.702, %v2664_v44  ;;  %v4234_v53 = vmul.f32 -1.702, %v2705_v45  ;;  %v2668_v6 = vpop.f32.mrb[19].mxu0  ;;  %v2709_v56 = vpop.f32.mrb[19].mxu1 }
 0x8c0   : > { %v4233_v57 = vmul.f32 -1.702, %v2666_v48  ;;  %v4235_v58 = vmul.f32 -1.702, %v2707_v49  ;;  %v4833_v17 = vld [vmem:[#allocation12 + $0x344] ss:$8 sps:$4 sm:$0xff]   ;;  %v1968_v56 = vrot.slane %v5644_v38, %v695_v32 }
 0x8c1   : > { %v2809_v59 = vmul.f32 1.442695, %v4232_v52  ;;  %v2813_v60 = vmul.f32 1.442695, %v4234_v53  ;;  %v4831_v43 = vld [vmem:[#allocation12 + $0x340] ss:$8 sps:$4 sm:$0xff]  }
 0x8c2   : > { %v2811_v61 = vmul.f32 1.442695, %v4233_v57  ;;  %v2815_v8 = vmul.f32 1.442695, %v4235_v58  ;;  %v4834_v46 = vld [vmem:[#allocation12 + $0x250] ss:$8 sps:$4 sm:$0xff]  }
 0x8c3   : > { %4912 = vpow2.f32 %v2809_v59  ;;  %v4837_v47 = vld [vmem:[#allocation12 + $0x350] ss:$8 sps:$4 sm:$0xff]   ;;  %v1975_v50 = vsub.s32 6, %v5551_v18  ;;  %v1979_v51 = vsub.s32 7, %v5551_v18  ;;  %v4840_v52 = vld [vmem:[#allocation12 + $0x260] ss:$8 sps:$4 sm:$0xff]   ;;  %v1972_v59 = vrot.slane %v5644_v38, %v699_v33 }
 0x8c4   : > { %4914 = vpow2.f32 %v2813_v60  ;;  %v4843_v53 = vld [vmem:[#allocation12 + $0x360] ss:$8 sps:$4 sm:$0xff]   ;;  %v4848_v6 = vld [vmem:[#allocation12 + $0x274] ss:$8 sps:$4 sm:$0xff]   ;;  %v4857_v18 = vld [vmem:[#allocation12 + $0x384] ss:$8 sps:$4 sm:$0xff]  }
 0x8c5   : > { %4916 = vpow2.f32 %v2811_v61  ;;  %v1976_v57 = vrot.slane %v5644_v38, %v1975_v50  ;;  %v4851_v58 = vld [vmem:[#allocation12 + $0x374] ss:$8 sps:$4 sm:$0xff]   ;;  %v1980_v60 = vrot.slane %v5644_v38, %v1979_v51  ;;  %v4846_v61 = vld [vmem:[#allocation12 + $0x270] ss:$8 sps:$4 sm:$0xff]  }
 0x8c6   : > { %4918 = vpow2.f32 %v2815_v8  ;;  %v4887_v51 = vld [vmem:[#allocation12 + $0x3d4] ss:$8 sps:$4 sm:$0xff]  }
 0x8cd   : > { %v4913_v62 = vpop.eup %4912 }
 0x8ce   : > { %v4915_v63 = vpop.eup %4914  ;;  %v2825_v0 = vadd.f32 1.0, %v4913_v62 }
 0x8cf   : > { %v4917_v3 = vpop.eup %4916  ;;  %v2827_v4 = vadd.f32 1.0, %v4915_v63  ;;  %v4849_v63 = vld [vmem:[#allocation12 + $0x370] ss:$8 sps:$4 sm:$0xff]  }
 0x8d0   : > { %v4919_v5 = vpop.eup %4918  ;;  %4920 = vrcp.f32 %v2825_v0  ;;  %v2826_v7 = vadd.f32 1.0, %v4917_v3  ;;  %v4854_v0 = vld [vmem:[#allocation12 + $0x284] ss:$8 sps:$4 sm:$0xff]  }
 0x8d1   : > { %4922 = vrcp.f32 %v2827_v4  ;;  %v2828_v9 = vadd.f32 1.0, %v4919_v5 }
 0x8d2   : > { %4924 = vrcp.f32 %v2826_v7 }
 0x8d3   : > { %4926 = vrcp.f32 %v2828_v9 }
 0x8da   : > { %v4921_v10 = vpop.eup %4920 }
 0x8db   : > { %v4923_v11 = vpop.eup %4922  ;;  %v2849_v15 = vmul.f32 %v4921_v10, %v2664_v44  ;;  %v4836_v44 = vld [vmem:[#allocation12 + $0x254] ss:$8 sps:$4 sm:$0xff]   ;;  %v4852_v10 = vld [vmem:[#allocation12 + $0x280] ss:$8 sps:$4 sm:$0xff]  }
 0x8dc   : > { %v4925_v13 = vpop.eup %4924  ;;  %v2851_v21 = vmul.f32 %v4923_v11, %v2705_v45  ;;  %v4839_v45 = vld [vmem:[#allocation12 + $0x354] ss:$8 sps:$4 sm:$0xff]   ;;  %v4855_v11 = vld [vmem:[#allocation12 + $0x380] ss:$8 sps:$4 sm:$0xff]  }
 0x8dd   : > { %v4927_v16 = vpop.eup %4926  ;;  %v2850_v54 = vmul.f32 %v4925_v13, %v2666_v48  ;;  %v2857_v24 = vpack.c.bf16 %v2849_v15, %v2849_v15  ;;  %v4842_v48 = vld [vmem:[#allocation12 + $0x264] ss:$8 sps:$4 sm:$0xff]  }
 0x8de   : > { %v2852_v55 = vmul.f32 %v4927_v16, %v2707_v49  ;;  %v2859_v28 = vpack.c.bf16 %v2851_v21, %v2851_v21  ;;  %v4845_v49 = vld [vmem:[#allocation12 + $0x364] ss:$8 sps:$4 sm:$0xff]  }
 0x8df   : > { %v2858_v22 = vpack.c.bf16 %v2850_v54, %v2850_v54 }
 0x8e0   : > { %v2860_v25 = vpack.c.bf16 %v2852_v55, %v2852_v55 }
 0x8e1   : > { %3677 = vmatprep.mubr.bf16.mxu0 %v2858_v22  ;;  %v4860_v22 = vld [vmem:[#allocation12 + $0x294] ss:$8 sps:$4 sm:$0xff]  }
 0x8e2   : > { %3718 = vmatprep.mubr.bf16.mxu1 %v2860_v25  ;;  %3678 = vmatmul.mubr.bf16.vlgmr.msra.gmra.mrb[24].mxu0 %v2857_v24  ;;  %v4863_v25 = vld [vmem:[#allocation12 + $0x394] ss:$8 sps:$4 sm:$0xff]  }
 0x8e3   : > { %3719 = vmatmul.mubr.bf16.vlgmr.msra.gmra.mrb[24].mxu1 %v2859_v28  ;;  %3728 = vmatpush1.bf16.msra.mxu0 %v4804_v23  ;;  %v4858_v28 = vld [vmem:[#allocation12 + $0x290] ss:$8 sps:$4 sm:$0xff]  }
 0x8e4   : > { %3769 = vmatpush1.bf16.msra.mxu1 %v4807_v26  ;;  %3729 = vmatprep.subr.bf16.mxu0 %v4812_v27 }
 0x8e5   : > { %3770 = vmatprep.subr.bf16.mxu1 %v4815_v1  ;;  %v4861_v1 = vld [vmem:[#allocation12 + $0x390] ss:$8 sps:$4 sm:$0xff]  }
 0x8e7   : > { %3730 = vmatpush1.bf16.msra.mxu0 %v4810_v29  ;;  %v4866_v29 = vld [vmem:[#allocation12 + $0x2a4] ss:$8 sps:$4 sm:$0xff]  }
 0x8e8   : > { %3771 = vmatpush1.bf16.msra.mxu1 %v4813_v30  ;;  %3731 = vmatprep.subr.bf16.mxu0 %v4818_v31  ;;  %v4869_v30 = vld [vmem:[#allocation12 + $0x3a4] ss:$8 sps:$4 sm:$0xff]   ;;  %v4864_v31 = vld [vmem:[#allocation12 + $0x2a0] ss:$8 sps:$4 sm:$0xff]  }
 0x8e9   : > { %3772 = vmatprep.subr.bf16.mxu1 %v4821_v2  ;;  %v4867_v2 = vld [vmem:[#allocation12 + $0x3a0] ss:$8 sps:$4 sm:$0xff]  }
 0x8eb   : > { %3732 = vmatpush1.bf16.msra.mxu0 %v4816_v34  ;;  %v4872_v34 = vld [vmem:[#allocation12 + $0x2b4] ss:$8 sps:$4 sm:$0xff]  }
 0x8ec   : > { %3773 = vmatpush1.bf16.msra.mxu1 %v4819_v35  ;;  %3733 = vmatprep.subr.bf16.mxu0 %v4824_v36  ;;  %v4875_v35 = vld [vmem:[#allocation12 + $0x3b4] ss:$8 sps:$4 sm:$0xff]   ;;  %v4870_v36 = vld [vmem:[#allocation12 + $0x2b0] ss:$8 sps:$4 sm:$0xff]  }
 0x8ed   : > { %3774 = vmatprep.subr.bf16.mxu1 %v4827_v37  ;;  %v4873_v37 = vld [vmem:[#allocation12 + $0x3b0] ss:$8 sps:$4 sm:$0xff]  }
 0x8ef   : > { %3734 = vmatpush1.bf16.msra.mxu0 %v4822_v39  ;;  %v4878_v39 = vld [vmem:[#allocation12 + $0x2c4] ss:$8 sps:$4 sm:$0xff]  }
 0x8f0   : > { %3775 = vmatpush1.bf16.msra.mxu1 %v4825_v40  ;;  %3735 = vmatprep.subr.bf16.mxu0 %v4830_v41  ;;  %v4881_v41 = vld [vmem:[#allocation12 + $0x3c4] ss:$8 sps:$4 sm:$0xff]  }
 0x8f1   : > { %3776 = vmatprep.subr.bf16.mxu1 %v4833_v17 }
 0x8f3   : > { %3736 = vmatpush1.bf16.msra.mxu0 %v4828_v42 }
 0x8f4   : > { %3777 = vmatpush1.bf16.msra.mxu1 %v4831_v43  ;;  %3737 = vmatprep.subr.bf16.mxu0 %v4836_v44 }
 0x8f5   : > { %3778 = vmatprep.subr.bf16.mxu1 %v4839_v45  ;;  %v4876_v45 = vld [vmem:[#allocation12 + $0x2c0] ss:$8 sps:$4 sm:$0xff]  }
 0x8f7   : > { %3738 = vmatpush1.bf16.msra.mxu0 %v4834_v46 }
 0x8f8   : > { %3779 = vmatpush1.bf16.msra.mxu1 %v4837_v47  ;;  %3739 = vmatprep.subr.bf16.mxu0 %v4842_v48  ;;  %v4879_v48 = vld [vmem:[#allocation12 + $0x3c0] ss:$8 sps:$4 sm:$0xff]  }
 0x8f9   : > { %3780 = vmatprep.subr.bf16.mxu1 %v4845_v49  ;;  %v4884_v49 = vld [vmem:[#allocation12 + $0x2d4] ss:$8 sps:$4 sm:$0xff]  }
 0x8fb   : > { %3740 = vmatpush1.bf16.msra.mxu0 %v4840_v52  ;;  %v4882_v52 = vld [vmem:[#allocation12 + $0x2d0] ss:$8 sps:$4 sm:$0xff]  }
 0x8fc   : > { %3781 = vmatpush1.bf16.msra.mxu1 %v4843_v53  ;;  %v2745_v8 = vpop.f32.mrb[20].mxu0  ;;  %v2786_v62 = vpop.f32.mrb[20].mxu1  ;;  %3741 = vmatprep.subr.bf16.mxu0 %v4848_v6  ;;  %v4885_v53 = vld [vmem:[#allocation12 + $0x3d0] ss:$8 sps:$4 sm:$0xff]   ;;  %v4890_v6 = vld [vmem:[#allocation12 + $0x2e4] ss:$8 sps:$4 sm:$0xff]  }
 0x8fd   : > { %v5666_v3 = vadd.f32 %v2745_v8, %v1968_v56  ;;  %v5668_v32 = vadd.f32 %v2786_v62, %v1976_v57  ;;  %v2747_v4 = vpop.f32.mrb[21].mxu0  ;;  %v2788_v5 = vpop.f32.mrb[21].mxu1  ;;  %3782 = vmatprep.subr.bf16.mxu1 %v4851_v58  ;;  %v4893_v56 = vld [vmem:[#allocation12 + $0x3e4] ss:$8 sps:$4 sm:$0xff]   ;;  %v4888_v57 = vld [vmem:[#allocation12 + $0x2e0] ss:$8 sps:$4 sm:$0xff]  }
 0x8fe   : > { %v5670_v7 = vadd.f32 %v2747_v4, %v1972_v59  ;;  %v5672_v33 = vadd.f32 %v2788_v5, %v1980_v60  ;;  %v2749_v38 = vpop.f32.mrb[22].mxu0  ;;  %v2790_v9 = vpop.f32.mrb[22].mxu1  ;;  %v4891_v58 = vld [vmem:[#allocation12 + $0x3e0] ss:$8 sps:$4 sm:$0xff]   ;;  %v4896_v59 = vld [vmem:[#allocation12 + $0x2f4] ss:$8 sps:$4 sm:$0xff]  }
 0x8ff   : > { %v4236_v13 = vmul.f32 -1.702, %v5666_v3  ;;  %v4238_v15 = vmul.f32 -1.702, %v5668_v32  ;;  %3742 = vmatpush1.bf16.msra.mxu0 %v4846_v61  ;;  %v2750_v16 = vpop.f32.mrb[23].mxu0  ;;  %v2791_v21 = vpop.f32.mrb[23].mxu1 }
 0x900   : > { %v4237_v54 = vmul.f32 -1.702, %v5670_v7  ;;  %v4239_v55 = vmul.f32 -1.702, %v5672_v33  ;;  %3783 = vmatpush1.bf16.msra.mxu1 %v4849_v63  ;;  %3743 = vmatprep.subr.bf16.mxu0 %v4854_v0  ;;  %v4899_v60 = vld [vmem:[#allocation12 + $0x3f4] ss:$8 sps:$4 sm:$0xff]  }
 0x901   : > { %v2817_v23 = vmul.f32 1.442695, %v4236_v13  ;;  %v2821_v24 = vmul.f32 1.442695, %v4238_v15  ;;  %3784 = vmatprep.subr.bf16.mxu1 %v4857_v18  ;;  %v4894_v62 = vld [vmem:[#allocation12 + $0x2f0] ss:$8 sps:$4 sm:$0xff]  }
 0x902   : > { %v2819_v26 = vmul.f32 1.442695, %v4237_v54  ;;  %v2823_v27 = vmul.f32 1.442695, %v4239_v55  ;;  %v4897_v4 = vld [vmem:[#allocation12 + $0x3f0] ss:$8 sps:$4 sm:$0xff]  }
 0x903   : > { %4928 = vpow2.f32 %v2817_v23  ;;  %3744 = vmatpush1.bf16.msra.mxu0 %v4852_v10 }
 0x904   : > { %4930 = vpow2.f32 %v2821_v24  ;;  %3785 = vmatpush1.bf16.msra.mxu1 %v4855_v11  ;;  %3745 = vmatprep.subr.bf16.mxu0 %v4860_v22 }
 0x905   : > { %4932 = vpow2.f32 %v2819_v26  ;;  %3786 = vmatprep.subr.bf16.mxu1 %v4863_v25 }
 0x906   : > { %4934 = vpow2.f32 %v2823_v27 }
 0x907   : > { %3746 = vmatpush1.bf16.msra.mxu0 %v4858_v28 }
 0x908   : > { %3787 = vmatpush1.bf16.msra.mxu1 %v4861_v1  ;;  %3747 = vmatprep.subr.bf16.mxu0 %v4866_v29 }
 0x909   : > { %3788 = vmatprep.subr.bf16.mxu1 %v4869_v30 }
 0x90b   : > { %3748 = vmatpush1.bf16.msra.mxu0 %v4864_v31 }
 0x90c   : > { %3789 = vmatpush1.bf16.msra.mxu1 %v4867_v2  ;;  %3749 = vmatprep.subr.bf16.mxu0 %v4872_v34 }
 0x90d   : > { %v4929_v40 = vpop.eup %4928  ;;  %3790 = vmatprep.subr.bf16.mxu1 %v4875_v35 }
 0x90e   : > { %v4931_v17 = vpop.eup %4930  ;;  %v2829_v42 = vadd.f32 1.0, %v4929_v40 }
 0x90f   : > { %v4933_v43 = vpop.eup %4932  ;;  %v2831_v44 = vadd.f32 1.0, %v4931_v17  ;;  %3750 = vmatpush1.bf16.msra.mxu0 %v4870_v36 }
 0x910   : > { %v4935_v46 = vpop.eup %4934  ;;  %4936 = vrcp.f32 %v2829_v42  ;;  %v2830_v47 = vadd.f32 1.0, %v4933_v43  ;;  %3791 = vmatpush1.bf16.msra.mxu1 %v4873_v37  ;;  %3751 = vmatprep.subr.bf16.mxu0 %v4878_v39 }
 0x911   : > { %4938 = vrcp.f32 %v2831_v44  ;;  %v2832_v50 = vadd.f32 1.0, %v4935_v46  ;;  %3792 = vmatprep.subr.bf16.mxu1 %v4881_v41 }
 0x912   : > { %4940 = vrcp.f32 %v2830_v47 }
 0x913   : > { %4942 = vrcp.f32 %v2832_v50  ;;  %3752 = vmatpush1.bf16.msra.mxu0 %v4876_v45 }
 0x914   : > { %3793 = vmatpush1.bf16.msra.mxu1 %v4879_v48  ;;  %3753 = vmatprep.subr.bf16.mxu0 %v4884_v49 }
 0x915   : > { %3794 = vmatprep.subr.bf16.mxu1 %v4887_v51 }
 0x917   : > { %3754 = vmatpush1.bf16.msra.mxu0 %v4882_v52 }
 0x918   : > { %3795 = vmatpush1.bf16.msra.mxu1 %v4885_v53  ;;  %3755 = vmatprep.subr.bf16.mxu0 %v4890_v6 }
 0x919   : > { %3796 = vmatprep.subr.bf16.mxu1 %v4893_v56 }
 0x91a   : > { %v4937_v61 = vpop.eup %4936 }
 0x91b   : > { %v4939_v8 = vpop.eup %4938  ;;  %3756 = vmatpush1.bf16.msra.mxu0 %v4888_v57  ;;  %v2853_v0 = vmul.f32 %v4937_v61, %v5666_v3  ;;  %v2993_v3 = vld [vmem:[%s5784_s20] sm:$0x3] }
 0x91c   : > { %v4941_v63 = vpop.eup %4940  ;;  %3797 = vmatpush1.bf16.msra.mxu1 %v4891_v58  ;;  %3757 = vmatprep.subr.bf16.mxu0 %v4896_v59  ;;  %v2855_v18 = vmul.f32 %v4939_v8, %v5668_v32  ;;  %v2998_v32 = vrot.slane %v2993_v3, %v5557_v20 }
 0x91d   : > { %v4943_v5 = vpop.eup %4942  ;;  %v2854_v38 = vmul.f32 %v4941_v63, %v5670_v7  ;;  %3798 = vmatprep.subr.bf16.mxu1 %v4899_v60  ;;  %v2861_v11 = vpack.c.bf16 %v2853_v0, %v2853_v0  ;;  %v3002_v7 = vrot.slane %v2993_v3, %v5554_v19 }
 0x91e   : > { %v2856_v9 = vmul.f32 %v4943_v5, %v5672_v33  ;;  %v2863_v15 = vpack.c.bf16 %v2855_v18, %v2855_v18 }
 0x91f   : > { %v2862_v10 = vpack.c.bf16 %v2854_v38, %v2854_v38  ;;  %3758 = vmatpush1.bf16.msra.mxu0 %v4894_v62 }
 0x920   : > { %v2864_v13 = vpack.c.bf16 %v2856_v9, %v2856_v9  ;;  %3799 = vmatpush1.bf16.msra.mxu1 %v4897_v4 }
 0x921   : > { %3759 = vmatprep.mubr.bf16.mxu0 %v2862_v10 }
 0x922   : > { %3800 = vmatprep.mubr.bf16.mxu1 %v2864_v13  ;;  %3760 = vmatmul.mubr.bf16.vlgmr.msra.gmra.mrb[28].mxu0 %v2861_v11 }
 0x923   : > { %3801 = vmatmul.mubr.bf16.vlgmr.msra.gmra.mrb[28].mxu1 %v2863_v15 }
 0x9b5   : > { %v3679_v16 = vpop.f32.mrb[24].mxu0 }
 0x9b6   : > { %v3680_v33 = vadd.f32 %v3679_v16, %v2998_v32  ;;  %v3720_v21 = vpop.f32.mrb[24].mxu1  ;;  %v3681_v54 = vpop.f32.mrb[25].mxu0 }
 0x9b7   : > { %v3682_v55 = vadd.f32 %v3681_v54, %v3002_v7  ;;  %v3722_v22 = vpop.f32.mrb[25].mxu1  ;;  %v3683_v23 = vpop.f32.mrb[26].mxu0 }
 0x9b8   : > { %v3721_v24 = vadd.f32 %v3720_v21, %v3680_v33  ;;  %v3724_v25 = vpop.f32.mrb[26].mxu1  ;;  %v3684_v26 = vpop.f32.mrb[27].mxu0 }
 0x9b9   : > { %v3723_v27 = vadd.f32 %v3722_v22, %v3682_v55  ;;  %v3725_v28 = vpop.f32.mrb[27].mxu1 }
 0x9f5   : > { %v3761_v1 = vpop.f32.mrb[28].mxu0 }
 0x9f6   : > { %v3762_v29 = vadd.f32 %v3761_v1, %v3721_v24  ;;  %v3802_v30 = vpop.f32.mrb[28].mxu1  ;;  %v3763_v20 = vpop.f32.mrb[29].mxu0 }
 0x9f7   : > { %v3764_v31 = vadd.f32 %v3763_v20, %v3723_v27  ;;  %v3804_v19 = vpop.f32.mrb[29].mxu1  ;;  %v3765_v2 = vpop.f32.mrb[30].mxu0 }
 0x9f8   : > { %v3803_v34 = vadd.f32 %v3802_v30, %v3762_v29  ;;  %v3806_v35 = vpop.f32.mrb[30].mxu1  ;;  %v3766_v36 = vpop.f32.mrb[31].mxu0 }
 0x9f9   : > { %v3805_v37 = vadd.f32 %v3804_v19, %v3764_v31  ;;  %v3807_v39 = vpop.f32.mrb[31].mxu1 }
 0x9fa   : > { %v3809_v40 = vadd.f32 %v3803_v34, %v5606_v12 }
 0x9fb   : > { %v3810_v41 = vadd.f32 %v3805_v37, %v5609_v14 }
 0x9fd   : > { %v4375_v17 = vpack.c.bf16 %v3810_v41, %v3809_v40 }
 0x9ff   : > { %3819 = vst [vmem:[%s527_s30] sm:$0xff] %v4375_v17 }
 0xa00   : > { %5127 = shalt.err (!%p5124_p3)
}
 0xa01   : > { %s5128_s12 = scalar_lea.hbm %s5695_s8, 128  ;;  %s5132_s30 = scalar_lea.hbm %s5785_s23, 256 }
 0xa02   : > { %p5129_p6 = scmp.ne.s32.totalorder %s5695_s8, %s5128_s12  ;;  %p5133_p8 = scmp.lt.u32.totalorder %s5695_s8, %s5785_s23 }
 0xa03   : > { %p5134_p5 = scmp.lt.u32.totalorder %s5132_s30, %s5128_s12  ;;  %p5136_p7 = scmp.lt.u32.totalorder %s5128_s12, %s5695_s8 }
 0xa04   : > { %p5130_p10 = pnand %p5129_p6, %p5786_p4 }
 0xa05   : > { %p5135_p9 = por %p5134_p5, %p5133_p8 }
 0xa06   : > { %p5131_p11 = pneg %p5130_p10 }
 0xa07   : > { %p5137_p12 = por %p5136_p7, %p5135_p9 }
 0xa09   : > { %p5138_p1 = pnand %p5137_p12, %p5131_p11 }
 0xa0b   : > { %5141 = shalt.err (!%p5138_p1)
}
 0xa0c   : > { %4431 = dma.vmem_to_hbm [thread:$0]  (%p5786_p4), %s5697_s19, 128, %s5695_s8, %s3821_s21  }
 0xa0d PF: > { %s3847_s18 = sand.u32 1, %s5180_s25   ;;  %p5787_p13 = scmp.ne.s32.totalorder %s5772_s29, 0 }
 0xa0e   : > { %p5788_p0 = scmp.ge.s32.totalorder %s5192_s28, 2  ;;  %s3848_s14 = scalar_lea.sflag [#allocation5], %s3847_s18 }
 0xa10   : > { %p4454_p2 = pnand %p5788_p0, %p5787_p13 }
 0xa12   : > { %5175 = dma.done.wait (!%p4454_p2), %s3848_s14, 128  }
 0xa13   : > { %5177 = vsyncadd (!%p4454_p2), %s3848_s14, 4294967168  ;;  %p29_p3 = scmp.ge.s32.totalorder %s5443_s16, 4   ;;  %s5789_s25 = smov %s5184_s26 }
 0xa14   : > { %s5790_s26 = smov %s5188_s27  ;;  %s5791_s27 = smov %s5455_s22 }
 0xa15   : > { %s5792_s28 = smov %s5443_s16  ;;  %31 = sbr.rel (!%p29_p3) target bundleno = 14 (0xe), region = 137 }
 0xa1c   :  { %3853 = vsyncpa [#allocation4], 1 }
 0xa1d   :  { %3855 = vsyncpa [#allocation4 + $0x1], 1 }
 0xa1e   :  { %3856 = vsyncpa [#allocation7], 1 }
 0xa1f   :  { %3857 = vsyncpa [#allocation10], 1 }
 0xa20   :  { %3858 = vsyncpa [#allocation13], 1 }
 0xa21   :  { %3859 = vsyncpa [#allocation5], 1 }
 0xa22   :  { %3861 = vsyncpa [#allocation5 + $0x1], 1 }

// kernel: tpu_custom_call.1
= control target key start
LH: loop header
LB: loop body
LE: loop exit
PB: predicated region body
PF: predicated region fallthrough
CT: control target
= control target key end

     0   :  { %s5739_s0 = inlined_call_operand.hbm [shape: bf16[2,8,256], index: 0, kind: input, shape index: {}]   ;;  %s5740_s1 = inlined_call_operand.hbm [shape: bf16[256,768], index: 1, kind: input, shape index: {}]   ;;  %s5741_s2 = inlined_call_operand.vmem [shape: f32[1,768], index: 2, kind: input, shape index: {}]   ;;  %s5742_s3 = inlined_call_operand.hbm [shape: bf16[256,256], index: 3, kind: input, shape index: {}]   ;;  %s5743_s4 = inlined_call_operand.hbm [shape: f32[1,256], index: 4, kind: input, shape index: {}]   ;;  %s5744_s5 = inlined_call_operand.vmem [shape: f32[1,256], index: 5, kind: input, shape index: {}]   ;;  %s5745_s6 = inlined_call_operand.vmem [shape: f32[1,256], index: 6, kind: input, shape index: {}]   ;;  %s5746_s7 = inlined_call_operand.hbm [shape: bf16[256,1024], index: 7, kind: input, shape index: {}]   ;;  %s5747_s8 = inlined_call_operand.vmem [shape: f32[1,1024], index: 8, kind: input, shape index: {}]   ;;  %s5748_s9 = inlined_call_operand.hbm [shape: bf16[1024,256], index: 9, kind: input, shape index: {}]   ;;  %s5749_s10 = inlined_call_operand.vmem [shape: f32[1,256], index: 10, kind: input, shape index: {}]   ;;  %s5750_s11 = inlined_call_operand.vmem [shape: f32[1,256], index: 11, kind: input, shape index: {}]   ;;  %s5751_s12 = inlined_call_operand.vmem [shape: f32[1,256], index: 12, kind: input, shape index: {}]   ;;  %s5752_s13 = inlined_call_operand.hbm [shape: bf16[2,8,256], index: 13, kind: output, shape index: {}]  }
   0x1   :  { %5759 = sst [smem:[#allocation20_spill]] %s5747_s8 }
   0x2   :  { %5760 = sst [smem:[#allocation21_spill]] %s5749_s10 }
   0x3   :  { %5761 = sst [smem:[#allocation22_spill]] %s5750_s11 }
   0x4   :  { %5762 = sst [smem:[#allocation23_spill]] %s5751_s12 }
   0x5   :  { %5763 = sst [smem:[#allocation24_spill]] %s5752_s13 }
   0x6   :  { %18 = vsyncpa [#allocation4], 0 }
   0x7   :  { %20 = vsyncpa [#allocation4 + $0x1], 0 }
   0x8   :  { %21 = vsyncpa [#allocation7], 0 }
   0x9   :  { %22 = vsyncpa [#allocation10], 0 }
   0xa   :  { %23 = vsyncpa [#allocation13], 0 }
   0xb   :  { %24 = vsyncpa [#allocation5], 0 }
   0xc   :  { %26 = vsyncpa [#allocation5 + $0x1], 0  ;;  %s5279_s25 = smov 0   ;;  %s5281_s26 = smov 0  }
   0xd   :  { %s5283_s27 = smov 0   ;;  %s5285_s28 = smov 0  }
   0xe LB: > { %s5194_s29 = smov [#allocation6]   ;;  %s5300_s14 = sadd.s32 4294967295, %s5192_s28   ;;  %s5192_s28 = sphi %s5285_s28, %s5792_s28   ;;  %s5188_s27 = sphi %s5283_s27, %s5791_s27   ;;  %s5184_s26 = sphi %s5281_s26, %s5790_s26   ;;  %s5180_s25 = sphi %s5279_s25, %s5789_s25  }
   0xf   : > { %s353_s30 = sshll.u32 %s5194_s29, 4  ;;  %p3954_p0 = scmp.ge.s32.totalorder %s5192_s28, 1  ;;  %s5305_s30 = int_to_ptr.vmem [resolvable:$true] %s353_s30 }
  0x10   : > { %p5754_p1 = scmp.eq.s32.totalorder %s5300_s14, 0  ;;  %p341_p2 = scmp.lt.s32.totalorder %s5192_s28, 3 }
  0x11   : > { %s5195_s16 = smov [#allocation9]   ;;  %s5196_s19 = smov [#allocation8]  }
  0x12   : > { %p5307_p3 = pnand %p3954_p0, %p341_p2  ;;  %s383_s17 = sshll.u32 %s5195_s16, 4  ;;  %s5320_s17 = int_to_ptr.vmem [resolvable:$true] %s383_s17 }
  0x13   : > { %s369_s20 = sshll.u32 %s5196_s19, 4  ;;  %s4944_s23 = scalar_lea.hbm %s5740_s1, 12288  ;;  %s5322_s20 = int_to_ptr.vmem [resolvable:$true] %s369_s20 }
  0x14   : > { %s5764_s15 = scalar_select %p5307_p3, 1, 0 }
  0x15   : > { %p4433_p5 = pneg %p5307_p3  ;;  %p4945_p7 = scmp.ne.s32.totalorder %s5740_s1, %s4944_s23 }
  0x16   : > { %p4951_p11 = scmp.lt.u32.totalorder %s4944_s23, %s5740_s1 }
  0x17   : > { %p5316_p6 = pnand %p4433_p5, %p5754_p1 }
  0x19   : > { %p5332_p8 = pneg %p5316_p6 }
  0x1b   : > { %p4947_p9 = pnand %p5332_p8, %p4945_p7 }
  0x1d   : > { %p4948_p10 = pneg %p4947_p9 }
  0x1f   : > { %p4953_p12 = pnand %p4951_p11, %p4948_p10 }
  0x21   : > { %4956 = shalt.err (!%p4953_p12)
}
  0x22   : > { %s4957_s21 = scalar_lea.vmem %s5305_s30, 12288  ;;  %p4965_p5 = scmp.lt.s32.totalorder %s5305_s30, %s5305_s30 }
  0x23   : > { %p4958_p13 = scmp.ne.s32.totalorder %s5305_s30, %s4957_s21  ;;  %p4966_p4 = scmp.lt.s32.totalorder %s4957_s21, %s4957_s21 }
  0x25   : > { %p4960_p0 = pnand %p4958_p13, %p5332_p8  ;;  %p4967_p7 = por %p4966_p4, %p4965_p5 }
  0x27   : > { %p4961_p2 = pneg %p4960_p0 }
  0x29   : > { %p4968_p9 = pnand %p4967_p7, %p4961_p2 }
  0x2b   : > { %4971 = shalt.err (!%p4968_p9)
}
  0x2c   : > { %s5197_s22 = smov 384   ;;  %s5198_s13 = smov 24  }
  0x2d   : > { %4436 = dma.hbm_to_vmem [thread:$0]  (!%p5316_p6), %s5740_s1, 12288, %s5305_s30, [#allocation7], %s5197_s22, %s5197_s22, %s5198_s13  }
  0x2e   : > { %s4972_s10 = scalar_lea.hbm %s5743_s4, 32 }
  0x2f   : > { %p4973_p4 = scmp.ne.s32.totalorder %s5743_s4, %s4972_s10  ;;  %p4979_p12 = scmp.lt.u32.totalorder %s4972_s10, %s5743_s4 }
  0x31   : > { %p4975_p10 = pnand %p4973_p4, %p5332_p8 }
  0x33   : > { %p4976_p11 = pneg %p4975_p10 }
  0x35   : > { %p4981_p13 = pnand %p4979_p12, %p4976_p11 }
  0x37   : > { %4984 = shalt.err (!%p4981_p13)
}
  0x38   : > { %s4985_s30 = scalar_lea.vmem %s5320_s17, 32  ;;  %p4993_p7 = scmp.lt.s32.totalorder %s5320_s17, %s5320_s17 }
  0x39   : > { %p4986_p0 = scmp.ne.s32.totalorder %s5320_s17, %s4985_s30  ;;  %p4994_p9 = scmp.lt.s32.totalorder %s4985_s30, %s4985_s30 }
  0x3b   : > { %p4988_p2 = pnand %p4986_p0, %p5332_p8  ;;  %p4995_p4 = por %p4994_p9, %p4993_p7 }
  0x3d   : > { %p4989_p5 = pneg %p4988_p2 }
  0x3f   : > { %p4996_p10 = pnand %p4995_p4, %p4989_p5 }
  0x41   : > { %4999 = shalt.err (!%p4996_p10)
}
  0x42   : > { %4442 = dma.hbm_to_vmem [thread:$0]  (!%p5316_p6), %s5743_s4, 32, %s5320_s17, [#allocation10]  }
  0x43   : > { %s5000_s22 = scalar_lea.hbm %s5742_s3, 4096 }
  0x44   : > { %p5001_p11 = scmp.ne.s32.totalorder %s5742_s3, %s5000_s22  ;;  %p5007_p0 = scmp.lt.u32.totalorder %s5000_s22, %s5742_s3 }
  0x46   : > { %p5003_p12 = pnand %p5001_p11, %p5332_p8 }
  0x48   : > { %p5004_p13 = pneg %p5003_p12 }
  0x4a   : > { %p5009_p2 = pnand %p5007_p0, %p5004_p13 }
  0x4c   : > { %5012 = shalt.err (!%p5009_p2)
}
  0x4d   : > { %s5013_s17 = scalar_lea.vmem %s5322_s20, 4096  ;;  %p5021_p4 = scmp.lt.s32.totalorder %s5322_s20, %s5322_s20 }
  0x4e   : > { %p5014_p5 = scmp.ne.s32.totalorder %s5322_s20, %s5013_s17  ;;  %p5022_p10 = scmp.lt.s32.totalorder %s5013_s17, %s5013_s17 }
  0x50   : > { %p5016_p7 = pnand %p5014_p5, %p5332_p8  ;;  %p5023_p11 = por %p5022_p10, %p5021_p4 }
  0x52   : > { %p5017_p9 = pneg %p5016_p7 }
  0x54   : > { %p5024_p12 = pnand %p5023_p11, %p5017_p9 }
  0x56   : > { %5027 = shalt.err (!%p5024_p12)
}
  0x57   : > { %s5756_s19 = smov 128   ;;  %s5757_s21 = smov 8  }
  0x58   : > { %4439 = dma.hbm_to_vmem [thread:$0]  (!%p5316_p6), %s5742_s3, 4096, %s5322_s20, [#allocation7], %s5756_s19, %s5756_s19, %s5757_s21  }
  0x59   : > { %s5201_s10 = smov [#allocation11]   ;;  %s5028_s13 = scalar_lea.hbm %s5746_s7, 16384 }
  0x5a   : > { %s399_s11 = sshll.u32 %s5201_s10, 4  ;;  %p5029_p13 = scmp.ne.s32.totalorder %s5746_s7, %s5028_s13  ;;  %s400_s11 = int_to_ptr.vmem [resolvable:$true] %s399_s11 }
  0x5b   : > { %p5035_p5 = scmp.lt.u32.totalorder %s5028_s13, %s5746_s7 }
  0x5c   : > { %p5031_p0 = pnand %p5029_p13, %p5332_p8 }
  0x5e   : > { %p5032_p2 = pneg %p5031_p0 }
  0x60   : > { %p5037_p7 = pnand %p5035_p5, %p5032_p2 }
  0x62   : > { %5040 = shalt.err (!%p5037_p7)
}
  0x63   : > { %s5041_s20 = scalar_lea.vmem %s400_s11, 16384  ;;  %p5049_p11 = scmp.lt.s32.totalorder %s400_s11, %s400_s11 }
  0x64   : > { %p5042_p9 = scmp.ne.s32.totalorder %s400_s11, %s5041_s20  ;;  %p5050_p12 = scmp.lt.s32.totalorder %s5041_s20, %s5041_s20 }
  0x66   : > { %p5044_p4 = pnand %p5042_p9, %p5332_p8  ;;  %p5051_p1 = por %p5050_p12, %p5049_p11 }
  0x68   : > { %p5045_p10 = pneg %p5044_p4 }
  0x6a   : > { %p5052_p3 = pnand %p5051_p1, %p5045_p10 }
  0x6c   : > { %5055 = shalt.err (!%p5052_p3)
}
  0x6d   : > { %s5202_s30 = smov 512   ;;  %s5203_s8 = smov 32  }
  0x6e   : > { %4445 = dma.hbm_to_vmem [thread:$0]  (!%p5316_p6), %s5746_s7, 16384, %s400_s11, [#allocation10], %s5202_s30, %s5202_s30, %s5203_s8  }
  0x6f   : > { %s5204_s22 = smov [#allocation12]   ;;  %s5056_s29 = scalar_lea.hbm %s5748_s9, 16384 }
  0x70   : > { %s415_s13 = sshll.u32 %s5204_s22, 4  ;;  %p5057_p1 = scmp.ne.s32.totalorder %s5748_s9, %s5056_s29  ;;  %s416_s13 = int_to_ptr.vmem [resolvable:$true] %s415_s13 }
  0x71   : > { %p5063_p0 = scmp.lt.u32.totalorder %s5056_s29, %s5748_s9 }
  0x72   : > { %p5059_p3 = pnand %p5057_p1, %p5332_p8 }
  0x74   : > { %p5060_p13 = pneg %p5059_p3 }
  0x76   : > { %p5065_p2 = pnand %p5063_p0, %p5060_p13 }
  0x78   : > { %5068 = shalt.err (!%p5065_p2)
}
  0x79   : > { %s5069_s11 = scalar_lea.vmem %s416_s13, 16384  ;;  %p5077_p4 = scmp.lt.s32.totalorder %s416_s13, %s416_s13 }
  0x7a   : > { %p5070_p5 = scmp.ne.s32.totalorder %s416_s13, %s5069_s11  ;;  %p5078_p10 = scmp.lt.s32.totalorder %s5069_s11, %s5069_s11 }
  0x7c   : > { %p5072_p7 = pnand %p5070_p5, %p5332_p8  ;;  %p5079_p11 = por %p5078_p10, %p5077_p4 }
  0x7e   : > { %p5073_p9 = pneg %p5072_p7 }
  0x80   : > { %p5080_p12 = pnand %p5079_p11, %p5073_p9 }
  0x82   : > { %5083 = shalt.err (!%p5080_p12)
}
  0x83   : > { %s5767_s30 = smov 8   ;;  %s5768_s8 = smov 128  }
  0x84   : > { %4448 = dma.hbm_to_vmem [thread:$0]  (!%p5316_p6), %s5748_s9, 16384, %s416_s13, [#allocation13], %s5768_s8, %s5768_s8, %s5767_s30  }
  0x85   : > { %s3953_s18 = sadd.s32 4294967294, %s5192_s28   ;;  %s5443_s16 = sadd.s32 1, %s5192_s28  }
  0x86   : > { %s39_s10 = sadd.s32 1, %s5188_s27  ;;  %s36_s12 = ssub.s32 %s5192_s28, %s5443_s16 }
  0x87   : > { %p46_p8 = scmp.ne.s32.totalorder %s5188_s27, %s5184_s26  ;;  %p37_p1 = scmp.eq.s32.totalorder %s36_s12, 0 }
  0x88   : > { %p47_p3 = scmp.eq.s32.totalorder %s5192_s28, 0  ;;  %p52_p13 = scmp.ne.s32.totalorder %s5184_s26, %s5180_s25 }
  0x89   : > { %p328_p0 = scmp.eq.s32.totalorder %s5300_s14, 1  ;;  %p5769_p5 = scmp.eq.s32.totalorder %s5300_s14, 0 }
  0x8a   : > { %s5455_s22 = scalar_select %p37_p1, %s5188_s27, %s39_s10  }
  0x8b   : > { %p48_p2 = por %p47_p3, %p46_p8  ;;  %p5459_p7 = por %p5769_p5, %p52_p13 }
  0x8c   : > { %p5463_p6 = por %p328_p0, %p46_p8  ;;  %p334_p9 = scmp.eq.s32.totalorder %s3953_s18, 1 }
  0x8d   : > { %p4462_p4 = scmp.lt.s32.totalorder %s5192_s28, 2  ;;  %s438_s24 = sand.u32 1, %s5188_s27  }
  0x8e   : > { %s5771_s13 = scalar_select %p5463_p6, 1, 0 }
  0x8f   : > { %p5469_p10 = por %p334_p9, %p52_p13  ;;  %s3961_s17 = sshll.u32 %s438_s24, 3 }
  0x90   : > { %s4374_s20 = sshll.u32 %s5192_s28, 7  ;;  %s442_s19 = scalar_lea.vmem [#allocation3], %s3961_s17 }
  0x91   : > { %s5772_s29 = scalar_select %p5469_p10, 1, 0 }
  0x92   : > { %s5477_s8 = scalar_lea.hbm %s5739_s0, %s4374_s20  ;;  %s450_s21 = sshll.u32 %s442_s19, 4  ;;  %s5483_s21 = int_to_ptr.vmem [resolvable:$true] %s450_s21 }
  0x93   : > { %p5479_p11 = pnand %p4462_p4, %p48_p2  ;;  %s439_s10 = scalar_lea.sflag [#allocation4], %s438_s24 }
  0x94   : > { %s5084_s12 = scalar_lea.hbm %s5477_s8, 128  ;;  %s5089_s11 = scalar_lea.hbm %s5739_s0, 256 }
  0x95   : > { %p5085_p12 = scmp.ne.s32.totalorder %s5477_s8, %s5084_s12  ;;  %p5086_p8 = pneg %p5479_p11 }
  0x96   : > { %p5090_p13 = scmp.lt.u32.totalorder %s5477_s8, %s5739_s0  ;;  %p5091_p0 = scmp.lt.u32.totalorder %s5089_s11, %s5084_s12 }
  0x97   : > { %p5087_p1 = pnand %p5086_p8, %p5085_p12  ;;  %p5093_p5 = scmp.lt.u32.totalorder %s5084_s12, %s5477_s8 }
  0x98   : > { %p5092_p2 = por %p5091_p0, %p5090_p13 }
  0x99   : > { %p5088_p3 = pneg %p5087_p1 }
  0x9a   : > { %p5094_p9 = por %p5093_p5, %p5092_p2 }
  0x9c   : > { %p5095_p4 = pnand %p5094_p9, %p5088_p3 }
  0x9e   : > { %5098 = shalt.err (!%p5095_p4)
}
  0x9f   : > { %s5099_s24 = scalar_lea.vmem %s5483_s21, 128  ;;  %s5205_s20 = smov [#allocation3]  }
  0xa0   : > { %p5100_p12 = scmp.ne.s32.totalorder %s5483_s21, %s5099_s24  ;;  %s5104_s17 = sshll.u32 %s5205_s20, 4  ;;  %s5105_s17 = int_to_ptr.vmem [resolvable:$false] %s5104_s17 }
  0xa1   : > { %s5106_s30 = scalar_lea.vmem %s5105_s17, 256  ;;  %p5107_p6 = scmp.lt.s32.totalorder %s5483_s21, %s5105_s17 }
  0xa2   : > { %p5102_p1 = pnand %p5100_p12, %p5086_p8  ;;  %p5108_p13 = scmp.lt.s32.totalorder %s5106_s30, %s5099_s24 }
  0xa4   : > { %p5103_p10 = pneg %p5102_p1  ;;  %p5109_p0 = por %p5108_p13, %p5107_p6 }
  0xa6   : > { %p5110_p2 = pnand %p5109_p0, %p5103_p10 }
  0xa8   : > { %5113 = shalt.err (!%p5110_p2)
}
  0xa9   : > { %4452 = dma.hbm_to_vmem [thread:$0]  (!%p5479_p11), %s5477_s8, 128, %s5483_s21, %s439_s10  }
  0xaa   : > { %p5774_p3 = scmp.ne.s32.totalorder %s5764_s15, 0 }
  0xab   : > { %s5513_s12 = sand.u32 (!%p5774_p3), 1, %s5184_s26  }
  0xac   : > { %459 = sbr.rel (%p5774_p3) target bundleno = 2573 (0xa0d), region = 72  ;;  %s3965_s11 = sshll.u32 (!%p5774_p3), %s5513_s12, 3 }
  0xad   : > { %s462_s19 = scalar_lea.sflag (!%p5774_p3), [#allocation4], %s5513_s12  ;;  %s465_s24 = scalar_lea.vmem (!%p5774_p3), [#allocation3], %s3965_s11 }
  0xb3   : > { %5159 = dma.done.wait (%p5459_p7), %s462_s19, 128  }
  0xb4   : > { %5161 = vsyncadd (%p5459_p7), %s462_s19, 4294967168  ;;  %p5775_p6 = scmp.eq.s32.totalorder %s5300_s14, 0 }
  0xb6   : > { %5163 = dma.done.wait (%p5775_p6), [#allocation7], 16384   ;;  %p5776_p10 = pmov %p5775_p6 }
  0xb7   : > { %p5777_p11 = pmov %p5775_p6 }
  0xb8   : > { %5165 = vsyncadd (%p5776_p10), [#allocation7], 4294950912 }
  0xb9   : > { %5167 = dma.done.wait (%p5777_p11), [#allocation10], 16416   ;;  %p5778_p8 = pmov %p5775_p6 }
  0xba   : > { %p5779_p5 = pmov %p5775_p6 }
  0xbb   : > { %5169 = vsyncadd (%p5778_p8), [#allocation10], 4294950880 }
  0xbc   : > { %5171 = dma.done.wait (%p5779_p5), [#allocation13], 16384   ;;  %p5780_p9 = pmov %p5779_p5 }
  0xbd   : > { %v529_v0 = vld [vmem:[%s465_s24] sm:$0xff]  ;;  %v4517_v6 = vld [vmem:[#allocation6 + $0xc] ss:$24 sps:$4 sm:$0xff]   ;;  %v4519_v7 = vld [vmem:[#allocation6 + $0x8] ss:$24 sps:$4 sm:$0xff]   ;;  %vm5207_vm0 = vmmov 0  }
  0xbe   : > { %5173 = vsyncadd (%p5780_p9), [#allocation13], 4294950912  ;;  %v5535_v1 = vunpack.c.l.bf16 %v529_v0  ;;  %v5537_v2 = vunpack.c.h.bf16 %v529_v0  ;;  %v4514_v4 = vld [vmem:[#allocation6 + $0x4] ss:$24 sps:$4 sm:$0xff]   ;;  %v4516_v5 = vld [vmem:[#allocation6] ss:$24 sps:$4 sm:$0xff]   ;;  %1228 = vmatprep.subr.bf16.mxu1 %v4517_v6 }
  0xbf   : > { %v4520_v8 = vld [vmem:[#allocation6 + $0x34] ss:$24 sps:$4 sm:$0xff]   ;;  %1187 = vmatprep.subr.bf16.mxu0 %v4514_v4  ;;  %1229 = vmatpush1.bf16.msra.mxu1 %v4519_v7  ;;  %v4522_v10 = vld [vmem:[#allocation6 + $0x30] ss:$24 sps:$4 sm:$0xff]   ;;  %v4526_v12 = vld [vmem:[#allocation6 + $0x64] ss:$24 sps:$4 sm:$0xff]  }
  0xc0   : > { %v534_v3 = vadd.f32 %v5537_v2, %v5535_v1  ;;  %v4523_v9 = vld [vmem:[#allocation6 + $0x3c] ss:$24 sps:$4 sm:$0xff]   ;;  %1188 = vmatpush1.bf16.msra.mxu0 %v4516_v5  ;;  %v4525_v11 = vld [vmem:[#allocation6 + $0x38] ss:$24 sps:$4 sm:$0xff]   ;;  %v4529_v13 = vld [vmem:[#allocation6 + $0x6c] ss:$24 sps:$4 sm:$0xff]  }
  0xc1   : > { %1189 = vmatprep.subr.bf16.mxu0 %v4520_v8  ;;  %1230 = vmatprep.subr.bf16.mxu1 %v4523_v9  ;;  %v4528_v14 = vld [vmem:[#allocation6 + $0x60] ss:$24 sps:$4 sm:$0xff]   ;;  %v4532_v16 = vld [vmem:[#allocation6 + $0x94] ss:$24 sps:$4 sm:$0xff]   ;;  %v4534_v18 = vld [vmem:[#allocation6 + $0x90] ss:$24 sps:$4 sm:$0xff]  }
  0xc2   : > { %535 = vadd.xlane.f32.xlu0 %v534_v3  ;;  %v4531_v15 = vld [vmem:[#allocation6 + $0x68] ss:$24 sps:$4 sm:$0xff]   ;;  %v4535_v17 = vld [vmem:[#allocation6 + $0x9c] ss:$24 sps:$4 sm:$0xff]   ;;  %v4537_v19 = vld [vmem:[#allocation6 + $0x98] ss:$24 sps:$4 sm:$0xff]  }
  0xc3   : > { %1231 = vmatpush1.bf16.msra.mxu1 %v4525_v11  ;;  %v4538_v20 = vld [vmem:[#allocation6 + $0xc4] ss:$24 sps:$4 sm:$0xff]   ;;  %v4540_v22 = vld [vmem:[#allocation6 + $0xc0] ss:$24 sps:$4 sm:$0xff]   ;;  %v4544_v24 = vld [vmem:[#allocation6 + $0xf4] ss:$24 sps:$4 sm:$0xff]  }
  0xc4   : > { %1190 = vmatpush1.bf16.msra.mxu0 %v4522_v10  ;;  %1232 = vmatprep.subr.bf16.mxu1 %v4529_v13  ;;  %v4541_v21 = vld [vmem:[#allocation6 + $0xcc] ss:$24 sps:$4 sm:$0xff]   ;;  %v4543_v23 = vld [vmem:[#allocation6 + $0xc8] ss:$24 sps:$4 sm:$0xff]   ;;  %v4547_v25 = vld [vmem:[#allocation6 + $0xfc] ss:$24 sps:$4 sm:$0xff]  }
  0xc5   : > { %1191 = vmatprep.subr.bf16.mxu0 %v4526_v12  ;;  %v4546_v26 = vld [vmem:[#allocation6 + $0xf0] ss:$24 sps:$4 sm:$0xff]   ;;  %v4550_v28 = vld [vmem:[#allocation6 + $0x124] ss:$24 sps:$4 sm:$0xff]   ;;  %v4552_v30 = vld [vmem:[#allocation6 + $0x120] ss:$24 sps:$4 sm:$0xff]  }
  0xc6   : > { %v4549_v27 = vld [vmem:[#allocation6 + $0xf8] ss:$24 sps:$4 sm:$0xff]   ;;  %v4553_v29 = vld [vmem:[#allocation6 + $0x12c] ss:$24 sps:$4 sm:$0xff]   ;;  %v4555_v31 = vld [vmem:[#allocation6 + $0x128] ss:$24 sps:$4 sm:$0xff]  }
  0xc7   : > { %1233 = vmatpush1.bf16.msra.mxu1 %v4531_v15  ;;  %v4556_v32 = vld [vmem:[#allocation6 + $0x154] ss:$24 sps:$4 sm:$0xff]   ;;  %v4558_v34 = vld [vmem:[#allocation6 + $0x150] ss:$24 sps:$4 sm:$0xff]   ;;  %v4562_v36 = vld [vmem:[#allocation6 + $0x184] ss:$24 sps:$4 sm:$0xff]  }
  0xc8   : > { %1192 = vmatpush1.bf16.msra.mxu0 %v4528_v14  ;;  %1234 = vmatprep.subr.bf16.mxu1 %v4535_v17  ;;  %v4559_v33 = vld [vmem:[#allocation6 + $0x15c] ss:$24 sps:$4 sm:$0xff]   ;;  %v4561_v35 = vld [vmem:[#allocation6 + $0x158] ss:$24 sps:$4 sm:$0xff]   ;;  %v4565_v37 = vld [vmem:[#allocation6 + $0x18c] ss:$24 sps:$4 sm:$0xff]  }
  0xc9   : > { %1193 = vmatprep.subr.bf16.mxu0 %v4532_v16  ;;  %v4564_v38 = vld [vmem:[#allocation6 + $0x180] ss:$24 sps:$4 sm:$0xff]   ;;  %v4568_v40 = vld [vmem:[#allocation6 + $0x1b4] ss:$24 sps:$4 sm:$0xff]   ;;  %v4570_v42 = vld [vmem:[#allocation6 + $0x1b0] ss:$24 sps:$4 sm:$0xff]   ;;  %v552_v16 = vlaneseq }
  0xca   : > { %v4567_v39 = vld [vmem:[#allocation6 + $0x188] ss:$24 sps:$4 sm:$0xff]   ;;  %v4571_v41 = vld [vmem:[#allocation6 + $0x1bc] ss:$24 sps:$4 sm:$0xff]   ;;  %v4573_v43 = vld [vmem:[#allocation6 + $0x1b8] ss:$24 sps:$4 sm:$0xff]  }
  0xcb   : > { %1235 = vmatpush1.bf16.msra.mxu1 %v4537_v19  ;;  %v4574_v44 = vld [vmem:[#allocation6 + $0x1e4] ss:$24 sps:$4 sm:$0xff]   ;;  %v4576_v52 = vld [vmem:[#allocation6 + $0x1e0] ss:$24 sps:$4 sm:$0xff]   ;;  %v4580_v55 = vld [vmem:[#allocation6 + $0x214] ss:$24 sps:$4 sm:$0xff]  }
  0xcc   : > { %1194 = vmatpush1.bf16.msra.mxu0 %v4534_v18  ;;  %1236 = vmatprep.subr.bf16.mxu1 %v4541_v21  ;;  %v4577_v53 = vld [vmem:[#allocation6 + $0x1ec] ss:$24 sps:$4 sm:$0xff]   ;;  %v4579_v54 = vld [vmem:[#allocation6 + $0x1e8] ss:$24 sps:$4 sm:$0xff]   ;;  %v4583_v57 = vld [vmem:[#allocation6 + $0x21c] ss:$24 sps:$4 sm:$0xff]  }
  0xcd   : > { %1195 = vmatprep.subr.bf16.mxu0 %v4538_v20  ;;  %v4582_v56 = vld [vmem:[#allocation6 + $0x210] ss:$24 sps:$4 sm:$0xff]   ;;  %v4586_v59 = vld [vmem:[#allocation6 + $0x244] ss:$24 sps:$4 sm:$0xff]   ;;  %v4588_v60 = vld [vmem:[#allocation6 + $0x240] ss:$24 sps:$4 sm:$0xff]  }
  0xce   : > { %v4585_v58 = vld [vmem:[#allocation6 + $0x218] ss:$24 sps:$4 sm:$0xff]   ;;  %v4589_v61 = vld [vmem:[#allocation6 + $0x24c] ss:$24 sps:$4 sm:$0xff]   ;;  %v4591_v62 = vld [vmem:[#allocation6 + $0x248] ss:$24 sps:$4 sm:$0xff]  }
  0xcf   : > { %1237 = vmatpush1.bf16.msra.mxu1 %v4543_v23  ;;  %v4592_v63 = vld [vmem:[#allocation6 + $0x274] ss:$24 sps:$4 sm:$0xff]   ;;  %v4594_v3 = vld [vmem:[#allocation6 + $0x270] ss:$24 sps:$4 sm:$0xff]   ;;  %v4598_v5 = vld [vmem:[#allocation6 + $0x2a4] ss:$24 sps:$4 sm:$0xff]  }
  0xd0   : > { %1196 = vmatpush1.bf16.msra.mxu0 %v4540_v22  ;;  %1238 = vmatprep.subr.bf16.mxu1 %v4547_v25  ;;  %v4595_v0 = vld [vmem:[#allocation6 + $0x27c] ss:$24 sps:$4 sm:$0xff]   ;;  %v4597_v4 = vld [vmem:[#allocation6 + $0x278] ss:$24 sps:$4 sm:$0xff]   ;;  %v4601_v6 = vld [vmem:[#allocation6 + $0x2ac] ss:$24 sps:$4 sm:$0xff]  }
  0xd1   : > { %1197 = vmatprep.subr.bf16.mxu0 %v4544_v24  ;;  %v4600_v7 = vld [vmem:[#allocation6 + $0x2a0] ss:$24 sps:$4 sm:$0xff]   ;;  %v4604_v9 = vld [vmem:[#allocation6 + $0x2d4] ss:$24 sps:$4 sm:$0xff]   ;;  %v4606_v11 = vld [vmem:[#allocation6 + $0x2d0] ss:$24 sps:$4 sm:$0xff]  }
  0xd2   : > { %v4603_v8 = vld [vmem:[#allocation6 + $0x2a8] ss:$24 sps:$4 sm:$0xff]   ;;  %v4607_v10 = vld [vmem:[#allocation6 + $0x2dc] ss:$24 sps:$4 sm:$0xff]   ;;  %v4609_v12 = vld [vmem:[#allocation6 + $0x2d8] ss:$24 sps:$4 sm:$0xff]  }
  0xd3   : > { %1239 = vmatpush1.bf16.msra.mxu1 %v4549_v27  ;;  %v4612_v13 = vld [vmem:[#allocation6 + $0x14] ss:$24 sps:$4 sm:$0xff]   ;;  %v5551_v18 = vshrl.u32 %v552_v16, 7  ;;  %v532_v21 = vld [vmem:[%s5744_s5] sm:$0x3]  ;;  %vm1369_vm1 = vcmask 1043456  }
  0xd4   : > { %1198 = vmatpush1.bf16.msra.mxu0 %v4546_v26  ;;  %1240 = vmatprep.subr.bf16.mxu1 %v4553_v29  ;;  %v533_v22 = vld [vmem:[%s5745_s6] sm:$0x3]  ;;  %vm1353_vm2 = vcmask 64512   ;;  %s5781_s30 = sld [smem:[#allocation22_spill]]  ;;  %s5782_s15 = sld [smem:[#allocation23_spill]] }
  0xd5   : > { %1199 = vmatprep.subr.bf16.mxu0 %v4550_v28  ;;  %v5554_v19 = vsub.s32 1, %v5551_v18  ;;  %v5557_v20 = vsub.s32 0, %v5551_v18  ;;  %s5783_s21 = sld [smem:[#allocation20_spill]]  ;;  %s5784_s20 = sld [smem:[#allocation21_spill]] }
  0xd6   : > { %s4376_s17 = sshll.u32 %s5300_s14, 7  ;;  %s5785_s23 = sld [smem:[#allocation24_spill]] }
  0xd7   : > { %1241 = vmatpush1.bf16.msra.mxu1 %v4555_v31  ;;  %v559_v23 = vrot.slane %v532_v21, %v5554_v19  ;;  %v555_v24 = vrot.slane %v532_v21, %v5557_v20  ;;  %v572_v27 = vrot.slane %v533_v22, %v5554_v19  ;;  %v568_v29 = vrot.slane %v533_v22, %v5557_v20  ;;  %p5786_p4 = scmp.ne.s32.totalorder %s5771_s13, 0  ;;  %s5208_s14 = smov [#allocation14]  }
  0xd8   : > { %1200 = vmatpush1.bf16.msra.mxu0 %v4552_v30  ;;  %1242 = vmatprep.subr.bf16.mxu1 %v4559_v33 }
  0xd9   : > { %1201 = vmatprep.subr.bf16.mxu0 %v4556_v32 }
  0xdb   : > { %1243 = vmatpush1.bf16.msra.mxu1 %v4561_v35  ;;  %v4610_v35 = vld [vmem:[#allocation6 + $0x10] ss:$24 sps:$4 sm:$0xff]  }
  0xdc   : > { %1202 = vmatpush1.bf16.msra.mxu0 %v4558_v34  ;;  %1244 = vmatprep.subr.bf16.mxu1 %v4565_v37  ;;  %v4615_v37 = vld [vmem:[#allocation6 + $0x44] ss:$24 sps:$4 sm:$0xff]   ;;  %s5695_s8 = scalar_lea.hbm %s5785_s23, %s4376_s17 }
  0xdd   : > { %1203 = vmatprep.subr.bf16.mxu0 %v4562_v36 }
  0xdf   : > { %1245 = vmatpush1.bf16.msra.mxu1 %v4567_v39  ;;  %v4618_v39 = vld [vmem:[#allocation6 + $0x74] ss:$24 sps:$4 sm:$0xff]  }
  0xe0   : > { %1204 = vmatpush1.bf16.msra.mxu0 %v4564_v38  ;;  %1246 = vmatprep.subr.bf16.mxu1 %v4571_v41  ;;  %v4613_v38 = vld [vmem:[#allocation6 + $0x40] ss:$24 sps:$4 sm:$0xff]   ;;  %v4621_v41 = vld [vmem:[#allocation6 + $0xa4] ss:$24 sps:$4 sm:$0xff]  }
  0xe1   : > { %1205 = vmatprep.subr.bf16.mxu0 %v4568_v40  ;;  %v4616_v40 = vld [vmem:[#allocation6 + $0x70] ss:$24 sps:$4 sm:$0xff]  }
  0xe3   : > { %1247 = vmatpush1.bf16.msra.mxu1 %v4573_v43  ;;  %v4624_v43 = vld [vmem:[#allocation6 + $0xd4] ss:$24 sps:$4 sm:$0xff]  }
  0xe4   : > { %1206 = vmatpush1.bf16.msra.mxu0 %v4570_v42  ;;  %1248 = vmatprep.subr.bf16.mxu1 %v4577_v53  ;;  %v4619_v42 = vld [vmem:[#allocation6 + $0xa0] ss:$24 sps:$4 sm:$0xff]   ;;  %v4639_v53 = vld [vmem:[#allocation6 + $0x1c4] ss:$24 sps:$4 sm:$0xff]  }
  0xe5   : > { %1207 = vmatprep.subr.bf16.mxu0 %v4574_v44  ;;  %v4622_v44 = vld [vmem:[#allocation6 + $0xd0] ss:$24 sps:$4 sm:$0xff]  }
  0xe7   : > { %1249 = vmatpush1.bf16.msra.mxu1 %v4579_v54  ;;  %v4637_v54 = vld [vmem:[#allocation6 + $0x1c0] ss:$24 sps:$4 sm:$0xff]  }
  0xe8   : > { %1208 = vmatpush1.bf16.msra.mxu0 %v4576_v52  ;;  %1250 = vmatprep.subr.bf16.mxu1 %v4583_v57  ;;  %v4634_v52 = vld [vmem:[#allocation6 + $0x190] ss:$24 sps:$4 sm:$0xff]   ;;  %v4645_v57 = vld [vmem:[#allocation6 + $0x224] ss:$24 sps:$4 sm:$0xff]  }
  0xe9   : > { %1209 = vmatprep.subr.bf16.mxu0 %v4580_v55  ;;  %v4642_v55 = vld [vmem:[#allocation6 + $0x1f4] ss:$24 sps:$4 sm:$0xff]  }
  0xeb   : > { %1251 = vmatpush1.bf16.msra.mxu1 %v4585_v58  ;;  %v4643_v58 = vld [vmem:[#allocation6 + $0x220] ss:$24 sps:$4 sm:$0xff]  }
  0xec   : > { %1210 = vmatpush1.bf16.msra.mxu0 %v4582_v56  ;;  %1252 = vmatprep.subr.bf16.mxu1 %v4589_v61  ;;  %v4640_v56 = vld [vmem:[#allocation6 + $0x1f0] ss:$24 sps:$4 sm:$0xff]   ;;  %v4651_v61 = vld [vmem:[#allocation6 + $0x284] ss:$24 sps:$4 sm:$0xff]  }
  0xed   : > { %1211 = vmatprep.subr.bf16.mxu0 %v4586_v59  ;;  %v4648_v59 = vld [vmem:[#allocation6 + $0x254] ss:$24 sps:$4 sm:$0xff]  }
  0xef   : > { %1253 = vmatpush1.bf16.msra.mxu1 %v4591_v62  ;;  %v4649_v62 = vld [vmem:[#allocation6 + $0x280] ss:$24 sps:$4 sm:$0xff]  }
  0xf0   : > { %1212 = vmatpush1.bf16.msra.mxu0 %v4588_v60  ;;  %1254 = vmatprep.subr.bf16.mxu1 %v4595_v0  ;;  %v4646_v60 = vld [vmem:[#allocation6 + $0x250] ss:$24 sps:$4 sm:$0xff]  }
  0xf1   : > { %1213 = vmatprep.subr.bf16.mxu0 %v4592_v63  ;;  %v4654_v63 = vld [vmem:[#allocation6 + $0x2b4] ss:$24 sps:$4 sm:$0xff]   ;;  %v4652_v0 = vld [vmem:[#allocation6 + $0x2b0] ss:$24 sps:$4 sm:$0xff]  }
  0xf3   : > { %1255 = vmatpush1.bf16.msra.mxu1 %v4597_v4  ;;  %v4655_v4 = vld [vmem:[#allocation6 + $0x2e0] ss:$24 sps:$4 sm:$0xff]  }
  0xf4   : > { %1214 = vmatpush1.bf16.msra.mxu0 %v4594_v3  ;;  %1256 = vmatprep.subr.bf16.mxu1 %v4601_v6  ;;  %v4657_v3 = vld [vmem:[#allocation6 + $0x2e4] ss:$24 sps:$4 sm:$0xff]   ;;  %v687_v6 = vsub.s32 2, %v5551_v18 }
  0xf5   : > { %1215 = vmatprep.subr.bf16.mxu0 %v4598_v5  ;;  %v5206_v5 = vmov 0.0  }
  0xf7   : > { %1257 = vmatpush1.bf16.msra.mxu1 %v4603_v8  ;;  %v691_v8 = vsub.s32 3, %v5551_v18 }
  0xf8   : > { %1216 = vmatpush1.bf16.msra.mxu0 %v4600_v7  ;;  %1258 = vmatprep.subr.bf16.mxu1 %v4607_v10  ;;  %v675_v7 = vld [vmem:[%s5741_s2] sm:$0x3f] }
  0xf9   : > { %1217 = vmatprep.subr.bf16.mxu0 %v4604_v9  ;;  %v688_v9 = vrot.slane %v675_v7, %v687_v6  ;;  %v692_v10 = vrot.slane %v675_v7, %v691_v8  ;;  %v680_v16 = vrot.slane %v675_v7, %v5557_v20 }
  0xfb   : > { %1259 = vmatpush1.bf16.msra.mxu1 %v4609_v12 }
  0xfc   : > { %1218 = vmatpush1.bf16.msra.mxu0 %v4606_v11  ;;  %4397 = vmatprep.subr.bf16.mxu1 %v5206_v5 }
  0xfd   : > { %1269 = vmatprep.subr.bf16.mxu0 %v4612_v13 }
 0x14f   : > { %v536_v45 = vpop.xlane.xlu0 %535 }
 0x150   : > { %v538_v46 = vmul.f32 0.00390625, %v536_v45  ;;  %v4627_v45 = vld [vmem:[#allocation6 + $0x104] ss:$24 sps:$4 sm:$0xff]  }
 0x152   : > { %v5542_v47 = vsub.f32 %v5535_v1, %v538_v46  ;;  %v5545_v48 = vsub.f32 %v5537_v2, %v538_v46  ;;  %v4625_v46 = vld [vmem:[#allocation6 + $0x100] ss:$24 sps:$4 sm:$0xff]  }
 0x154   : > { %v541_v49 = vmul.f32 %v5542_v47, %v5542_v47  ;;  %v542_v50 = vmul.f32 %v5545_v48, %v5545_v48 }
 0x156   : > { %v543_v51 = vadd.f32 %v542_v50, %v541_v49  ;;  %v4633_v49 = vld [vmem:[#allocation6 + $0x164] ss:$24 sps:$4 sm:$0xff]   ;;  %v4631_v50 = vld [vmem:[#allocation6 + $0x160] ss:$24 sps:$4 sm:$0xff]  }
 0x158   : > { %544 = vadd.xlane.f32.xlu0 %v543_v51  ;;  %v4636_v51 = vld [vmem:[#allocation6 + $0x194] ss:$24 sps:$4 sm:$0xff]  }
 0x1e5   : > { %v545_v14 = vpop.xlane.xlu0 %544 }
 0x1e6   : > { %v546_v15 = vmul.f32 0.00390625, %v545_v14 }
 0x1e8   : > { %v547_v17 = vadd.f32 1e-05, %v546_v15 }
 0x1ea   : > { %4900 = vrsqrt.f32 %v547_v17 }
 0x1f4   : > { %v4901_v25 = vpop.eup %4900 }
 0x1f5   : > { %v550_v26 = vmul.f32 %v4901_v25, %v5545_v48  ;;  %v549_v28 = vmul.f32 %v4901_v25, %v5542_v47  ;;  %v4630_v47 = vld [vmem:[#allocation6 + $0x134] ss:$24 sps:$4 sm:$0xff]   ;;  %v4628_v48 = vld [vmem:[#allocation6 + $0x130] ss:$24 sps:$4 sm:$0xff]  }
 0x1f7   : > { %v563_v30 = vmul.f32 %v559_v23, %v550_v26  ;;  %v562_v31 = vmul.f32 %v555_v24, %v549_v28  ;;  %v684_v24 = vrot.slane %v675_v7, %v5554_v19 }
 0x1f9   : > { %v576_v32 = vadd.f32 %v572_v27, %v563_v30  ;;  %v575_v33 = vadd.f32 %v568_v29, %v562_v31 }
 0x1fb   : > { %v578_v34 = vpack.c.bf16 %v576_v32, %v576_v32  ;;  %v5571_v36 = vpack.c.bf16 %v575_v33, %v575_v33  ;;  %v695_v32 = vsub.s32 4, %v5551_v18  ;;  %v699_v33 = vsub.s32 5, %v5551_v18 }
 0x1fd   : > { %1219 = vmatprep.mubr.bf16.mxu0 %v578_v34  ;;  %1260 = vmatprep.mubr.bf16.mxu1 %v578_v34 }
 0x1fe   : > { %1220 = vmatmul.mubr.bf16.vlgmr.msra.gmra.mrb[0].mxu0 %v5571_v36  ;;  %1261 = vmatmul.mubr.bf16.vlgmr.msra.gmra.mrb[0].mxu1 %v5571_v36 }
 0x1ff   : > { %1270 = vmatpush1.bf16.msra.mxu0 %v4610_v35  ;;  %1301 = vmatprep.mubr.bf16.mxu0 %v578_v34  ;;  %v696_v34 = vrot.slane %v675_v7, %v695_v32  ;;  %v700_v35 = vrot.slane %v675_v7, %v699_v33 }
 0x200   : > { %1271 = vmatprep.subr.bf16.mxu0 %v4615_v37  ;;  %4399 = vmatprep.mubr.msk.bf16.mxu1 %vm5207_vm0, %v5206_v5 }
 0x203   : > { %1272 = vmatpush1.bf16.msra.mxu0 %v4613_v38 }
 0x204   : > { %1273 = vmatprep.subr.bf16.mxu0 %v4618_v39 }
 0x207   : > { %1274 = vmatpush1.bf16.msra.mxu0 %v4616_v40 }
 0x208   : > { %1275 = vmatprep.subr.bf16.mxu0 %v4621_v41 }
 0x20b   : > { %1276 = vmatpush1.bf16.msra.mxu0 %v4619_v42 }
 0x20c   : > { %1277 = vmatprep.subr.bf16.mxu0 %v4624_v43 }
 0x20f   : > { %1278 = vmatpush1.bf16.msra.mxu0 %v4622_v44 }
 0x210   : > { %1279 = vmatprep.subr.bf16.mxu0 %v4627_v45 }
 0x213   : > { %1280 = vmatpush1.bf16.msra.mxu0 %v4625_v46 }
 0x214   : > { %1281 = vmatprep.subr.bf16.mxu0 %v4630_v47 }
 0x217   : > { %1282 = vmatpush1.bf16.msra.mxu0 %v4628_v48 }
 0x218   : > { %1283 = vmatprep.subr.bf16.mxu0 %v4633_v49 }
 0x21b   : > { %1284 = vmatpush1.bf16.msra.mxu0 %v4631_v50 }
 0x21c   : > { %1285 = vmatprep.subr.bf16.mxu0 %v4636_v51 }
 0x21f   : > { %1286 = vmatpush1.bf16.msra.mxu0 %v4634_v52 }
 0x220   : > { %1287 = vmatprep.subr.bf16.mxu0 %v4639_v53 }
 0x223   : > { %1288 = vmatpush1.bf16.msra.mxu0 %v4637_v54 }
 0x224   : > { %1289 = vmatprep.subr.bf16.mxu0 %v4642_v55 }
 0x227   : > { %1290 = vmatpush1.bf16.msra.mxu0 %v4640_v56 }
 0x228   : > { %1291 = vmatprep.subr.bf16.mxu0 %v4645_v57 }
 0x22b   : > { %1292 = vmatpush1.bf16.msra.mxu0 %v4643_v58 }
 0x22c   : > { %1293 = vmatprep.subr.bf16.mxu0 %v4648_v59 }
 0x22f   : > { %1294 = vmatpush1.bf16.msra.mxu0 %v4646_v60 }
 0x230   : > { %1295 = vmatprep.subr.bf16.mxu0 %v4651_v61 }
 0x233   : > { %1296 = vmatpush1.bf16.msra.mxu0 %v4649_v62 }
 0x234   : > { %1297 = vmatprep.subr.bf16.mxu0 %v4654_v63 }
 0x237   : > { %1298 = vmatpush1.bf16.msra.mxu0 %v4652_v0 }
 0x238   : > { %1299 = vmatprep.subr.bf16.mxu0 %v4657_v3 }
 0x23b   : > { %1300 = vmatpush1.bf16.msra.mxu0 %v4655_v4  ;;  %v4660_v4 = vld [vmem:[#allocation8 + $0x4] ss:$8 sps:$4 sm:$0xff]  }
 0x23c   : > { %4385 = vmatprep.subr.bf16.mxu0 %v5206_v5 }
 0x23e   : > { %1302 = vmatmul.mubr.bf16.vlgmr.msra.gmra.mrb[4].mxu0 %v5571_v36 }
 0x23f   : > { %4387 = vmatprep.mubr.msk.bf16.mxu0 %vm5207_vm0, %v5206_v5 }
 0x2d1   : > { %v1221_v11 = vpop.f32.mrb[0].mxu0  ;;  %v1262_v12 = vpop.f32.mrb[0].mxu1 }
 0x2d2   : > { %v1263_v13 = vadd.f32 %v1262_v12, %v688_v9  ;;  %v1223_v14 = vpop.f32.mrb[1].mxu0  ;;  %v1264_v15 = vpop.f32.mrb[1].mxu1  ;;  %v1222_v28 = vadd.f32 %v1221_v11, %v680_v16  ;;  %v4663_v16 = vld [vmem:[#allocation8 + $0x14] ss:$8 sps:$4 sm:$0xff]  }
 0x2d3   : > { %v1265_v17 = vadd.f32 %v1264_v15, %v692_v10  ;;  %v1225_v21 = vpop.f32.mrb[2].mxu0  ;;  %v1266_v22 = vpop.f32.mrb[2].mxu1  ;;  %v1224_v29 = vadd.f32 %v1223_v14, %v684_v24  ;;  %v4658_v14 = vld [vmem:[#allocation8] ss:$8 sps:$4 sm:$0xff]   ;;  %v4667_v24 = vld [vmem:[#allocation8 + $0x30] ss:$8 sps:$4 sm:$0xff]  }
 0x2d4   : > { %v1311_v23 = vpack.c.bf16 %v1263_v13, %v1263_v13  ;;  %v1226_v25 = vpop.f32.mrb[3].mxu0  ;;  %v1267_v26 = vpop.f32.mrb[3].mxu1  ;;  %v1310_v30 = vpack.c.bf16 %v1222_v28, %v1222_v28  ;;  %v4666_v21 = vld [vmem:[#allocation8 + $0x24] ss:$8 sps:$4 sm:$0xff]   ;;  %v4664_v22 = vld [vmem:[#allocation8 + $0x20] ss:$8 sps:$4 sm:$0xff]  }
 0x2d5   : > { %v1416_v27 = vpack.c.bf16 %v1265_v17, %v1265_v17  ;;  %v1415_v31 = vpack.c.bf16 %v1224_v29, %v1224_v29  ;;  %v4661_v17 = vld [vmem:[#allocation8 + $0x10] ss:$8 sps:$4 sm:$0xff]   ;;  %v4672_v25 = vld [vmem:[#allocation8 + $0x44] ss:$8 sps:$4 sm:$0xff]   ;;  %v4670_v26 = vld [vmem:[#allocation8 + $0x40] ss:$8 sps:$4 sm:$0xff]  }
 0x2d6   : > { %4386 = vmatpush3.bf16.xpose.msra.mxu0 %v1311_v23  ;;  %v4669_v23 = vld [vmem:[#allocation8 + $0x34] ss:$8 sps:$4 sm:$0xff]   ;;  %v4673_v28 = vld [vmem:[#allocation8 + $0x50] ss:$8 sps:$4 sm:$0xff]   ;;  %v4678_v29 = vld [vmem:[#allocation8 + $0x64] ss:$8 sps:$4 sm:$0xff]  }
 0x2d7   : > { %4398 = vmatpush3.bf16.xpose.msra.mxu1 %v1416_v27  ;;  %4391 = vmatprep.subr.bf16.mxu0 %v5206_v5  ;;  %v4675_v27 = vld [vmem:[#allocation8 + $0x54] ss:$8 sps:$4 sm:$0xff]  }
 0x2d8   : > { %4403 = vmatprep.subr.bf16.mxu1 %v5206_v5 }
 0x2dd   : > { %4388 = vmatmul.mubr.bf16.vlgmr.msra.gmra.mrb[8].mxu0 %v1310_v30  ;;  %v4676_v30 = vld [vmem:[#allocation8 + $0x60] ss:$8 sps:$4 sm:$0xff]  }
 0x2de   : > { %4400 = vmatmul.mubr.bf16.vlgmr.msra.gmra.mrb[4].mxu1 %v1415_v31  ;;  %4393 = vmatprep.mubr.msk.bf16.mxu0 %vm5207_vm0, %v5206_v5  ;;  %v4681_v31 = vld [vmem:[#allocation8 + $0x74] ss:$8 sps:$4 sm:$0xff]  }
 0x2df   : > { %4405 = vmatprep.mubr.msk.bf16.mxu1 %vm5207_vm0, %v5206_v5 }
 0x311   : > { %v1303_v36 = vpop.f32.mrb[4].mxu0 }
 0x312   : > { %v1304_v37 = vadd.f32 %v1303_v36, %v696_v34  ;;  %v1305_v38 = vpop.f32.mrb[5].mxu0  ;;  %v4679_v34 = vld [vmem:[#allocation8 + $0x70] ss:$8 sps:$4 sm:$0xff]   ;;  %v4682_v36 = vld [vmem:[#allocation8 + $0x80] ss:$8 sps:$4 sm:$0xff]  }
 0x313   : > { %v1306_v39 = vadd.f32 %v1305_v38, %v700_v35  ;;  %v1307_v40 = vpop.f32.mrb[6].mxu0  ;;  %v4684_v35 = vld [vmem:[#allocation8 + $0x84] ss:$8 sps:$4 sm:$0xff]   ;;  %v4685_v38 = vld [vmem:[#allocation8 + $0x90] ss:$8 sps:$4 sm:$0xff]  }
 0x314   : > { %v1312_v41 = vpack.c.bf16 %v1304_v37, %v1304_v37  ;;  %v1308_v42 = vpop.f32.mrb[7].mxu0  ;;  %v4687_v37 = vld [vmem:[#allocation8 + $0x94] ss:$8 sps:$4 sm:$0xff]   ;;  %v4688_v40 = vld [vmem:[#allocation8 + $0xa0] ss:$8 sps:$4 sm:$0xff]  }
 0x315   : > { %v1417_v43 = vpack.c.bf16 %v1306_v39, %v1306_v39  ;;  %v4690_v39 = vld [vmem:[#allocation8 + $0xa4] ss:$8 sps:$4 sm:$0xff]   ;;  %v4691_v42 = vld [vmem:[#allocation8 + $0xb0] ss:$8 sps:$4 sm:$0xff]  }
 0x316   : > { %v1371_v44 = vsel %vm1369_vm1, %v1312_v41, 0  ;;  %v4693_v41 = vld [vmem:[#allocation8 + $0xb4] ss:$8 sps:$4 sm:$0xff]  }
 0x317   : > { %v1474_v45 = vsel %vm1369_vm1, %v1417_v43, 0  ;;  %4392 = vmatpush3.bf16.msra.mxu0 %v1371_v44  ;;  %v4696_v43 = vld [vmem:[#allocation8 + $0xc4] ss:$8 sps:$4 sm:$0xff]   ;;  %v4694_v44 = vld [vmem:[#allocation8 + $0xc0] ss:$8 sps:$4 sm:$0xff]  }
 0x318   : > { %4404 = vmatpush3.bf16.msra.mxu1 %v1474_v45  ;;  %v4699_v45 = vld [vmem:[#allocation8 + $0xd4] ss:$8 sps:$4 sm:$0xff]  }
 0x319   : > { %1730 = vmatprep.subr.bf16.mxu1 %v4660_v4 }
 0x3b0   : > { %v1347_v46 = vpop.f32.mrb[8].mxu0 }
 0x3b1   : > { %v4389_v47 = vpop.f32.mrb[9].mxu0  ;;  %v1452_v48 = vpop.f32.mrb[4].mxu1  ;;  %v1354_v49 = vsel %vm1353_vm2, %v1347_v46, -inf }
 0x3b2   : > { %v4401_v50 = vpop.f32.mrb[5].mxu1  ;;  %1355 = vmax.xlane.f32.xlu1 %v1354_v49  ;;  %v1350_v51 = vpop.f32.mrb[10].mxu0  ;;  %v1458_v55 = vsel %vm1353_vm2, %v1452_v48, -inf  ;;  %v4702_v47 = vld [vmem:[#allocation8 + $0xe4] ss:$8 sps:$4 sm:$0xff]  }
 0x3b3   : > { %v4390_v52 = vpop.f32.mrb[11].mxu0  ;;  %v1455_v53 = vpop.f32.mrb[6].mxu1  ;;  %v4705_v49 = vld [vmem:[#allocation8 + $0xf4] ss:$8 sps:$4 sm:$0xff]   ;;  %v4703_v50 = vld [vmem:[#allocation8 + $0xf0] ss:$8 sps:$4 sm:$0xff]  }
 0x3b4   : > { %v4402_v54 = vpop.f32.mrb[7].mxu1 }
 0x3b6   : > { %1459 = vmax.xlane.f32.xlu1 %v1458_v55 }
 0x43f   : > { %v1356_v56 = vpop.xlane.xlu1 %1355 }
 0x440   : > { %v1357_v57 = vsub.f32 %v1347_v46, %v1356_v56  ;;  %v4697_v46 = vld [vmem:[#allocation8 + $0xd0] ss:$8 sps:$4 sm:$0xff]  }
 0x442   : > { %v1358_v58 = vmul.f32 1.442695, %v1357_v57 }
 0x443   : > { %v1460_v59 = vpop.xlane.xlu1 %1459 }
 0x444   : > { %4902 = vpow2.f32 %v1358_v58  ;;  %v1461_v60 = vsub.f32 %v1452_v48, %v1460_v59  ;;  %v4700_v48 = vld [vmem:[#allocation8 + $0xe0] ss:$8 sps:$4 sm:$0xff]  }
 0x446   : > { %v1462_v61 = vmul.f32 1.442695, %v1461_v60 }
 0x448   : > { %4904 = vpow2.f32 %v1462_v61 }
 0x44e   : > { %v4903_v62 = vpop.eup %4902 }
 0x44f   : > { %v1360_v63 = vsel %vm1353_vm2, %v4903_v62, 0.0 }
 0x450   : > { %1361 = vadd.xlane.f32.xlu0 %v1360_v63 }
 0x452   : > { %v4905_v0 = vpop.eup %4904 }
 0x453   : > { %v1464_v3 = vsel %vm1353_vm2, %v4905_v0, 0.0 }
 0x454   : > { %1465 = vadd.xlane.f32.xlu1 %v1464_v3 }
 0x4dd   : > { %v1362_v5 = vpop.xlane.xlu0 %1361 }
 0x4de   : > { %4906 = vrcp.f32 %v1362_v5 }
 0x4e1   : > { %v1466_v7 = vpop.xlane.xlu1 %1465 }
 0x4e2   : > { %4908 = vrcp.f32 %v1466_v7 }
 0x4e8   : > { %v4907_v9 = vpop.eup %4906 }
 0x4e9   : > { %v1364_v10 = vmul.f32 %v4907_v9, %v4903_v62 }
 0x4eb   : > { %v1365_v11 = vpack.c.bf16 %v1364_v10, %v1364_v10 }
 0x4ec   : > { %v4909_v12 = vpop.eup %4908 }
 0x4ed   : > { %v1468_v13 = vmul.f32 %v4909_v12, %v4905_v0  ;;  %4394 = vmatmul.mubr.msk.bf16.vlgmr.msra.gmra.mrb[12].mxu0 %vm1353_vm2, %v1365_v11  ;;  %v1551_v0 = vld [vmem:[#allocation9] sm:$0x3] }
 0x4ee   : > { %v1556_v3 = vrot.slane %v1551_v0, %v5557_v20  ;;  %v1560_v4 = vrot.slane %v1551_v0, %v5554_v19 }
 0x4ef   : > { %v1469_v15 = vpack.c.bf16 %v1468_v13, %v1468_v13 }
 0x4f1   : > { %4406 = vmatmul.mubr.msk.bf16.vlgmr.msra.gmra.mrb[8].mxu1 %vm1353_vm2, %v1469_v15 }
 0x4f2   : > { %1731 = vmatpush1.bf16.msra.mxu1 %v4658_v14 }
 0x4f3   : > { %1732 = vmatprep.subr.bf16.mxu1 %v4663_v16  ;;  %v1819_v16 = vld [vmem:[#allocation11] sm:$0xff] }
 0x4f6   : > { %1733 = vmatpush1.bf16.msra.mxu1 %v4661_v17  ;;  %v1823_v17 = vld [vmem:[#allocation11 + $0x20] sm:$0xff] }
 0x4f7   : > { %1734 = vmatprep.subr.bf16.mxu1 %v4666_v21  ;;  %v1820_v21 = vld [vmem:[#allocation11 + $0x8] sm:$0xff] }
 0x4fa   : > { %1735 = vmatpush1.bf16.msra.mxu1 %v4664_v22  ;;  %v4104_v22 = vcombine.low %v1819_v16, %v1823_v17 }
 0x4fb   : > { %1736 = vmatprep.subr.bf16.mxu1 %v4669_v23  ;;  %v4105_v23 = vcombine.high %v1819_v16, %v1823_v17  ;;  %v1879_v16 = vld [vmem:[#allocation11 + $0x1e0] sm:$0xff]  ;;  %v1876_v17 = vld [vmem:[#allocation11 + $0x1c8] sm:$0xff] }
 0x4fd   : > { %2629 = vmatprep.subr.bf16.mxu0 %v4105_v23 }
 0x4fe   : > { %1737 = vmatpush1.bf16.msra.mxu1 %v4667_v24  ;;  %v1824_v24 = vld [vmem:[#allocation11 + $0x28] sm:$0xff]  ;;  %2630 = vmatpush1.bf16.msra.mxu0 %v4104_v22 }
 0x4ff   : > { %1738 = vmatprep.subr.bf16.mxu1 %v4672_v25  ;;  %v1827_v25 = vld [vmem:[#allocation11 + $0x40] sm:$0xff] }
 0x502   : > { %1739 = vmatpush1.bf16.msra.mxu1 %v4670_v26  ;;  %v1831_v26 = vld [vmem:[#allocation11 + $0x60] sm:$0xff] }
 0x503   : > { %1740 = vmatprep.subr.bf16.mxu1 %v4675_v27  ;;  %v4106_v27 = vcombine.low %v1820_v21, %v1824_v24 }
 0x506   : > { %1741 = vmatpush1.bf16.msra.mxu1 %v4673_v28  ;;  %v4107_v28 = vcombine.high %v1820_v21, %v1824_v24  ;;  %v1880_v21 = vld [vmem:[#allocation11 + $0x1e8] sm:$0xff] }
 0x507   : > { %1742 = vmatprep.subr.bf16.mxu1 %v4678_v29  ;;  %v1828_v29 = vld [vmem:[#allocation11 + $0x48] sm:$0xff] }
 0x50a   : > { %1743 = vmatpush1.bf16.msra.mxu1 %v4676_v30  ;;  %v1832_v30 = vld [vmem:[#allocation11 + $0x68] sm:$0xff] }
 0x50b   : > { %1744 = vmatprep.subr.bf16.mxu1 %v4681_v31  ;;  %v1835_v31 = vld [vmem:[#allocation11 + $0x80] sm:$0xff] }
 0x50e   : > { %1745 = vmatpush1.bf16.msra.mxu1 %v4679_v34  ;;  %v1839_v34 = vld [vmem:[#allocation11 + $0xa0] sm:$0xff] }
 0x50f   : > { %1746 = vmatprep.subr.bf16.mxu1 %v4684_v35  ;;  %v1836_v35 = vld [vmem:[#allocation11 + $0x88] sm:$0xff] }
 0x512   : > { %1747 = vmatpush1.bf16.msra.mxu1 %v4682_v36  ;;  %v1840_v36 = vld [vmem:[#allocation11 + $0xa8] sm:$0xff] }
 0x513   : > { %1748 = vmatprep.subr.bf16.mxu1 %v4687_v37  ;;  %v4112_v37 = vcombine.low %v1827_v25, %v1831_v26 }
 0x516   : > { %1749 = vmatpush1.bf16.msra.mxu1 %v4685_v38  ;;  %v4114_v38 = vcombine.low %v1828_v29, %v1832_v30 }
 0x517   : > { %1750 = vmatprep.subr.bf16.mxu1 %v4690_v39  ;;  %v4121_v39 = vcombine.high %v1835_v31, %v1839_v34 }
 0x51a   : > { %1751 = vmatpush1.bf16.msra.mxu1 %v4688_v40  ;;  %v4123_v40 = vcombine.high %v1836_v35, %v1840_v36 }
 0x51b   : > { %1752 = vmatprep.subr.bf16.mxu1 %v4693_v41  ;;  %v1843_v41 = vld [vmem:[#allocation11 + $0xc0] sm:$0xff] }
 0x51e   : > { %1753 = vmatpush1.bf16.msra.mxu1 %v4691_v42  ;;  %v1847_v42 = vld [vmem:[#allocation11 + $0xe0] sm:$0xff] }
 0x51f   : > { %1754 = vmatprep.subr.bf16.mxu1 %v4696_v43  ;;  %v1844_v43 = vld [vmem:[#allocation11 + $0xc8] sm:$0xff] }
 0x522   : > { %1755 = vmatpush1.bf16.msra.mxu1 %v4694_v44  ;;  %v1848_v44 = vld [vmem:[#allocation11 + $0xe8] sm:$0xff] }
 0x523   : > { %1756 = vmatprep.subr.bf16.mxu1 %v4699_v45  ;;  %v4120_v45 = vcombine.low %v1835_v31, %v1839_v34  ;;  %v1891_v34 = vld [vmem:[#allocation11 + $0x240] sm:$0xff] }
 0x526   : > { %1757 = vmatpush1.bf16.msra.mxu1 %v4697_v46  ;;  %v4122_v46 = vcombine.low %v1836_v35, %v1840_v36  ;;  %v1895_v35 = vld [vmem:[#allocation11 + $0x260] sm:$0xff]  ;;  %v1892_v36 = vld [vmem:[#allocation11 + $0x248] sm:$0xff] }
 0x527   : > { %1758 = vmatprep.subr.bf16.mxu1 %v4702_v47  ;;  %v4129_v47 = vcombine.high %v1843_v41, %v1847_v42 }
 0x52a   : > { %1759 = vmatpush1.bf16.msra.mxu1 %v4700_v48  ;;  %v4131_v48 = vcombine.high %v1844_v43, %v1848_v44 }
 0x52b   : > { %1760 = vmatprep.subr.bf16.mxu1 %v4705_v49  ;;  %v1851_v49 = vld [vmem:[#allocation11 + $0x100] sm:$0xff] }
 0x52e   : > { %1761 = vmatpush1.bf16.msra.mxu1 %v4703_v50  ;;  %v1855_v50 = vld [vmem:[#allocation11 + $0x120] sm:$0xff] }
 0x52f   : > { %2670 = vmatprep.subr.bf16.mxu1 %v4107_v28  ;;  %v1884_v28 = vld [vmem:[#allocation11 + $0x208] sm:$0xff] }
 0x5c0   : > { %v1407_v51 = vpop.f32.mrb[12].mxu0 }
 0x5c1   : > { %v1413_v52 = vpack.c.bf16 %v1407_v51, %v1407_v51  ;;  %v4395_v53 = vpop.f32.mrb[13].mxu0  ;;  %v1852_v51 = vld [vmem:[#allocation11 + $0x108] sm:$0xff] }
 0x5c2   : > { %v1410_v54 = vpop.f32.mrb[14].mxu0  ;;  %v4128_v53 = vcombine.low %v1843_v41, %v1847_v42  ;;  %v1899_v42 = vld [vmem:[#allocation11 + $0x280] sm:$0xff] }
 0x5c3   : > { %1414 = vst [vmem:[#allocation2] sm:$0xf] %v1413_v52  ;;  %v4396_v55 = vpop.f32.mrb[15].mxu0  ;;  %v1856_v52 = vld [vmem:[#allocation11 + $0x128] sm:$0xff]  ;;  %v4130_v54 = vcombine.low %v1844_v43, %v1848_v44  ;;  %v1903_v43 = vld [vmem:[#allocation11 + $0x2a0] sm:$0xff] }
 0x5c4   : > { %v1510_v56 = vpop.f32.mrb[8].mxu1  ;;  %v4137_v55 = vcombine.high %v1851_v49, %v1855_v50  ;;  %v1900_v44 = vld [vmem:[#allocation11 + $0x288] sm:$0xff] }
 0x5c5   : > { %v1516_v57 = vpack.c.bf16 %v1510_v56, %v1510_v56  ;;  %v4407_v58 = vpop.f32.mrb[9].mxu1  ;;  %v4139_v56 = vcombine.high %v1852_v51, %v1856_v52 }
 0x5c6   : > { %v1513_v59 = vpop.f32.mrb[10].mxu1  ;;  %v1863_v58 = vld [vmem:[#allocation11 + $0x160] sm:$0xff] }
 0x5c7   : > { %1517 = vst [vmem:[#allocation2 + $0x4] sm:$0xf] %v1516_v57  ;;  %v4408_v60 = vpop.f32.mrb[11].mxu1  ;;  %v1859_v57 = vld [vmem:[#allocation11 + $0x140] sm:$0xff]  ;;  %v1860_v59 = vld [vmem:[#allocation11 + $0x148] sm:$0xff] }
 0x5c8   : > { %v1864_v60 = vld [vmem:[#allocation11 + $0x168] sm:$0xff] }
 0x5c9   : > { %v4147_v0 = vcombine.high %v1860_v59, %v1864_v60 }
 0x5ce   : > { %v1518_v61 = vld [vmem:[#allocation2] sm:$0xff] }
 0x5cf   : > { %v4070_v62 = vcombine.low %v1518_v61, %v1518_v61  ;;  %v4071_v63 = vcombine.high %v1518_v61, %v1518_v61  ;;  %v4136_v61 = vcombine.low %v1851_v49, %v1855_v50  ;;  %v4184_v50 = vcombine.low %v1899_v42, %v1903_v43 }
 0x5d1   : > { %1762 = vmatprep.mubr.bf16.mxu1 %v4071_v63  ;;  %v4145_v63 = vcombine.high %v1859_v57, %v1863_v58 }
 0x5d2   : > { %1763 = vmatmul.mubr.bf16.vlgmr.msra.gmra.mrb[12].mxu1 %v4070_v62  ;;  %v4138_v62 = vcombine.low %v1852_v51, %v1856_v52 }
 0x5d3   : > { %2671 = vmatpush1.bf16.msra.mxu1 %v4106_v27  ;;  %v1887_v27 = vld [vmem:[#allocation11 + $0x220] sm:$0xff] }
 0x6a5   : > { %v1764_v5 = vpop.f32.mrb[12].mxu1 }
 0x6a6   : > { %v1765_v7 = vadd.f32 %v1764_v5, %v1556_v3  ;;  %v1766_v9 = vpop.f32.mrb[13].mxu1  ;;  %v1867_v3 = vld [vmem:[#allocation11 + $0x180] sm:$0xff]  ;;  %v1868_v5 = vld [vmem:[#allocation11 + $0x188] sm:$0xff] }
 0x6a7   : > { %v1767_v10 = vadd.f32 %v1766_v9, %v1560_v4  ;;  %v1768_v11 = vpop.f32.mrb[14].mxu1  ;;  %v1871_v4 = vld [vmem:[#allocation11 + $0x1a0] sm:$0xff]  ;;  %v4144_v9 = vcombine.low %v1859_v57, %v1863_v58 }
 0x6a8   : > { %v5606_v12 = vadd.f32 %v1765_v7, %v5535_v1  ;;  %v1769_v13 = vpop.f32.mrb[15].mxu1  ;;  %v4113_v1 = vcombine.high %v1827_v25, %v1831_v26  ;;  %v1872_v7 = vld [vmem:[#allocation11 + $0x1a8] sm:$0xff]  ;;  %v4153_v11 = vcombine.high %v1867_v3, %v1871_v4  ;;  %v4152_v22 = vcombine.low %v1867_v3, %v1871_v4  ;;  %v1883_v26 = vld [vmem:[#allocation11 + $0x200] sm:$0xff] }
 0x6a9   : > { %v5609_v14 = vadd.f32 %v1767_v10, %v5537_v2  ;;  %v4115_v2 = vcombine.high %v1828_v29, %v1832_v30  ;;  %v4146_v10 = vcombine.low %v1860_v59, %v1864_v60  ;;  %v4155_v13 = vcombine.high %v1868_v5, %v1872_v7  ;;  %v1907_v59 = vld [vmem:[#allocation11 + $0x2c0] sm:$0xff] }
 0x6aa   : > { %2631 = vmatprep.subr.bf16.mxu0 %v4113_v1  ;;  %v4154_v23 = vcombine.low %v1868_v5, %v1872_v7  ;;  %v4163_v25 = vcombine.high %v1876_v17, %v1880_v21  ;;  %v1888_v1 = vld [vmem:[#allocation11 + $0x228] sm:$0xff]  ;;  %v4162_v30 = vcombine.low %v1876_v17, %v1880_v21  ;;  %v4169_v31 = vcombine.high %v1883_v26, %v1887_v27  ;;  %v1911_v60 = vld [vmem:[#allocation11 + $0x2e0] sm:$0xff] }
 0x6ab   : > { %v1775_v15 = vadd.f32 %v5609_v14, %v5606_v12  ;;  %2672 = vmatprep.subr.bf16.mxu1 %v4115_v2  ;;  %2632 = vmatpush1.bf16.msra.mxu0 %v4112_v37  ;;  %v4171_v2 = vcombine.high %v1884_v28, %v1888_v1  ;;  %v1896_v37 = vld [vmem:[#allocation11 + $0x268] sm:$0xff]  ;;  %v1915_v5 = vld [vmem:[#allocation11 + $0x300] sm:$0xff] }
 0x6ac   : > { %2673 = vmatpush1.bf16.msra.mxu1 %v4114_v38  ;;  %2633 = vmatprep.subr.bf16.mxu0 %v4121_v39  ;;  %v4168_v38 = vcombine.low %v1883_v26, %v1887_v27  ;;  %v4170_v39 = vcombine.low %v1884_v28, %v1888_v1  ;;  %v4179_v41 = vcombine.high %v1892_v36, %v1896_v37  ;;  %v1919_v7 = vld [vmem:[#allocation11 + $0x320] sm:$0xff] }
 0x6ad   : > { %1776 = vadd.xlane.f32.xlu0 %v1775_v15  ;;  %2674 = vmatprep.subr.bf16.mxu1 %v4123_v40  ;;  %v1875_v15 = vld [vmem:[#allocation11 + $0x1c0] sm:$0xff]  ;;  %v4177_v40 = vcombine.high %v1891_v34, %v1895_v35 }
 0x6ae   : > { %v4161_v24 = vcombine.high %v1875_v15, %v1879_v16  ;;  %v4160_v29 = vcombine.low %v1875_v15, %v1879_v16  ;;  %v1923_v17 = vld [vmem:[#allocation11 + $0x340] sm:$0xff] }
 0x6af   : > { %2634 = vmatpush1.bf16.msra.mxu0 %v4120_v45  ;;  %v1904_v45 = vld [vmem:[#allocation11 + $0x2a8] sm:$0xff]  ;;  %v1927_v21 = vld [vmem:[#allocation11 + $0x360] sm:$0xff] }
 0x6b0   : > { %2675 = vmatpush1.bf16.msra.mxu1 %v4122_v46  ;;  %2635 = vmatprep.subr.bf16.mxu0 %v4129_v47  ;;  %v4176_v46 = vcombine.low %v1891_v34, %v1895_v35  ;;  %v4178_v47 = vcombine.low %v1892_v36, %v1896_v37  ;;  %v4187_v49 = vcombine.high %v1900_v44, %v1904_v45  ;;  %v1931_v28 = vld [vmem:[#allocation11 + $0x380] sm:$0xff] }
 0x6b1   : > { %2676 = vmatprep.subr.bf16.mxu1 %v4131_v48  ;;  %v4185_v48 = vcombine.high %v1899_v42, %v1903_v43  ;;  %v4186_v51 = vcombine.low %v1900_v44, %v1904_v45  ;;  %v1935_v1 = vld [vmem:[#allocation11 + $0x3a0] sm:$0xff]  ;;  %v1821_v44 = vld [vmem:[#allocation11 + $0x10] sm:$0xff] }
 0x6b2   : > { %v1939_v36 = vld [vmem:[#allocation11 + $0x3c0] sm:$0xff]  ;;  %v1825_v45 = vld [vmem:[#allocation11 + $0x30] sm:$0xff] }
 0x6b3   : > { %2636 = vmatpush1.bf16.msra.mxu0 %v4128_v53  ;;  %v1943_v37 = vld [vmem:[#allocation11 + $0x3e0] sm:$0xff] }
 0x6b4   : > { %2677 = vmatpush1.bf16.msra.mxu1 %v4130_v54  ;;  %2637 = vmatprep.subr.bf16.mxu0 %v4137_v55 }
 0x6b5   : > { %2678 = vmatprep.subr.bf16.mxu1 %v4139_v56 }
 0x6b7   : > { %2638 = vmatpush1.bf16.msra.mxu0 %v4136_v61  ;;  %v1908_v61 = vld [vmem:[#allocation11 + $0x2c8] sm:$0xff] }
 0x6b8   : > { %2679 = vmatpush1.bf16.msra.mxu1 %v4138_v62  ;;  %2639 = vmatprep.subr.bf16.mxu0 %v4145_v63  ;;  %v4193_v62 = vcombine.high %v1907_v59, %v1911_v60  ;;  %v1912_v63 = vld [vmem:[#allocation11 + $0x2e8] sm:$0xff] }
 0x6b9   : > { %2680 = vmatprep.subr.bf16.mxu1 %v4147_v0  ;;  %v4192_v0 = vcombine.low %v1907_v59, %v1911_v60  ;;  %v4194_v3 = vcombine.low %v1908_v61, %v1912_v63  ;;  %v4195_v4 = vcombine.high %v1908_v61, %v1912_v63 }
 0x6bb   : > { %2640 = vmatpush1.bf16.msra.mxu0 %v4144_v9  ;;  %v1916_v9 = vld [vmem:[#allocation11 + $0x308] sm:$0xff] }
 0x6bc   : > { %2681 = vmatpush1.bf16.msra.mxu1 %v4146_v10  ;;  %2641 = vmatprep.subr.bf16.mxu0 %v4153_v11  ;;  %v4201_v10 = vcombine.high %v1915_v5, %v1919_v7  ;;  %v1920_v11 = vld [vmem:[#allocation11 + $0x328] sm:$0xff] }
 0x6bd   : > { %2682 = vmatprep.subr.bf16.mxu1 %v4155_v13  ;;  %v4200_v13 = vcombine.low %v1915_v5, %v1919_v7  ;;  %v4202_v15 = vcombine.low %v1916_v9, %v1920_v11  ;;  %v4203_v16 = vcombine.high %v1916_v9, %v1920_v11  ;;  %v1833_v11 = vld [vmem:[#allocation11 + $0x70] sm:$0xff] }
 0x6bf   : > { %2642 = vmatpush1.bf16.msra.mxu0 %v4152_v22  ;;  %v1924_v22 = vld [vmem:[#allocation11 + $0x348] sm:$0xff] }
 0x6c0   : > { %2683 = vmatpush1.bf16.msra.mxu1 %v4154_v23  ;;  %2643 = vmatprep.subr.bf16.mxu0 %v4161_v24  ;;  %v4209_v23 = vcombine.high %v1923_v17, %v1927_v21  ;;  %v1928_v24 = vld [vmem:[#allocation11 + $0x368] sm:$0xff] }
 0x6c1   : > { %2684 = vmatprep.subr.bf16.mxu1 %v4163_v25  ;;  %v4208_v25 = vcombine.low %v1923_v17, %v1927_v21  ;;  %v4210_v26 = vcombine.low %v1924_v22, %v1928_v24  ;;  %v4211_v27 = vcombine.high %v1924_v22, %v1928_v24  ;;  %v1837_v21 = vld [vmem:[#allocation11 + $0x90] sm:$0xff]  ;;  %v1842_v24 = vld [vmem:[#allocation11 + $0xb8] sm:$0xff] }
 0x6c2   : > { %v1841_v22 = vld [vmem:[#allocation11 + $0xb0] sm:$0xff] }
 0x6c3   : > { %2644 = vmatpush1.bf16.msra.mxu0 %v4160_v29  ;;  %v1932_v29 = vld [vmem:[#allocation11 + $0x388] sm:$0xff] }
 0x6c4   : > { %2685 = vmatpush1.bf16.msra.mxu1 %v4162_v30  ;;  %2645 = vmatprep.subr.bf16.mxu0 %v4169_v31  ;;  %v4217_v30 = vcombine.high %v1931_v28, %v1935_v1  ;;  %v1936_v31 = vld [vmem:[#allocation11 + $0x3a8] sm:$0xff] }
 0x6c5   : > { %2686 = vmatprep.subr.bf16.mxu1 %v4171_v2  ;;  %v4216_v2 = vcombine.low %v1931_v28, %v1935_v1  ;;  %v4218_v34 = vcombine.low %v1932_v29, %v1936_v31  ;;  %v4219_v35 = vcombine.high %v1932_v29, %v1936_v31  ;;  %v1845_v1 = vld [vmem:[#allocation11 + $0xd0] sm:$0xff]  ;;  %v1850_v31 = vld [vmem:[#allocation11 + $0xf8] sm:$0xff] }
 0x6c6   : > { %v1849_v29 = vld [vmem:[#allocation11 + $0xf0] sm:$0xff] }
 0x6c7   : > { %2646 = vmatpush1.bf16.msra.mxu0 %v4168_v38  ;;  %v1940_v38 = vld [vmem:[#allocation11 + $0x3c8] sm:$0xff] }
 0x6c8   : > { %2687 = vmatpush1.bf16.msra.mxu1 %v4170_v39  ;;  %2647 = vmatprep.subr.bf16.mxu0 %v4177_v40  ;;  %v4225_v39 = vcombine.high %v1939_v36, %v1943_v37  ;;  %v1944_v40 = vld [vmem:[#allocation11 + $0x3e8] sm:$0xff] }
 0x6c9   : > { %2688 = vmatprep.subr.bf16.mxu1 %v4179_v41  ;;  %v4224_v41 = vcombine.low %v1939_v36, %v1943_v37  ;;  %v4227_v42 = vcombine.high %v1940_v38, %v1944_v40  ;;  %v4226_v43 = vcombine.low %v1940_v38, %v1944_v40  ;;  %v1853_v37 = vld [vmem:[#allocation11 + $0x110] sm:$0xff]  ;;  %v1858_v40 = vld [vmem:[#allocation11 + $0x138] sm:$0xff] }
 0x6ca   : > { %v1857_v38 = vld [vmem:[#allocation11 + $0x130] sm:$0xff] }
 0x6cb   : > { %2648 = vmatpush1.bf16.msra.mxu0 %v4176_v46  ;;  %v1822_v46 = vld [vmem:[#allocation11 + $0x18] sm:$0xff] }
 0x6cc   : > { %2689 = vmatpush1.bf16.msra.mxu1 %v4178_v47  ;;  %2649 = vmatprep.subr.bf16.mxu0 %v4185_v48  ;;  %v4109_v47 = vcombine.high %v1821_v44, %v1825_v45  ;;  %v1826_v48 = vld [vmem:[#allocation11 + $0x38] sm:$0xff] }
 0x6cd   : > { %2690 = vmatprep.subr.bf16.mxu1 %v4187_v49  ;;  %v4108_v49 = vcombine.low %v1821_v44, %v1825_v45  ;;  %v1861_v45 = vld [vmem:[#allocation11 + $0x150] sm:$0xff] }
 0x6cf   : > { %2650 = vmatpush1.bf16.msra.mxu0 %v4184_v50  ;;  %v4110_v50 = vcombine.low %v1822_v46, %v1826_v48 }
 0x6d0   : > { %2691 = vmatpush1.bf16.msra.mxu1 %v4186_v51  ;;  %2651 = vmatprep.subr.bf16.mxu0 %v4193_v62  ;;  %v4111_v51 = vcombine.high %v1822_v46, %v1826_v48  ;;  %v1865_v46 = vld [vmem:[#allocation11 + $0x170] sm:$0xff]  ;;  %v1866_v48 = vld [vmem:[#allocation11 + $0x178] sm:$0xff] }
 0x6d1   : > { %2692 = vmatprep.subr.bf16.mxu1 %v4195_v4 }
 0x6d3   : > { %2652 = vmatpush1.bf16.msra.mxu0 %v4192_v0 }
 0x6d4   : > { %2693 = vmatpush1.bf16.msra.mxu1 %v4194_v3  ;;  %2653 = vmatprep.subr.bf16.mxu0 %v4201_v10  ;;  %v1829_v10 = vld [vmem:[#allocation11 + $0x50] sm:$0xff] }
 0x6d5   : > { %2694 = vmatprep.subr.bf16.mxu1 %v4203_v16 }
 0x6d7   : > { %2654 = vmatpush1.bf16.msra.mxu0 %v4200_v13  ;;  %v1830_v13 = vld [vmem:[#allocation11 + $0x58] sm:$0xff] }
 0x6d8   : > { %2695 = vmatpush1.bf16.msra.mxu1 %v4202_v15  ;;  %2655 = vmatprep.subr.bf16.mxu0 %v4209_v23  ;;  %v1834_v15 = vld [vmem:[#allocation11 + $0x78] sm:$0xff] }
 0x6d9   : > { %2696 = vmatprep.subr.bf16.mxu1 %v4211_v27  ;;  %v1838_v23 = vld [vmem:[#allocation11 + $0x98] sm:$0xff]  ;;  %v4125_v27 = vcombine.high %v1837_v21, %v1841_v22 }
 0x6da   : > { %v4127_v28 = vcombine.high %v1838_v23, %v1842_v24 }
 0x6db   : > { %2656 = vmatpush1.bf16.msra.mxu0 %v4208_v25  ;;  %v4116_v25 = vcombine.low %v1829_v10, %v1833_v11 }
 0x6dc   : > { %2697 = vmatpush1.bf16.msra.mxu1 %v4210_v26  ;;  %2657 = vmatprep.subr.bf16.mxu0 %v4217_v30  ;;  %v4118_v26 = vcombine.low %v1830_v13, %v1834_v15  ;;  %v1846_v30 = vld [vmem:[#allocation11 + $0xd8] sm:$0xff] }
 0x6dd   : > { %2698 = vmatprep.subr.bf16.mxu1 %v4219_v35  ;;  %v4133_v35 = vcombine.high %v1845_v1, %v1849_v29  ;;  %v4135_v36 = vcombine.high %v1846_v30, %v1850_v31 }
 0x6df   : > { %2658 = vmatpush1.bf16.msra.mxu0 %v4216_v2  ;;  %v4124_v2 = vcombine.low %v1837_v21, %v1841_v22 }
 0x6e0   : > { %2699 = vmatpush1.bf16.msra.mxu1 %v4218_v34  ;;  %2659 = vmatprep.subr.bf16.mxu0 %v4225_v39  ;;  %v4126_v34 = vcombine.low %v1838_v23, %v1842_v24  ;;  %v1854_v39 = vld [vmem:[#allocation11 + $0x118] sm:$0xff]  ;;  %v1893_v23 = vld [vmem:[#allocation11 + $0x250] sm:$0xff] }
 0x6e1   : > { %2700 = vmatprep.subr.bf16.mxu1 %v4227_v42  ;;  %v4134_v42 = vcombine.low %v1846_v30, %v1850_v31  ;;  %v4143_v44 = vcombine.high %v1854_v39, %v1858_v40  ;;  %v1897_v24 = vld [vmem:[#allocation11 + $0x270] sm:$0xff] }
 0x6e2   : > { %v1901_v30 = vld [vmem:[#allocation11 + $0x290] sm:$0xff] }
 0x6e3   : > { %2660 = vmatpush1.bf16.msra.mxu0 %v4224_v41  ;;  %v4132_v41 = vcombine.low %v1845_v1, %v1849_v29  ;;  %v4181_v1 = vcombine.high %v1893_v23, %v1897_v24  ;;  %v1905_v31 = vld [vmem:[#allocation11 + $0x2b0] sm:$0xff] }
 0x6e4   : > { %2701 = vmatpush1.bf16.msra.mxu1 %v4226_v43  ;;  %2711 = vmatprep.subr.bf16.mxu0 %v4109_v47  ;;  %v4141_v43 = vcombine.high %v1853_v37, %v1857_v38  ;;  %v1862_v47 = vld [vmem:[#allocation11 + $0x158] sm:$0xff] }
 0x6e5   : > { %2752 = vmatprep.subr.bf16.mxu1 %v4111_v51  ;;  %v4149_v51 = vcombine.high %v1861_v45, %v1865_v46 }
 0x73a   : > { %v1777_v52 = vpop.xlane.xlu0 %1776 }
 0x73b   : > { %v1778_v53 = vmul.f32 0.00390625, %v1777_v52 }
 0x73d   : > { %v5614_v54 = vsub.f32 %v5606_v12, %v1778_v53  ;;  %v5617_v55 = vsub.f32 %v5609_v14, %v1778_v53 }
 0x73f   : > { %v1781_v56 = vmul.f32 %v5614_v54, %v5614_v54  ;;  %v1782_v57 = vmul.f32 %v5617_v55, %v5617_v55 }
 0x741   : > { %v1783_v58 = vadd.f32 %v1782_v57, %v1781_v56  ;;  %v1773_v57 = vld [vmem:[%s5781_s30] sm:$0x3]  ;;  %s527_s30 = scalar_lea.vmem [#allocation14], %s3965_s11  ;;  %s5118_s11 = sshll.u32 %s5208_s14, 4  ;;  %s5119_s11 = int_to_ptr.vmem [resolvable:$false] %s5118_s11 }
 0x742   : > { %v1799_v59 = vrot.slane %v1773_v57, %v5554_v19  ;;  %v1795_v60 = vrot.slane %v1773_v57, %v5557_v20  ;;  %v1870_v57 = vld [vmem:[#allocation11 + $0x198] sm:$0xff]  ;;  %s3835_s19 = sshll.u32 %s527_s30, 4  ;;  %s5120_s10 = scalar_lea.vmem %s5119_s11, 256  ;;  %s5697_s19 = int_to_ptr.vmem [resolvable:$true] %s3835_s19 }
 0x743   : > { %1784 = vadd.xlane.f32.xlu1 %v1783_v58  ;;  %v1774_v58 = vld [vmem:[%s5782_s15] sm:$0x3]  ;;  %s5114_s18 = scalar_lea.vmem %s5697_s19, 128  ;;  %p5121_p13 = scmp.lt.s32.totalorder %s5697_s19, %s5119_s11 }
 0x744   : > { %v1812_v0 = vrot.slane %v1774_v58, %v5554_v19  ;;  %v1808_v3 = vrot.slane %v1774_v58, %v5557_v20  ;;  %v1874_v58 = vld [vmem:[#allocation11 + $0x1b8] sm:$0xff]  ;;  %p5115_p7 = scmp.ne.s32.totalorder %s5697_s19, %s5114_s18  ;;  %p5122_p0 = scmp.lt.s32.totalorder %s5120_s10, %s5114_s18 }
 0x746   : > { %p5116_p12 = pnand %p5115_p7, %p5786_p4  ;;  %p5123_p2 = por %p5122_p0, %p5121_p13 }
 0x748   : > { %p5117_p1 = pneg %p5116_p12 }
 0x74a   : > { %p5124_p3 = pnand %p5123_p2, %p5117_p1 }
 0x7d0   : > { %v1785_v52 = vpop.xlane.xlu1 %1784 }
 0x7d1   : > { %v1786_v53 = vmul.f32 0.00390625, %v1785_v52  ;;  %v4151_v52 = vcombine.high %v1862_v47, %v1866_v48 }
 0x7d3   : > { %v1787_v56 = vadd.f32 1e-05, %v1786_v53  ;;  %v1869_v53 = vld [vmem:[#allocation11 + $0x190] sm:$0xff] }
 0x7d5   : > { %4910 = vrsqrt.f32 %v1787_v56  ;;  %v1873_v56 = vld [vmem:[#allocation11 + $0x1b0] sm:$0xff] }
 0x7df   : > { %v4911_v61 = vpop.eup %4910 }
 0x7e0   : > { %v1789_v62 = vmul.f32 %v4911_v61, %v5614_v54  ;;  %v1790_v63 = vmul.f32 %v4911_v61, %v5617_v55  ;;  %v4117_v54 = vcombine.high %v1829_v10, %v1833_v11  ;;  %v4119_v55 = vcombine.high %v1830_v13, %v1834_v15  ;;  %v1885_v11 = vld [vmem:[#allocation11 + $0x210] sm:$0xff]  ;;  %v1886_v15 = vld [vmem:[#allocation11 + $0x218] sm:$0xff] }
 0x7e1   : > { %v4157_v61 = vcombine.high %v1869_v53, %v1873_v56  ;;  %v1889_v13 = vld [vmem:[#allocation11 + $0x230] sm:$0xff] }
 0x7e2   : > { %v1803_v4 = vmul.f32 %v1799_v59, %v1790_v63  ;;  %v1802_v5 = vmul.f32 %v1795_v60, %v1789_v62  ;;  %v4148_v59 = vcombine.low %v1861_v45, %v1865_v46  ;;  %v4150_v60 = vcombine.low %v1862_v47, %v1866_v48  ;;  %v1877_v63 = vld [vmem:[#allocation11 + $0x1d0] sm:$0xff] }
 0x7e3   : > { %v4159_v62 = vcombine.high %v1870_v57, %v1874_v58  ;;  %v1917_v47 = vld [vmem:[#allocation11 + $0x310] sm:$0xff] }
 0x7e4   : > { %v1816_v7 = vadd.f32 %v1812_v0, %v1803_v4  ;;  %v1815_v9 = vadd.f32 %v1808_v3, %v1802_v5  ;;  %v1881_v0 = vld [vmem:[#allocation11 + $0x1f0] sm:$0xff]  ;;  %v1878_v3 = vld [vmem:[#allocation11 + $0x1d8] sm:$0xff]  ;;  %v4156_v5 = vcombine.low %v1869_v53, %v1873_v56 }
 0x7e5   : > { %v1882_v4 = vld [vmem:[#allocation11 + $0x1f8] sm:$0xff]  ;;  %v4164_v21 = vcombine.low %v1877_v63, %v1881_v0  ;;  %v1921_v48 = vld [vmem:[#allocation11 + $0x330] sm:$0xff] }
 0x7e6   : > { %v1818_v16 = vpack.c.bf16 %v1816_v7, %v1816_v7  ;;  %v5635_v17 = vpack.c.bf16 %v1815_v9, %v1815_v9  ;;  %v4158_v7 = vcombine.low %v1870_v57, %v1874_v58  ;;  %v4165_v9 = vcombine.high %v1877_v63, %v1881_v0  ;;  %v1925_v57 = vld [vmem:[#allocation11 + $0x350] sm:$0xff] }
 0x7e7   : > { %v4167_v10 = vcombine.high %v1878_v3, %v1882_v4  ;;  %v4205_v53 = vcombine.high %v1917_v47, %v1921_v48  ;;  %v1929_v58 = vld [vmem:[#allocation11 + $0x370] sm:$0xff] }
 0x7e8   : > { %2661 = vmatprep.mubr.bf16.mxu0 %v1818_v16  ;;  %2702 = vmatprep.mubr.bf16.mxu1 %v1818_v16  ;;  %v4213_v63 = vcombine.high %v1925_v57, %v1929_v58 }
 0x7e9   : > { %2662 = vmatmul.mubr.bf16.vlgmr.msra.gmra.mrb[16].mxu0 %v5635_v17  ;;  %2703 = vmatmul.mubr.bf16.vlgmr.msra.gmra.mrb[16].mxu1 %v5635_v17 }
 0x7ea   : > { %2712 = vmatpush1.bf16.msra.mxu0 %v4108_v49  ;;  %2753 = vmatpush1.bf16.msra.mxu1 %v4110_v50  ;;  %v4140_v49 = vcombine.low %v1853_v37, %v1857_v38  ;;  %v4142_v50 = vcombine.low %v1854_v39, %v1858_v40  ;;  %v4189_v37 = vcombine.high %v1901_v30, %v1905_v31  ;;  %v1909_v39 = vld [vmem:[#allocation11 + $0x2d0] sm:$0xff] }
 0x7eb   : > { %2743 = vmatprep.mubr.bf16.mxu0 %v1818_v16  ;;  %2784 = vmatprep.mubr.bf16.mxu1 %v1818_v16  ;;  %v1890_v16 = vld [vmem:[#allocation11 + $0x238] sm:$0xff]  ;;  %v1913_v40 = vld [vmem:[#allocation11 + $0x2f0] sm:$0xff] }
 0x7ec   : > { %2713 = vmatprep.subr.bf16.mxu0 %v4117_v54  ;;  %2754 = vmatprep.subr.bf16.mxu1 %v4119_v55  ;;  %v4166_v54 = vcombine.low %v1878_v3, %v1882_v4  ;;  %v4173_v55 = vcombine.high %v1885_v11, %v1889_v13  ;;  %v4175_v22 = vcombine.high %v1886_v15, %v1890_v16  ;;  %v1933_v3 = vld [vmem:[#allocation11 + $0x390] sm:$0xff] }
 0x7ed   : > { %v4197_v45 = vcombine.high %v1909_v39, %v1913_v40  ;;  %v1937_v4 = vld [vmem:[#allocation11 + $0x3b0] sm:$0xff] }
 0x7ee   : > { %2714 = vmatpush1.bf16.msra.mxu0 %v4116_v25  ;;  %2755 = vmatpush1.bf16.msra.mxu1 %v4118_v26  ;;  %v1894_v25 = vld [vmem:[#allocation11 + $0x258] sm:$0xff] }
 0x7ef   : > { %2715 = vmatprep.subr.bf16.mxu0 %v4125_v27  ;;  %2756 = vmatprep.subr.bf16.mxu1 %v4127_v28  ;;  %v1898_v26 = vld [vmem:[#allocation11 + $0x278] sm:$0xff]  ;;  %v4172_v27 = vcombine.low %v1885_v11, %v1889_v13  ;;  %v4174_v28 = vcombine.low %v1886_v15, %v1890_v16  ;;  %v4221_v11 = vcombine.high %v1933_v3, %v1937_v4  ;;  %v1941_v15 = vld [vmem:[#allocation11 + $0x3d0] sm:$0xff] }
 0x7f0   : > { %v4183_v29 = vcombine.high %v1894_v25, %v1898_v26  ;;  %v1945_v16 = vld [vmem:[#allocation11 + $0x3f0] sm:$0xff] }
 0x7f2   : > { %2716 = vmatpush1.bf16.msra.mxu0 %v4124_v2  ;;  %2757 = vmatpush1.bf16.msra.mxu1 %v4126_v34  ;;  %v1902_v2 = vld [vmem:[#allocation11 + $0x298] sm:$0xff] }
 0x7f3   : > { %2717 = vmatprep.subr.bf16.mxu0 %v4133_v35  ;;  %2758 = vmatprep.subr.bf16.mxu1 %v4135_v36  ;;  %v1906_v34 = vld [vmem:[#allocation11 + $0x2b8] sm:$0xff]  ;;  %v4180_v35 = vcombine.low %v1893_v23, %v1897_v24  ;;  %v4182_v36 = vcombine.low %v1894_v25, %v1898_v26  ;;  %v4229_v23 = vcombine.high %v1941_v15, %v1945_v16 }
 0x7f4   : > { %v4191_v38 = vcombine.high %v1902_v2, %v1906_v34  ;;  %v4228_v25 = vcombine.low %v1941_v15, %v1945_v16  ;;  %v4779_v15 = vld [vmem:[#allocation12 + $0x1b4] ss:$8 sps:$4 sm:$0xff]   ;;  %v4774_v16 = vld [vmem:[#allocation12 + $0xb0] ss:$8 sps:$4 sm:$0xff]  }
 0x7f6   : > { %2718 = vmatpush1.bf16.msra.mxu0 %v4132_v41  ;;  %2759 = vmatpush1.bf16.msra.mxu1 %v4134_v42  ;;  %v1910_v41 = vld [vmem:[#allocation11 + $0x2d8] sm:$0xff] }
 0x7f7   : > { %2719 = vmatprep.subr.bf16.mxu0 %v4141_v43  ;;  %2760 = vmatprep.subr.bf16.mxu1 %v4143_v44  ;;  %v1914_v42 = vld [vmem:[#allocation11 + $0x2f8] sm:$0xff]  ;;  %v4188_v43 = vcombine.low %v1901_v30, %v1905_v31  ;;  %v4190_v44 = vcombine.low %v1902_v2, %v1906_v34 }
 0x7f8   : > { %v4199_v46 = vcombine.high %v1910_v41, %v1914_v42  ;;  %v4716_v30 = vld [vmem:[#allocation12 + $0x14] ss:$8 sps:$4 sm:$0xff]   ;;  %v4714_v2 = vld [vmem:[#allocation12 + $0x10] ss:$8 sps:$4 sm:$0xff]  }
 0x7f9   : > { %v4719_v31 = vld [vmem:[#allocation12 + $0x114] ss:$8 sps:$4 sm:$0xff]   ;;  %v4717_v34 = vld [vmem:[#allocation12 + $0x110] ss:$8 sps:$4 sm:$0xff]  }
 0x7fa   : > { %2720 = vmatpush1.bf16.msra.mxu0 %v4140_v49  ;;  %2761 = vmatpush1.bf16.msra.mxu1 %v4142_v50  ;;  %v1918_v49 = vld [vmem:[#allocation11 + $0x318] sm:$0xff] }
 0x7fb   : > { %2721 = vmatprep.subr.bf16.mxu0 %v4149_v51  ;;  %2762 = vmatprep.subr.bf16.mxu1 %v4151_v52  ;;  %v1922_v50 = vld [vmem:[#allocation11 + $0x338] sm:$0xff]  ;;  %v4196_v51 = vcombine.low %v1909_v39, %v1913_v40  ;;  %v4198_v52 = vcombine.low %v1910_v41, %v1914_v42  ;;  %v4734_v42 = vld [vmem:[#allocation12 + $0x44] ss:$8 sps:$4 sm:$0xff]  }
 0x7fc   : > { %v4207_v56 = vcombine.high %v1918_v49, %v1922_v50  ;;  %v4728_v39 = vld [vmem:[#allocation12 + $0x34] ss:$8 sps:$4 sm:$0xff]   ;;  %v4726_v41 = vld [vmem:[#allocation12 + $0x30] ss:$8 sps:$4 sm:$0xff]  }
 0x7fd   : > { %v4731_v40 = vld [vmem:[#allocation12 + $0x134] ss:$8 sps:$4 sm:$0xff]  }
 0x7fe   : > { %2722 = vmatpush1.bf16.msra.mxu0 %v4148_v59  ;;  %2763 = vmatpush1.bf16.msra.mxu1 %v4150_v60  ;;  %v1926_v59 = vld [vmem:[#allocation11 + $0x358] sm:$0xff] }
 0x7ff   : > { %2723 = vmatprep.subr.bf16.mxu0 %v4157_v61  ;;  %2764 = vmatprep.subr.bf16.mxu1 %v4159_v62  ;;  %v1930_v60 = vld [vmem:[#allocation11 + $0x378] sm:$0xff]  ;;  %v4204_v61 = vcombine.low %v1917_v47, %v1921_v48  ;;  %v4206_v62 = vcombine.low %v1918_v49, %v1922_v50  ;;  %v4746_v50 = vld [vmem:[#allocation12 + $0x64] ss:$8 sps:$4 sm:$0xff]  }
 0x800   : > { %v4215_v0 = vcombine.high %v1926_v59, %v1930_v60  ;;  %v4743_v47 = vld [vmem:[#allocation12 + $0x154] ss:$8 sps:$4 sm:$0xff]   ;;  %v4738_v48 = vld [vmem:[#allocation12 + $0x50] ss:$8 sps:$4 sm:$0xff]  }
 0x801   : > { %v4741_v49 = vld [vmem:[#allocation12 + $0x150] ss:$8 sps:$4 sm:$0xff]  }
 0x802   : > { %2724 = vmatpush1.bf16.msra.mxu0 %v4156_v5  ;;  %2765 = vmatpush1.bf16.msra.mxu1 %v4158_v7  ;;  %v1934_v5 = vld [vmem:[#allocation11 + $0x398] sm:$0xff] }
 0x803   : > { %2725 = vmatprep.subr.bf16.mxu0 %v4165_v9  ;;  %2766 = vmatprep.subr.bf16.mxu1 %v4167_v10  ;;  %v1938_v7 = vld [vmem:[#allocation11 + $0x3b8] sm:$0xff]  ;;  %v4212_v9 = vcombine.low %v1925_v57, %v1929_v58  ;;  %v4214_v10 = vcombine.low %v1926_v59, %v1930_v60  ;;  %v4758_v60 = vld [vmem:[#allocation12 + $0x84] ss:$8 sps:$4 sm:$0xff]  }
 0x804   : > { %v4223_v13 = vcombine.high %v1934_v5, %v1938_v7  ;;  %v4755_v57 = vld [vmem:[#allocation12 + $0x174] ss:$8 sps:$4 sm:$0xff]   ;;  %v4750_v58 = vld [vmem:[#allocation12 + $0x70] ss:$8 sps:$4 sm:$0xff]  }
 0x805   : > { %v4753_v59 = vld [vmem:[#allocation12 + $0x170] ss:$8 sps:$4 sm:$0xff]  }
 0x806   : > { %2726 = vmatpush1.bf16.msra.mxu0 %v4164_v21  ;;  %2767 = vmatpush1.bf16.msra.mxu1 %v4166_v54  ;;  %v1942_v21 = vld [vmem:[#allocation11 + $0x3d8] sm:$0xff] }
 0x807   : > { %2727 = vmatprep.subr.bf16.mxu0 %v4173_v55  ;;  %2768 = vmatprep.subr.bf16.mxu1 %v4175_v22  ;;  %v1946_v54 = vld [vmem:[#allocation11 + $0x3f8] sm:$0xff]  ;;  %v4220_v55 = vcombine.low %v1933_v3, %v1937_v4  ;;  %v4222_v22 = vcombine.low %v1934_v5, %v1938_v7  ;;  %v4770_v7 = vld [vmem:[#allocation12 + $0xa4] ss:$8 sps:$4 sm:$0xff]  }
 0x808   : > { %v4231_v24 = vcombine.high %v1942_v21, %v1946_v54  ;;  %v4230_v26 = vcombine.low %v1942_v21, %v1946_v54  ;;  %v4767_v3 = vld [vmem:[#allocation12 + $0x194] ss:$8 sps:$4 sm:$0xff]   ;;  %v4762_v4 = vld [vmem:[#allocation12 + $0x90] ss:$8 sps:$4 sm:$0xff]   ;;  %v4782_v54 = vld [vmem:[#allocation12 + $0xc4] ss:$8 sps:$4 sm:$0xff]  }
 0x809   : > { %v4765_v5 = vld [vmem:[#allocation12 + $0x190] ss:$8 sps:$4 sm:$0xff]  }
 0x80a   : > { %2728 = vmatpush1.bf16.msra.mxu0 %v4172_v27  ;;  %2769 = vmatpush1.bf16.msra.mxu1 %v4174_v28  ;;  %v4710_v27 = vld [vmem:[#allocation12 + $0x4] ss:$8 sps:$4 sm:$0xff]   ;;  %v4777_v21 = vld [vmem:[#allocation12 + $0x1b0] ss:$8 sps:$4 sm:$0xff]  }
 0x80b   : > { %2729 = vmatprep.subr.bf16.mxu0 %v4181_v1  ;;  %2770 = vmatprep.subr.bf16.mxu1 %v4183_v29  ;;  %v4713_v28 = vld [vmem:[#allocation12 + $0x104] ss:$8 sps:$4 sm:$0xff]   ;;  %v4708_v1 = vld [vmem:[#allocation12] ss:$8 sps:$4 sm:$0xff]  }
 0x80c   : > { %v4711_v29 = vld [vmem:[#allocation12 + $0x100] ss:$8 sps:$4 sm:$0xff]  }
 0x80e   : > { %2730 = vmatpush1.bf16.msra.mxu0 %v4180_v35  ;;  %2771 = vmatpush1.bf16.msra.mxu1 %v4182_v36  ;;  %v4722_v35 = vld [vmem:[#allocation12 + $0x24] ss:$8 sps:$4 sm:$0xff]  }
 0x80f   : > { %2731 = vmatprep.subr.bf16.mxu0 %v4189_v37  ;;  %2772 = vmatprep.subr.bf16.mxu1 %v4191_v38  ;;  %v4725_v36 = vld [vmem:[#allocation12 + $0x124] ss:$8 sps:$4 sm:$0xff]   ;;  %v4720_v37 = vld [vmem:[#allocation12 + $0x20] ss:$8 sps:$4 sm:$0xff]  }
 0x810   : > { %v4723_v38 = vld [vmem:[#allocation12 + $0x120] ss:$8 sps:$4 sm:$0xff]  }
 0x812   : > { %2732 = vmatpush1.bf16.msra.mxu0 %v4188_v43  ;;  %2773 = vmatpush1.bf16.msra.mxu1 %v4190_v44  ;;  %v4737_v43 = vld [vmem:[#allocation12 + $0x144] ss:$8 sps:$4 sm:$0xff]   ;;  %v4732_v44 = vld [vmem:[#allocation12 + $0x40] ss:$8 sps:$4 sm:$0xff]  }
 0x813   : > { %2733 = vmatprep.subr.bf16.mxu0 %v4197_v45  ;;  %2774 = vmatprep.subr.bf16.mxu1 %v4199_v46  ;;  %v4735_v45 = vld [vmem:[#allocation12 + $0x140] ss:$8 sps:$4 sm:$0xff]   ;;  %v4740_v46 = vld [vmem:[#allocation12 + $0x54] ss:$8 sps:$4 sm:$0xff]  }
 0x816   : > { %2734 = vmatpush1.bf16.msra.mxu0 %v4196_v51  ;;  %2775 = vmatpush1.bf16.msra.mxu1 %v4198_v52  ;;  %v4749_v51 = vld [vmem:[#allocation12 + $0x164] ss:$8 sps:$4 sm:$0xff]   ;;  %v4744_v52 = vld [vmem:[#allocation12 + $0x60] ss:$8 sps:$4 sm:$0xff]  }
 0x817   : > { %2735 = vmatprep.subr.bf16.mxu0 %v4205_v53  ;;  %2776 = vmatprep.subr.bf16.mxu1 %v4207_v56  ;;  %v4747_v53 = vld [vmem:[#allocation12 + $0x160] ss:$8 sps:$4 sm:$0xff]   ;;  %v4752_v56 = vld [vmem:[#allocation12 + $0x74] ss:$8 sps:$4 sm:$0xff]  }
 0x81a   : > { %2736 = vmatpush1.bf16.msra.mxu0 %v4204_v61  ;;  %2777 = vmatpush1.bf16.msra.mxu1 %v4206_v62  ;;  %v4761_v61 = vld [vmem:[#allocation12 + $0x184] ss:$8 sps:$4 sm:$0xff]   ;;  %v4756_v62 = vld [vmem:[#allocation12 + $0x80] ss:$8 sps:$4 sm:$0xff]  }
 0x81b   : > { %2737 = vmatprep.subr.bf16.mxu0 %v4213_v63  ;;  %2778 = vmatprep.subr.bf16.mxu1 %v4215_v0  ;;  %v4759_v63 = vld [vmem:[#allocation12 + $0x180] ss:$8 sps:$4 sm:$0xff]   ;;  %v4764_v0 = vld [vmem:[#allocation12 + $0x94] ss:$8 sps:$4 sm:$0xff]  }
 0x81e   : > { %2738 = vmatpush1.bf16.msra.mxu0 %v4212_v9  ;;  %2779 = vmatpush1.bf16.msra.mxu1 %v4214_v10  ;;  %v4773_v9 = vld [vmem:[#allocation12 + $0x1a4] ss:$8 sps:$4 sm:$0xff]   ;;  %v4768_v10 = vld [vmem:[#allocation12 + $0xa0] ss:$8 sps:$4 sm:$0xff]  }
 0x81f   : > { %2739 = vmatprep.subr.bf16.mxu0 %v4221_v11  ;;  %2780 = vmatprep.subr.bf16.mxu1 %v4223_v13  ;;  %v4771_v11 = vld [vmem:[#allocation12 + $0x1a0] ss:$8 sps:$4 sm:$0xff]   ;;  %v4776_v13 = vld [vmem:[#allocation12 + $0xb4] ss:$8 sps:$4 sm:$0xff]  }
 0x822   : > { %2740 = vmatpush1.bf16.msra.mxu0 %v4220_v55  ;;  %2781 = vmatpush1.bf16.msra.mxu1 %v4222_v22  ;;  %v4785_v55 = vld [vmem:[#allocation12 + $0x1c4] ss:$8 sps:$4 sm:$0xff]   ;;  %v4780_v22 = vld [vmem:[#allocation12 + $0xc0] ss:$8 sps:$4 sm:$0xff]  }
 0x823   : > { %2741 = vmatprep.subr.bf16.mxu0 %v4229_v23  ;;  %2782 = vmatprep.subr.bf16.mxu1 %v4231_v24  ;;  %v4783_v23 = vld [vmem:[#allocation12 + $0x1c0] ss:$8 sps:$4 sm:$0xff]   ;;  %v4788_v24 = vld [vmem:[#allocation12 + $0xd4] ss:$8 sps:$4 sm:$0xff]  }
 0x826   : > { %2742 = vmatpush1.bf16.msra.mxu0 %v4228_v25  ;;  %2783 = vmatpush1.bf16.msra.mxu1 %v4230_v26  ;;  %v4791_v25 = vld [vmem:[#allocation12 + $0x1d4] ss:$8 sps:$4 sm:$0xff]   ;;  %v4786_v26 = vld [vmem:[#allocation12 + $0xd0] ss:$8 sps:$4 sm:$0xff]  }
 0x827   : > { %3645 = vmatprep.subr.bf16.mxu0 %v4710_v27  ;;  %3686 = vmatprep.subr.bf16.mxu1 %v4713_v28  ;;  %v4789_v27 = vld [vmem:[#allocation12 + $0x1d0] ss:$8 sps:$4 sm:$0xff]   ;;  %v4794_v28 = vld [vmem:[#allocation12 + $0xe4] ss:$8 sps:$4 sm:$0xff]  }
 0x829   : > { %2744 = vmatmul.mubr.bf16.vlgmr.msra.gmra.mrb[20].mxu0 %v5635_v17  ;;  %2785 = vmatmul.mubr.bf16.vlgmr.msra.gmra.mrb[20].mxu1 %v5635_v17  ;;  %v4729_v17 = vld [vmem:[#allocation12 + $0x130] ss:$8 sps:$4 sm:$0xff]  }
 0x82a   : > { %3646 = vmatpush1.bf16.msra.mxu0 %v4708_v1  ;;  %3687 = vmatpush1.bf16.msra.mxu1 %v4711_v29  ;;  %v4797_v1 = vld [vmem:[#allocation12 + $0x1e4] ss:$8 sps:$4 sm:$0xff]   ;;  %v4792_v29 = vld [vmem:[#allocation12 + $0xe0] ss:$8 sps:$4 sm:$0xff]  }
 0x82b   : > { %3647 = vmatprep.subr.bf16.mxu0 %v4716_v30  ;;  %3688 = vmatprep.subr.bf16.mxu1 %v4719_v31  ;;  %v4795_v30 = vld [vmem:[#allocation12 + $0x1e0] ss:$8 sps:$4 sm:$0xff]   ;;  %v4800_v31 = vld [vmem:[#allocation12 + $0xf4] ss:$8 sps:$4 sm:$0xff]  }
 0x82e   : > { %3648 = vmatpush1.bf16.msra.mxu0 %v4714_v2  ;;  %3689 = vmatpush1.bf16.msra.mxu1 %v4717_v34  ;;  %v4803_v2 = vld [vmem:[#allocation12 + $0x1f4] ss:$8 sps:$4 sm:$0xff]   ;;  %v4798_v34 = vld [vmem:[#allocation12 + $0xf0] ss:$8 sps:$4 sm:$0xff]  }
 0x82f   : > { %3649 = vmatprep.subr.bf16.mxu0 %v4722_v35  ;;  %3690 = vmatprep.subr.bf16.mxu1 %v4725_v36  ;;  %v4801_v35 = vld [vmem:[#allocation12 + $0x1f0] ss:$8 sps:$4 sm:$0xff]   ;;  %v4806_v36 = vld [vmem:[#allocation12 + $0x204] ss:$8 sps:$4 sm:$0xff]  }
 0x832   : > { %3650 = vmatpush1.bf16.msra.mxu0 %v4720_v37  ;;  %3691 = vmatpush1.bf16.msra.mxu1 %v4723_v38  ;;  %v4809_v37 = vld [vmem:[#allocation12 + $0x304] ss:$8 sps:$4 sm:$0xff]  }
 0x833   : > { %3651 = vmatprep.subr.bf16.mxu0 %v4728_v39  ;;  %3692 = vmatprep.subr.bf16.mxu1 %v4731_v40  ;;  %v5644_v38 = vld [vmem:[%s5783_s21] sm:$0xff]  ;;  %s3821_s21 = scalar_lea.sflag [#allocation5], %s5513_s12 }
 0x834   : > { %v1952_v39 = vrot.slane %v5644_v38, %v5557_v20  ;;  %v1960_v40 = vrot.slane %v5644_v38, %v687_v6 }
 0x836   : > { %3652 = vmatpush1.bf16.msra.mxu0 %v4726_v41  ;;  %3693 = vmatpush1.bf16.msra.mxu1 %v4729_v17  ;;  %v1956_v41 = vrot.slane %v5644_v38, %v5554_v19  ;;  %v1964_v17 = vrot.slane %v5644_v38, %v691_v8 }
 0x837   : > { %3653 = vmatprep.subr.bf16.mxu0 %v4734_v42  ;;  %3694 = vmatprep.subr.bf16.mxu1 %v4737_v43 }
 0x83a   : > { %3654 = vmatpush1.bf16.msra.mxu0 %v4732_v44  ;;  %3695 = vmatpush1.bf16.msra.mxu1 %v4735_v45 }
 0x83b   : > { %3655 = vmatprep.subr.bf16.mxu0 %v4740_v46  ;;  %3696 = vmatprep.subr.bf16.mxu1 %v4743_v47 }
 0x83e   : > { %3656 = vmatpush1.bf16.msra.mxu0 %v4738_v48  ;;  %3697 = vmatpush1.bf16.msra.mxu1 %v4741_v49 }
 0x83f   : > { %3657 = vmatprep.subr.bf16.mxu0 %v4746_v50  ;;  %3698 = vmatprep.subr.bf16.mxu1 %v4749_v51 }
 0x842   : > { %3658 = vmatpush1.bf16.msra.mxu0 %v4744_v52  ;;  %3699 = vmatpush1.bf16.msra.mxu1 %v4747_v53 }
 0x843   : > { %3659 = vmatprep.subr.bf16.mxu0 %v4752_v56  ;;  %3700 = vmatprep.subr.bf16.mxu1 %v4755_v57 }
 0x846   : > { %3660 = vmatpush1.bf16.msra.mxu0 %v4750_v58  ;;  %3701 = vmatpush1.bf16.msra.mxu1 %v4753_v59 }
 0x847   : > { %3661 = vmatprep.subr.bf16.mxu0 %v4758_v60  ;;  %3702 = vmatprep.subr.bf16.mxu1 %v4761_v61 }
 0x84a   : > { %3662 = vmatpush1.bf16.msra.mxu0 %v4756_v62  ;;  %3703 = vmatpush1.bf16.msra.mxu1 %v4759_v63 }
 0x84b   : > { %3663 = vmatprep.subr.bf16.mxu0 %v4764_v0  ;;  %3704 = vmatprep.subr.bf16.mxu1 %v4767_v3 }
 0x84e   : > { %3664 = vmatpush1.bf16.msra.mxu0 %v4762_v4  ;;  %3705 = vmatpush1.bf16.msra.mxu1 %v4765_v5 }
 0x84f   : > { %3665 = vmatprep.subr.bf16.mxu0 %v4770_v7  ;;  %3706 = vmatprep.subr.bf16.mxu1 %v4773_v9 }
 0x852   : > { %3666 = vmatpush1.bf16.msra.mxu0 %v4768_v10  ;;  %3707 = vmatpush1.bf16.msra.mxu1 %v4771_v11 }
 0x853   : > { %3667 = vmatprep.subr.bf16.mxu0 %v4776_v13  ;;  %3708 = vmatprep.subr.bf16.mxu1 %v4779_v15 }
 0x856   : > { %3668 = vmatpush1.bf16.msra.mxu0 %v4774_v16  ;;  %3709 = vmatpush1.bf16.msra.mxu1 %v4777_v21 }
 0x857   : > { %3669 = vmatprep.subr.bf16.mxu0 %v4782_v54  ;;  %3710 = vmatprep.subr.bf16.mxu1 %v4785_v55 }
 0x85a   : > { %3670 = vmatpush1.bf16.msra.mxu0 %v4780_v22  ;;  %3711 = vmatpush1.bf16.msra.mxu1 %v4783_v23  ;;  %v4804_v23 = vld [vmem:[#allocation12 + $0x200] ss:$8 sps:$4 sm:$0xff]  }
 0x85b   : > { %3671 = vmatprep.subr.bf16.mxu0 %v4788_v24  ;;  %3712 = vmatprep.subr.bf16.mxu1 %v4791_v25 }
 0x85e   : > { %3672 = vmatpush1.bf16.msra.mxu0 %v4786_v26  ;;  %3713 = vmatpush1.bf16.msra.mxu1 %v4789_v27  ;;  %v4807_v26 = vld [vmem:[#allocation12 + $0x300] ss:$8 sps:$4 sm:$0xff]   ;;  %v4812_v27 = vld [vmem:[#allocation12 + $0x214] ss:$8 sps:$4 sm:$0xff]  }
 0x85f   : > { %3673 = vmatprep.subr.bf16.mxu0 %v4794_v28  ;;  %3714 = vmatprep.subr.bf16.mxu1 %v4797_v1  ;;  %v4815_v1 = vld [vmem:[#allocation12 + $0x314] ss:$8 sps:$4 sm:$0xff]  }
 0x862   : > { %3674 = vmatpush1.bf16.msra.mxu0 %v4792_v29  ;;  %3715 = vmatpush1.bf16.msra.mxu1 %v4795_v30  ;;  %v4810_v29 = vld [vmem:[#allocation12 + $0x210] ss:$8 sps:$4 sm:$0xff]  }
 0x863   : > { %3675 = vmatprep.subr.bf16.mxu0 %v4800_v31  ;;  %3716 = vmatprep.subr.bf16.mxu1 %v4803_v2  ;;  %v4813_v30 = vld [vmem:[#allocation12 + $0x310] ss:$8 sps:$4 sm:$0xff]   ;;  %v4818_v31 = vld [vmem:[#allocation12 + $0x224] ss:$8 sps:$4 sm:$0xff]  }
 0x864   : > { %v4821_v2 = vld [vmem:[#allocation12 + $0x324] ss:$8 sps:$4 sm:$0xff]  }
 0x866   : > { %3676 = vmatpush1.bf16.msra.mxu0 %v4798_v34  ;;  %3717 = vmatpush1.bf16.msra.mxu1 %v4801_v35  ;;  %v4816_v34 = vld [vmem:[#allocation12 + $0x220] ss:$8 sps:$4 sm:$0xff]  }
 0x867   : > { %3727 = vmatprep.subr.bf16.mxu0 %v4806_v36  ;;  %3768 = vmatprep.subr.bf16.mxu1 %v4809_v37  ;;  %v4819_v35 = vld [vmem:[#allocation12 + $0x320] ss:$8 sps:$4 sm:$0xff]   ;;  %v4824_v36 = vld [vmem:[#allocation12 + $0x234] ss:$8 sps:$4 sm:$0xff]  }
 0x868   : > { %v4827_v37 = vld [vmem:[#allocation12 + $0x334] ss:$8 sps:$4 sm:$0xff]  }
 0x8bc   : > { %v2663_v42 = vpop.f32.mrb[16].mxu0  ;;  %v2704_v43 = vpop.f32.mrb[16].mxu1 }
 0x8bd   : > { %v2664_v44 = vadd.f32 %v2663_v42, %v1952_v39  ;;  %v2705_v45 = vadd.f32 %v2704_v43, %v1960_v40  ;;  %v2665_v46 = vpop.f32.mrb[17].mxu0  ;;  %v2706_v47 = vpop.f32.mrb[17].mxu1  ;;  %v4822_v39 = vld [vmem:[#allocation12 + $0x230] ss:$8 sps:$4 sm:$0xff]   ;;  %v4828_v42 = vld [vmem:[#allocation12 + $0x240] ss:$8 sps:$4 sm:$0xff]  }
 0x8be   : > { %v2666_v48 = vadd.f32 %v2665_v46, %v1956_v41  ;;  %v2707_v49 = vadd.f32 %v2706_v47, %v1964_v17  ;;  %v2667_v50 = vpop.f32.mrb[18].mxu0  ;;  %v2708_v51 = vpop.f32.mrb[18].mxu1  ;;  %v4825_v40 = vld [vmem:[#allocation12 + $0x330] ss:$8 sps:$4 sm:$0xff]   ;;  %v4830_v41 = vld [vmem:[#allocation12 + $0x244] ss:$8 sps:$4 sm:$0xff]  }
 0x8bf   : > { %v4232_v52 = vmul.f32 -1.702, %v2664_v44  ;;  %v4234_v53 = vmul.f32 -1.702, %v2705_v45  ;;  %v2668_v6 = vpop.f32.mrb[19].mxu0  ;;  %v2709_v56 = vpop.f32.mrb[19].mxu1 }
 0x8c0   : > { %v4233_v57 = vmul.f32 -1.702, %v2666_v48  ;;  %v4235_v58 = vmul.f32 -1.702, %v2707_v49  ;;  %v4833_v17 = vld [vmem:[#allocation12 + $0x344] ss:$8 sps:$4 sm:$0xff]   ;;  %v1968_v56 = vrot.slane %v5644_v38, %v695_v32 }
 0x8c1   : > { %v2809_v59 = vmul.f32 1.442695, %v4232_v52  ;;  %v2813_v60 = vmul.f32 1.442695, %v4234_v53  ;;  %v4831_v43 = vld [vmem:[#allocation12 + $0x340] ss:$8 sps:$4 sm:$0xff]  }
 0x8c2   : > { %v2811_v61 = vmul.f32 1.442695, %v4233_v57  ;;  %v2815_v8 = vmul.f32 1.442695, %v4235_v58  ;;  %v4834_v46 = vld [vmem:[#allocation12 + $0x250] ss:$8 sps:$4 sm:$0xff]  }
 0x8c3   : > { %4912 = vpow2.f32 %v2809_v59  ;;  %v4837_v47 = vld [vmem:[#allocation12 + $0x350] ss:$8 sps:$4 sm:$0xff]   ;;  %v1975_v50 = vsub.s32 6, %v5551_v18  ;;  %v1979_v51 = vsub.s32 7, %v5551_v18  ;;  %v4840_v52 = vld [vmem:[#allocation12 + $0x260] ss:$8 sps:$4 sm:$0xff]   ;;  %v1972_v59 = vrot.slane %v5644_v38, %v699_v33 }
 0x8c4   : > { %4914 = vpow2.f32 %v2813_v60  ;;  %v4843_v53 = vld [vmem:[#allocation12 + $0x360] ss:$8 sps:$4 sm:$0xff]   ;;  %v4848_v6 = vld [vmem:[#allocation12 + $0x274] ss:$8 sps:$4 sm:$0xff]   ;;  %v4857_v18 = vld [vmem:[#allocation12 + $0x384] ss:$8 sps:$4 sm:$0xff]  }
 0x8c5   : > { %4916 = vpow2.f32 %v2811_v61  ;;  %v1976_v57 = vrot.slane %v5644_v38, %v1975_v50  ;;  %v4851_v58 = vld [vmem:[#allocation12 + $0x374] ss:$8 sps:$4 sm:$0xff]   ;;  %v1980_v60 = vrot.slane %v5644_v38, %v1979_v51  ;;  %v4846_v61 = vld [vmem:[#allocation12 + $0x270] ss:$8 sps:$4 sm:$0xff]  }
 0x8c6   : > { %4918 = vpow2.f32 %v2815_v8  ;;  %v4887_v51 = vld [vmem:[#allocation12 + $0x3d4] ss:$8 sps:$4 sm:$0xff]  }
 0x8cd   : > { %v4913_v62 = vpop.eup %4912 }
 0x8ce   : > { %v4915_v63 = vpop.eup %4914  ;;  %v2825_v0 = vadd.f32 1.0, %v4913_v62 }
 0x8cf   : > { %v4917_v3 = vpop.eup %4916  ;;  %v2827_v4 = vadd.f32 1.0, %v4915_v63  ;;  %v4849_v63 = vld [vmem:[#allocation12 + $0x370] ss:$8 sps:$4 sm:$0xff]  }
 0x8d0   : > { %v4919_v5 = vpop.eup %4918  ;;  %4920 = vrcp.f32 %v2825_v0  ;;  %v2826_v7 = vadd.f32 1.0, %v4917_v3  ;;  %v4854_v0 = vld [vmem:[#allocation12 + $0x284] ss:$8 sps:$4 sm:$0xff]  }
 0x8d1   : > { %4922 = vrcp.f32 %v2827_v4  ;;  %v2828_v9 = vadd.f32 1.0, %v4919_v5 }
 0x8d2   : > { %4924 = vrcp.f32 %v2826_v7 }
 0x8d3   : > { %4926 = vrcp.f32 %v2828_v9 }
 0x8da   : > { %v4921_v10 = vpop.eup %4920 }
 0x8db   : > { %v4923_v11 = vpop.eup %4922  ;;  %v2849_v15 = vmul.f32 %v4921_v10, %v2664_v44  ;;  %v4836_v44 = vld [vmem:[#allocation12 + $0x254] ss:$8 sps:$4 sm:$0xff]   ;;  %v4852_v10 = vld [vmem:[#allocation12 + $0x280] ss:$8 sps:$4 sm:$0xff]  }
 0x8dc   : > { %v4925_v13 = vpop.eup %4924  ;;  %v2851_v21 = vmul.f32 %v4923_v11, %v2705_v45  ;;  %v4839_v45 = vld [vmem:[#allocation12 + $0x354] ss:$8 sps:$4 sm:$0xff]   ;;  %v4855_v11 = vld [vmem:[#allocation12 + $0x380] ss:$8 sps:$4 sm:$0xff]  }
 0x8dd   : > { %v4927_v16 = vpop.eup %4926  ;;  %v2850_v54 = vmul.f32 %v4925_v13, %v2666_v48  ;;  %v2857_v24 = vpack.c.bf16 %v2849_v15, %v2849_v15  ;;  %v4842_v48 = vld [vmem:[#allocation12 + $0x264] ss:$8 sps:$4 sm:$0xff]  }
 0x8de   : > { %v2852_v55 = vmul.f32 %v4927_v16, %v2707_v49  ;;  %v2859_v28 = vpack.c.bf16 %v2851_v21, %v2851_v21  ;;  %v4845_v49 = vld [vmem:[#allocation12 + $0x364] ss:$8 sps:$4 sm:$0xff]  }
 0x8df   : > { %v2858_v22 = vpack.c.bf16 %v2850_v54, %v2850_v54 }
 0x8e0   : > { %v2860_v25 = vpack.c.bf16 %v2852_v55, %v2852_v55 }
 0x8e1   : > { %3677 = vmatprep.mubr.bf16.mxu0 %v2858_v22  ;;  %v4860_v22 = vld [vmem:[#allocation12 + $0x294] ss:$8 sps:$4 sm:$0xff]  }
 0x8e2   : > { %3718 = vmatprep.mubr.bf16.mxu1 %v2860_v25  ;;  %3678 = vmatmul.mubr.bf16.vlgmr.msra.gmra.mrb[24].mxu0 %v2857_v24  ;;  %v4863_v25 = vld [vmem:[#allocation12 + $0x394] ss:$8 sps:$4 sm:$0xff]  }
 0x8e3   : > { %3719 = vmatmul.mubr.bf16.vlgmr.msra.gmra.mrb[24].mxu1 %v2859_v28  ;;  %3728 = vmatpush1.bf16.msra.mxu0 %v4804_v23  ;;  %v4858_v28 = vld [vmem:[#allocation12 + $0x290] ss:$8 sps:$4 sm:$0xff]  }
 0x8e4   : > { %3769 = vmatpush1.bf16.msra.mxu1 %v4807_v26  ;;  %3729 = vmatprep.subr.bf16.mxu0 %v4812_v27 }
 0x8e5   : > { %3770 = vmatprep.subr.bf16.mxu1 %v4815_v1  ;;  %v4861_v1 = vld [vmem:[#allocation12 + $0x390] ss:$8 sps:$4 sm:$0xff]  }
 0x8e7   : > { %3730 = vmatpush1.bf16.msra.mxu0 %v4810_v29  ;;  %v4866_v29 = vld [vmem:[#allocation12 + $0x2a4] ss:$8 sps:$4 sm:$0xff]  }
 0x8e8   : > { %3771 = vmatpush1.bf16.msra.mxu1 %v4813_v30  ;;  %3731 = vmatprep.subr.bf16.mxu0 %v4818_v31  ;;  %v4869_v30 = vld [vmem:[#allocation12 + $0x3a4] ss:$8 sps:$4 sm:$0xff]   ;;  %v4864_v31 = vld [vmem:[#allocation12 + $0x2a0] ss:$8 sps:$4 sm:$0xff]  }
 0x8e9   : > { %3772 = vmatprep.subr.bf16.mxu1 %v4821_v2  ;;  %v4867_v2 = vld [vmem:[#allocation12 + $0x3a0] ss:$8 sps:$4 sm:$0xff]  }
 0x8eb   : > { %3732 = vmatpush1.bf16.msra.mxu0 %v4816_v34  ;;  %v4872_v34 = vld [vmem:[#allocation12 + $0x2b4] ss:$8 sps:$4 sm:$0xff]  }
 0x8ec   : > { %3773 = vmatpush1.bf16.msra.mxu1 %v4819_v35  ;;  %3733 = vmatprep.subr.bf16.mxu0 %v4824_v36  ;;  %v4875_v35 = vld [vmem:[#allocation12 + $0x3b4] ss:$8 sps:$4 sm:$0xff]   ;;  %v4870_v36 = vld [vmem:[#allocation12 + $0x2b0] ss:$8 sps:$4 sm:$0xff]  }
 0x8ed   : > { %3774 = vmatprep.subr.bf16.mxu1 %v4827_v37  ;;  %v4873_v37 = vld [vmem:[#allocation12 + $0x3b0] ss:$8 sps:$4 sm:$0xff]  }
 0x8ef   : > { %3734 = vmatpush1.bf16.msra.mxu0 %v4822_v39  ;;  %v4878_v39 = vld [vmem:[#allocation12 + $0x2c4] ss:$8 sps:$4 sm:$0xff]  }
 0x8f0   : > { %3775 = vmatpush1.bf16.msra.mxu1 %v4825_v40  ;;  %3735 = vmatprep.subr.bf16.mxu0 %v4830_v41  ;;  %v4881_v41 = vld [vmem:[#allocation12 + $0x3c4] ss:$8 sps:$4 sm:$0xff]  }
 0x8f1   : > { %3776 = vmatprep.subr.bf16.mxu1 %v4833_v17 }
 0x8f3   : > { %3736 = vmatpush1.bf16.msra.mxu0 %v4828_v42 }
 0x8f4   : > { %3777 = vmatpush1.bf16.msra.mxu1 %v4831_v43  ;;  %3737 = vmatprep.subr.bf16.mxu0 %v4836_v44 }
 0x8f5   : > { %3778 = vmatprep.subr.bf16.mxu1 %v4839_v45  ;;  %v4876_v45 = vld [vmem:[#allocation12 + $0x2c0] ss:$8 sps:$4 sm:$0xff]  }
 0x8f7   : > { %3738 = vmatpush1.bf16.msra.mxu0 %v4834_v46 }
 0x8f8   : > { %3779 = vmatpush1.bf16.msra.mxu1 %v4837_v47  ;;  %3739 = vmatprep.subr.bf16.mxu0 %v4842_v48  ;;  %v4879_v48 = vld [vmem:[#allocation12 + $0x3c0] ss:$8 sps:$4 sm:$0xff]  }
 0x8f9   : > { %3780 = vmatprep.subr.bf16.mxu1 %v4845_v49  ;;  %v4884_v49 = vld [vmem:[#allocation12 + $0x2d4] ss:$8 sps:$4 sm:$0xff]  }
 0x8fb   : > { %3740 = vmatpush1.bf16.msra.mxu0 %v4840_v52  ;;  %v4882_v52 = vld [vmem:[#allocation12 + $0x2d0] ss:$8 sps:$4 sm:$0xff]  }
 0x8fc   : > { %3781 = vmatpush1.bf16.msra.mxu1 %v4843_v53  ;;  %v2745_v8 = vpop.f32.mrb[20].mxu0  ;;  %v2786_v62 = vpop.f32.mrb[20].mxu1  ;;  %3741 = vmatprep.subr.bf16.mxu0 %v4848_v6  ;;  %v4885_v53 = vld [vmem:[#allocation12 + $0x3d0] ss:$8 sps:$4 sm:$0xff]   ;;  %v4890_v6 = vld [vmem:[#allocation12 + $0x2e4] ss:$8 sps:$4 sm:$0xff]  }
 0x8fd   : > { %v5666_v3 = vadd.f32 %v2745_v8, %v1968_v56  ;;  %v5668_v32 = vadd.f32 %v2786_v62, %v1976_v57  ;;  %v2747_v4 = vpop.f32.mrb[21].mxu0  ;;  %v2788_v5 = vpop.f32.mrb[21].mxu1  ;;  %3782 = vmatprep.subr.bf16.mxu1 %v4851_v58  ;;  %v4893_v56 = vld [vmem:[#allocation12 + $0x3e4] ss:$8 sps:$4 sm:$0xff]   ;;  %v4888_v57 = vld [vmem:[#allocation12 + $0x2e0] ss:$8 sps:$4 sm:$0xff]  }
 0x8fe   : > { %v5670_v7 = vadd.f32 %v2747_v4, %v1972_v59  ;;  %v5672_v33 = vadd.f32 %v2788_v5, %v1980_v60  ;;  %v2749_v38 = vpop.f32.mrb[22].mxu0  ;;  %v2790_v9 = vpop.f32.mrb[22].mxu1  ;;  %v4891_v58 = vld [vmem:[#allocation12 + $0x3e0] ss:$8 sps:$4 sm:$0xff]   ;;  %v4896_v59 = vld [vmem:[#allocation12 + $0x2f4] ss:$8 sps:$4 sm:$0xff]  }
 0x8ff   : > { %v4236_v13 = vmul.f32 -1.702, %v5666_v3  ;;  %v4238_v15 = vmul.f32 -1.702, %v5668_v32  ;;  %3742 = vmatpush1.bf16.msra.mxu0 %v4846_v61  ;;  %v2750_v16 = vpop.f32.mrb[23].mxu0  ;;  %v2791_v21 = vpop.f32.mrb[23].mxu1 }
 0x900   : > { %v4237_v54 = vmul.f32 -1.702, %v5670_v7  ;;  %v4239_v55 = vmul.f32 -1.702, %v5672_v33  ;;  %3783 = vmatpush1.bf16.msra.mxu1 %v4849_v63  ;;  %3743 = vmatprep.subr.bf16.mxu0 %v4854_v0  ;;  %v4899_v60 = vld [vmem:[#allocation12 + $0x3f4] ss:$8 sps:$4 sm:$0xff]  }
 0x901   : > { %v2817_v23 = vmul.f32 1.442695, %v4236_v13  ;;  %v2821_v24 = vmul.f32 1.442695, %v4238_v15  ;;  %3784 = vmatprep.subr.bf16.mxu1 %v4857_v18  ;;  %v4894_v62 = vld [vmem:[#allocation12 + $0x2f0] ss:$8 sps:$4 sm:$0xff]  }
 0x902   : > { %v2819_v26 = vmul.f32 1.442695, %v4237_v54  ;;  %v2823_v27 = vmul.f32 1.442695, %v4239_v55  ;;  %v4897_v4 = vld [vmem:[#allocation12 + $0x3f0] ss:$8 sps:$4 sm:$0xff]  }
 0x903   : > { %4928 = vpow2.f32 %v2817_v23  ;;  %3744 = vmatpush1.bf16.msra.mxu0 %v4852_v10 }
 0x904   : > { %4930 = vpow2.f32 %v2821_v24  ;;  %3785 = vmatpush1.bf16.msra.mxu1 %v4855_v11  ;;  %3745 = vmatprep.subr.bf16.mxu0 %v4860_v22 }
 0x905   : > { %4932 = vpow2.f32 %v2819_v26  ;;  %3786 = vmatprep.subr.bf16.mxu1 %v4863_v25 }
 0x906   : > { %4934 = vpow2.f32 %v2823_v27 }
 0x907   : > { %3746 = vmatpush1.bf16.msra.mxu0 %v4858_v28 }
 0x908   : > { %3787 = vmatpush1.bf16.msra.mxu1 %v4861_v1  ;;  %3747 = vmatprep.subr.bf16.mxu0 %v4866_v29 }
 0x909   : > { %3788 = vmatprep.subr.bf16.mxu1 %v4869_v30 }
 0x90b   : > { %3748 = vmatpush1.bf16.msra.mxu0 %v4864_v31 }
 0x90c   : > { %3789 = vmatpush1.bf16.msra.mxu1 %v4867_v2  ;;  %3749 = vmatprep.subr.bf16.mxu0 %v4872_v34 }
 0x90d   : > { %v4929_v40 = vpop.eup %4928  ;;  %3790 = vmatprep.subr.bf16.mxu1 %v4875_v35 }
 0x90e   : > { %v4931_v17 = vpop.eup %4930  ;;  %v2829_v42 = vadd.f32 1.0, %v4929_v40 }
 0x90f   : > { %v4933_v43 = vpop.eup %4932  ;;  %v2831_v44 = vadd.f32 1.0, %v4931_v17  ;;  %3750 = vmatpush1.bf16.msra.mxu0 %v4870_v36 }
 0x910   : > { %v4935_v46 = vpop.eup %4934  ;;  %4936 = vrcp.f32 %v2829_v42  ;;  %v2830_v47 = vadd.f32 1.0, %v4933_v43  ;;  %3791 = vmatpush1.bf16.msra.mxu1 %v4873_v37  ;;  %3751 = vmatprep.subr.bf16.mxu0 %v4878_v39 }
 0x911   : > { %4938 = vrcp.f32 %v2831_v44  ;;  %v2832_v50 = vadd.f32 1.0, %v4935_v46  ;;  %3792 = vmatprep.subr.bf16.mxu1 %v4881_v41 }
 0x912   : > { %4940 = vrcp.f32 %v2830_v47 }
 0x913   : > { %4942 = vrcp.f32 %v2832_v50  ;;  %3752 = vmatpush1.bf16.msra.mxu0 %v4876_v45 }
 0x914   : > { %3793 = vmatpush1.bf16.msra.mxu1 %v4879_v48  ;;  %3753 = vmatprep.subr.bf16.mxu0 %v4884_v49 }
 0x915   : > { %3794 = vmatprep.subr.bf16.mxu1 %v4887_v51 }
 0x917   : > { %3754 = vmatpush1.bf16.msra.mxu0 %v4882_v52 }
 0x918   : > { %3795 = vmatpush1.bf16.msra.mxu1 %v4885_v53  ;;  %3755 = vmatprep.subr.bf16.mxu0 %v4890_v6 }
 0x919   : > { %3796 = vmatprep.subr.bf16.mxu1 %v4893_v56 }
 0x91a   : > { %v4937_v61 = vpop.eup %4936 }
 0x91b   : > { %v4939_v8 = vpop.eup %4938  ;;  %3756 = vmatpush1.bf16.msra.mxu0 %v4888_v57  ;;  %v2853_v0 = vmul.f32 %v4937_v61, %v5666_v3  ;;  %v2993_v3 = vld [vmem:[%s5784_s20] sm:$0x3] }
 0x91c   : > { %v4941_v63 = vpop.eup %4940  ;;  %3797 = vmatpush1.bf16.msra.mxu1 %v4891_v58  ;;  %3757 = vmatprep.subr.bf16.mxu0 %v4896_v59  ;;  %v2855_v18 = vmul.f32 %v4939_v8, %v5668_v32  ;;  %v2998_v32 = vrot.slane %v2993_v3, %v5557_v20 }
 0x91d   : > { %v4943_v5 = vpop.eup %4942  ;;  %v2854_v38 = vmul.f32 %v4941_v63, %v5670_v7  ;;  %3798 = vmatprep.subr.bf16.mxu1 %v4899_v60  ;;  %v2861_v11 = vpack.c.bf16 %v2853_v0, %v2853_v0  ;;  %v3002_v7 = vrot.slane %v2993_v3, %v5554_v19 }
 0x91e   : > { %v2856_v9 = vmul.f32 %v4943_v5, %v5672_v33  ;;  %v2863_v15 = vpack.c.bf16 %v2855_v18, %v2855_v18 }
 0x91f   : > { %v2862_v10 = vpack.c.bf16 %v2854_v38, %v2854_v38  ;;  %3758 = vmatpush1.bf16.msra.mxu0 %v4894_v62 }
 0x920   : > { %v2864_v13 = vpack.c.bf16 %v2856_v9, %v2856_v9  ;;  %3799 = vmatpush1.bf16.msra.mxu1 %v4897_v4 }
 0x921   : > { %3759 = vmatprep.mubr.bf16.mxu0 %v2862_v10 }
 0x922   : > { %3800 = vmatprep.mubr.bf16.mxu1 %v2864_v13  ;;  %3760 = vmatmul.mubr.bf16.vlgmr.msra.gmra.mrb[28].mxu0 %v2861_v11 }
 0x923   : > { %3801 = vmatmul.mubr.bf16.vlgmr.msra.gmra.mrb[28].mxu1 %v2863_v15 }
 0x9b5   : > { %v3679_v16 = vpop.f32.mrb[24].mxu0 }
 0x9b6   : > { %v3680_v33 = vadd.f32 %v3679_v16, %v2998_v32  ;;  %v3720_v21 = vpop.f32.mrb[24].mxu1  ;;  %v3681_v54 = vpop.f32.mrb[25].mxu0 }
 0x9b7   : > { %v3682_v55 = vadd.f32 %v3681_v54, %v3002_v7  ;;  %v3722_v22 = vpop.f32.mrb[25].mxu1  ;;  %v3683_v23 = vpop.f32.mrb[26].mxu0 }
 0x9b8   : > { %v3721_v24 = vadd.f32 %v3720_v21, %v3680_v33  ;;  %v3724_v25 = vpop.f32.mrb[26].mxu1  ;;  %v3684_v26 = vpop.f32.mrb[27].mxu0 }
 0x9b9   : > { %v3723_v27 = vadd.f32 %v3722_v22, %v3682_v55  ;;  %v3725_v28 = vpop.f32.mrb[27].mxu1 }
 0x9f5   : > { %v3761_v1 = vpop.f32.mrb[28].mxu0 }
 0x9f6   : > { %v3762_v29 = vadd.f32 %v3761_v1, %v3721_v24  ;;  %v3802_v30 = vpop.f32.mrb[28].mxu1  ;;  %v3763_v20 = vpop.f32.mrb[29].mxu0 }
 0x9f7   : > { %v3764_v31 = vadd.f32 %v3763_v20, %v3723_v27  ;;  %v3804_v19 = vpop.f32.mrb[29].mxu1  ;;  %v3765_v2 = vpop.f32.mrb[30].mxu0 }
 0x9f8   : > { %v3803_v34 = vadd.f32 %v3802_v30, %v3762_v29  ;;  %v3806_v35 = vpop.f32.mrb[30].mxu1  ;;  %v3766_v36 = vpop.f32.mrb[31].mxu0 }
 0x9f9   : > { %v3805_v37 = vadd.f32 %v3804_v19, %v3764_v31  ;;  %v3807_v39 = vpop.f32.mrb[31].mxu1 }
 0x9fa   : > { %v3809_v40 = vadd.f32 %v3803_v34, %v5606_v12 }
 0x9fb   : > { %v3810_v41 = vadd.f32 %v3805_v37, %v5609_v14 }
 0x9fd   : > { %v4375_v17 = vpack.c.bf16 %v3810_v41, %v3809_v40 }
 0x9ff   : > { %3819 = vst [vmem:[%s527_s30] sm:$0xff] %v4375_v17 }
 0xa00   : > { %5127 = shalt.err (!%p5124_p3)
}
 0xa01   : > { %s5128_s12 = scalar_lea.hbm %s5695_s8, 128  ;;  %s5132_s30 = scalar_lea.hbm %s5785_s23, 256 }
 0xa02   : > { %p5129_p6 = scmp.ne.s32.totalorder %s5695_s8, %s5128_s12  ;;  %p5133_p8 = scmp.lt.u32.totalorder %s5695_s8, %s5785_s23 }
 0xa03   : > { %p5134_p5 = scmp.lt.u32.totalorder %s5132_s30, %s5128_s12  ;;  %p5136_p7 = scmp.lt.u32.totalorder %s5128_s12, %s5695_s8 }
 0xa04   : > { %p5130_p10 = pnand %p5129_p6, %p5786_p4 }
 0xa05   : > { %p5135_p9 = por %p5134_p5, %p5133_p8 }
 0xa06   : > { %p5131_p11 = pneg %p5130_p10 }
 0xa07   : > { %p5137_p12 = por %p5136_p7, %p5135_p9 }
 0xa09   : > { %p5138_p1 = pnand %p5137_p12, %p5131_p11 }
 0xa0b   : > { %5141 = shalt.err (!%p5138_p1)
}
 0xa0c   : > { %4431 = dma.vmem_to_hbm [thread:$0]  (%p5786_p4), %s5697_s19, 128, %s5695_s8, %s3821_s21  }
 0xa0d PF: > { %s3847_s18 = sand.u32 1, %s5180_s25   ;;  %p5787_p13 = scmp.ne.s32.totalorder %s5772_s29, 0 }
 0xa0e   : > { %p5788_p0 = scmp.ge.s32.totalorder %s5192_s28, 2  ;;  %s3848_s14 = scalar_lea.sflag [#allocation5], %s3847_s18 }
 0xa10   : > { %p4454_p2 = pnand %p5788_p0, %p5787_p13 }
 0xa12   : > { %5175 = dma.done.wait (!%p4454_p2), %s3848_s14, 128  }
 0xa13   : > { %5177 = vsyncadd (!%p4454_p2), %s3848_s14, 4294967168  ;;  %p29_p3 = scmp.ge.s32.totalorder %s5443_s16, 4   ;;  %s5789_s25 = smov %s5184_s26 }
 0xa14   : > { %s5790_s26 = smov %s5188_s27  ;;  %s5791_s27 = smov %s5455_s22 }
 0xa15   : > { %s5792_s28 = smov %s5443_s16  ;;  %31 = sbr.rel (!%p29_p3) target bundleno = 14 (0xe), region = 137 }
 0xa1c   :  { %3853 = vsyncpa [#allocation4], 1 }
 0xa1d   :  { %3855 = vsyncpa [#allocation4 + $0x1], 1 }
 0xa1e   :  { %3856 = vsyncpa [#allocation7], 1 }
 0xa1f   :  { %3857 = vsyncpa [#allocation10], 1 }
 0xa20   :  { %3858 = vsyncpa [#allocation13], 1 }
 0xa21   :  { %3859 = vsyncpa [#allocation5], 1 }
 0xa22   :  { %3861 = vsyncpa [#allocation5 + $0x1], 1 }

</bundles_post_ra>
